<compile_context>
chip_gen: v5e
topology: v5e:2x2
jax: 0.10.0
libtpu: 0.0.40
codegen_flags: <defaults>
</compile_context>

<pallas_src>
import functools

import jax
import jax.numpy as jnp
from jax import lax
from jax.experimental import pallas as pl
from jax.experimental.pallas import tpu as pltpu


def _inception_kernel(xw_ref, w1_ref, w2_ref, w3_ref, o_ref,
                      c11_ref, b4a_ref, slab1_ref, slab2_ref, *, pb, wp):
    """One grid step = `batch_tile` images of the whole inception block.

    Layout: channels on sublanes, flattened working-grid positions on lanes.
    The working grid is the (Ho+4, Wo+4) output-grid-padded-by-2; flat index
    p = b*HP*WP + hp*WP + wp.  A conv tap with spatial offset (dh, dw) is then
    just a lane-shift of dh*WP + dw, i.e. a contiguous slice of a flat buffer.

    xw_ref:    (1, Cin+1, PB)  x placed on the working grid + validity-mask row
    w1_ref:    (40, Cin+1)     both 1x1 convs, bias in the last column
    w2_ref:    (48, 401)       5x5 (rows 0:24) + 3x3_1 (rows 24:48) over the
                               25-tap x 16-ch slab, bias in column 400
    w3_ref:    (24, 217)       3x3_2 over the 9-tap x 24-ch slab, bias in col 216
    o_ref:     (1, 88, PB)     concatenated output on the working grid
    c11_ref:   (16, PB+2*PAD)  c11 with PAD lead/trail lanes for shifted reads
    b4a_ref:   (24, PB+2*PAD)  b4a with PAD lead/trail lanes
    slab1_ref: (401, PB)       im2col slab for the 5x5 / 3x3_1 taps (+mask row)
    slab2_ref: (217, PB)       im2col slab for the 3x3_2 taps (+mask row)
    """
    f32 = jnp.float32
    pad = 2 * wp + 2  # flat reach of the 5x5 window

    def mm(w, x):  # (Co, K) @ (K, PB) -> (Co, PB), f32 accumulation on the MXU
        return lax.dot_general(w, x, (((1,), (0,)), ((), ())),
                               preferred_element_type=f32)

    xw = xw_ref[0].astype(f32)          # (Cin+1, PB); last row = validity mask
    vmask = xw[-1:, :]                   # (1, PB)

    # Zero only the lead/trail border strips (never the full buffers).  Needed
    # so masked-out ring values stay finite (NaN * 0 == NaN).  Done every grid
    # step on purpose: with dimension_semantics=("parallel",) on v7x megacore,
    # gating on program_id(0) == 0 would leave core 1 with stale garbage.
    c11_ref[:, 0:pad] = jnp.zeros((16, pad), f32)
    c11_ref[:, pad + pb:pad + pb + pad] = jnp.zeros((16, pad), f32)
    b4a_ref[:, 0:pad] = jnp.zeros((24, pad), f32)
    b4a_ref[:, pad + pb:pad + pb + pad] = jnp.zeros((24, pad), f32)

    # ---- matmul 1: both 1x1 convs at once; bias rides on the mask channel ----
    t1 = mm(w1_ref[...], xw)                                  # (40, PB)
    o_ref[0, 0:24, :] = t1[0:24, :].astype(o_ref.dtype)       # branch1
    o_ref[0, 24:40, :] = t1[24:40, :].astype(o_ref.dtype)     # branch2 (= c11)
    # c11 on the working grid: already exactly zero outside the valid region
    # (x is zero there and the bias is multiplied by the mask channel).
    c11_ref[:, pad:pad + pb] = t1[24:40, :]

    # ---- im2col slab over c11: 25 taps x 16 ch (+ mask row for the biases) ---
    for kh in range(5):
        for kw in range(5):
            t = kh * 5 + kw
            slab1_ref[t * 16:(t + 1) * 16, :] = c11_ref[:, pl.ds(kh * wp + kw, pb)]
    slab1_ref[400:401, :] = vmask

    # ---- matmul 2: branch3 (5x5) and conv_3x3_1 (-> b4a) in one deep dot -----
    t2 = mm(w2_ref[...], slab1_ref[...])                      # (48, PB)
    o_ref[0, 40:64, :] = t2[0:24, :].astype(o_ref.dtype)      # branch3
    # b4a must be exactly zero outside the valid region (it is the zero padding
    # of the next conv), hence the single sublane-broadcast mask multiply.
    b4a_ref[:, pad:pad + pb] = t2[24:48, :] * vmask

    # ---- im2col slab over b4a: 9 taps x 24 ch (+ mask row) -------------------
    for ah in range(3):
        for aw in range(3):
            t = ah * 3 + aw
            slab2_ref[t * 24:(t + 1) * 24, :] = (
                b4a_ref[:, pl.ds((wp + 1) + ah * wp + aw, pb)])
    slab2_ref[216:217, :] = vmask

    # ---- matmul 3: branch4 (conv_3x3_2) ---------------------------------------
    t3 = mm(w3_ref[...], slab2_ref[...])                      # (24, PB)
    o_ref[0, 64:88, :] = t3.astype(o_ref.dtype)


def _pick_batch_tile(n):
    # Amortize per-step overhead, but keep >= 2 grid steps for v7x megacore.
    for bt in (8, 4, 2):
        if n % bt == 0 and n // bt >= 2:
            return bt
    return 1


def init_params(key, in_channels):
    def init_conv(k, kh, kw, cin, cout):
        kw_key, kb_key = jax.random.split(k)
        fan_in = cin * kh * kw
        bound = 1.0 / jnp.sqrt(jnp.float32(fan_in))
        w = jax.random.uniform(kw_key, (kh, kw, cin, cout), jnp.float32, -bound, bound)
        b = jax.random.uniform(kb_key, (cout,), jnp.float32, -bound, bound)
        return w, b

    keys = jax.random.split(key, 5)
    p = {}
    p["w_1x1_1"], p["b_1x1_1"] = init_conv(keys[0], 1, 1, in_channels, 16)
    p["w_1x1_2"], p["b_1x1_2"] = init_conv(keys[1], 1, 1, in_channels, 24)
    p["w_3x3_1"], p["b_3x3_1"] = init_conv(keys[2], 3, 3, 16, 24)
    p["w_3x3_2"], p["b_3x3_2"] = init_conv(keys[3], 3, 3, 24, 24)
    p["w_5x5"], p["b_5x5"] = init_conv(keys[4], 5, 5, 16, 24)
    return p


def inspection_a_forward(x_nchw, params, *, batch_tile=None):
    """Forward pass of InspectionA. Input/output are NCHW like PyTorch."""
    f32 = jnp.float32
    n, cin, h, w = x_nchw.shape
    ho, wo = h + 2, w + 2            # output spatial (k=1 conv, padding=1)
    hp, wp = ho + 4, wo + 4          # working grid (output padded by 2)
    ppb = hp * wp                    # flat working positions per image
    pad = 2 * wp + 2

    bt = batch_tile if batch_tile is not None else _pick_batch_tile(n)
    assert n % bt == 0, (n, bt)
    g = n // bt
    pb = bt * ppb

    # ---- inputs: x placed on the working grid + a validity-mask channel ------
    xpad = jnp.pad(x_nchw.astype(f32), ((0, 0), (0, 0), (3, 3), (3, 3)))
    xflat = xpad.reshape(n, cin, ppb)
    row_ok = (jnp.arange(hp) >= 2) & (jnp.arange(hp) < 2 + ho)
    col_ok = (jnp.arange(wp) >= 2) & (jnp.arange(wp) < 2 + wo)
    vmask = (row_ok[:, None] & col_ok[None, :]).astype(f32).reshape(1, ppb)
    xw = jnp.concatenate([xflat, jnp.broadcast_to(vmask, (n, 1, ppb))], axis=1)
    xw = xw.reshape(g, bt, cin + 1, ppb).transpose(0, 2, 1, 3).reshape(g, cin + 1, pb)

    # ---- weights: convs rewritten as (Cout, K) matrices over the slab layout -
    w11_1 = params["w_1x1_1"].reshape(cin, 16)
    w11_2 = params["w_1x1_2"].reshape(cin, 24)
    b11_1, b11_2 = params["b_1x1_1"], params["b_1x1_2"]
    w331, b331 = params["w_3x3_1"], params["b_3x3_1"]   # (3,3,16,24)
    w332, b332 = params["w_3x3_2"], params["b_3x3_2"]   # (3,3,24,24)
    w55, b55 = params["w_5x5"], params["b_5x5"]          # (5,5,16,24)

    w1 = jnp.zeros((40, cin + 1), f32)
    w1 = w1.at[0:24, 0:cin].set(w11_2.T).at[0:24, cin].set(b11_2)
    w1 = w1.at[24:40, 0:cin].set(w11_1.T).at[24:40, cin].set(b11_1)

    w5_blk = jnp.transpose(w55, (3, 0, 1, 2)).reshape(24, 400)
    w331_blk = jnp.transpose(jnp.pad(w331, ((1, 1), (1, 1), (0, 0), (0, 0))),
                             (3, 0, 1, 2)).reshape(24, 400)
    w2 = jnp.zeros((48, 401), f32)
    w2 = w2.at[0:24, 0:400].set(w5_blk).at[0:24, 400].set(b55)
    w2 = w2.at[24:48, 0:400].set(w331_blk).at[24:48, 400].set(b331)

    w3 = jnp.zeros((24, 217), f32)
    w3 = w3.at[:, 0:216].set(jnp.transpose(w332, (3, 0, 1, 2)).reshape(24, 216))
    w3 = w3.at[:, 216].set(b332)

    kernel = functools.partial(_inception_kernel, pb=pb, wp=wp)
    out_flat = pl.pallas_call(
        kernel,
        out_shape=jax.ShapeDtypeStruct((g, 88, pb), x_nchw.dtype),
        grid=(g,),
        in_specs=[
            pl.BlockSpec((1, cin + 1, pb), lambda i: (i, 0, 0)),
            pl.BlockSpec((40, cin + 1), lambda i: (0, 0)),
            pl.BlockSpec((48, 401), lambda i: (0, 0)),
            pl.BlockSpec((24, 217), lambda i: (0, 0)),
        ],
        out_specs=pl.BlockSpec((1, 88, pb), lambda i: (i, 0, 0)),
        scratch_shapes=[
            pltpu.VMEM((16, pb + 2 * pad), f32),   # c11 on the working grid
            pltpu.VMEM((24, pb + 2 * pad), f32),   # b4a on the working grid
            pltpu.VMEM((401, pb), f32),            # im2col slab (5x5 / 3x3_1)
            pltpu.VMEM((217, pb), f32),            # im2col slab (3x3_2)
        ],
        compiler_params=pltpu.CompilerParams(dimension_semantics=("parallel",)),
    )(xw, w1, w2, w3)

    # Un-flatten, drop the working-grid border, already NCHW.
    out = out_flat.reshape(g, 88, bt, hp, wp).transpose(0, 2, 1, 3, 4)
    out = out.reshape(n, 88, hp, wp)[:, :, 2:2 + ho, 2:2 + wo]
    return out


# ---------------------- pure-JAX reference (for validation) ----------------------
def _conv_ref(x_nhwc, w, b, padding):
    out = lax.conv_general_dilated(
        x_nhwc, w, window_strides=(1, 1),
        padding=[(padding, padding), (padding, padding)],
        dimension_numbers=("NHWC", "HWIO", "NHWC"))
    return out + b[None, None, None, :]


def _forward_ref(x_nchw, p):
    x = jnp.transpose(x_nchw, (0, 2, 3, 1))
    c11_1 = _conv_ref(x, p["w_1x1_1"], p["b_1x1_1"], 1)
    branch1 = _conv_ref(x, p["w_1x1_2"], p["b_1x1_2"], 1)
    branch3 = _conv_ref(c11_1, p["w_5x5"], p["b_5x5"], 2)
    branch4 = _conv_ref(_conv_ref(c11_1, p["w_3x3_1"], p["b_3x3_1"], 1),
                        p["w_3x3_2"], p["b_3x3_2"], 1)
    out = jnp.concatenate([branch1, c11_1, branch3, branch4], axis=-1)
    return jnp.transpose(out, (0, 3, 1, 2))


if __name__ == "__main__":
    key = jax.random.PRNGKey(0)
    k_x, k_p = jax.random.split(key)

    N, C, H, W = 2, 4, 16, 16
    x = jax.random.normal(k_x, (N, C, H, W), jnp.float32)
    params = init_params(k_p, C)

    out = jax.jit(inspection_a_forward)(x, params)
    out = jax.block_until_ready(out)

    expected_shape = (N, 88, H + 2, W + 2)
    assert out.shape == expected_shape, (out.shape, expected_shape)

    ref = jax.block_until_ready(_forward_ref(x, params))
    assert jnp.allclose(out, ref, rtol=1e-3, atol=1e-3), float(jnp.max(jnp.abs(out - ref)))

    print("KERNEL_OK")
</pallas_src>

<mosaic_0001>
module attributes {stable_mosaic.version = 11 : i64} {
  func.func @_inception_kernel(%arg0: i32, %arg1: memref<1x5x484xf32, #tpu.memory_space<vmem>>, %arg2: memref<40x5xf32, #tpu.memory_space<vmem>>, %arg3: memref<48x401xf32, #tpu.memory_space<vmem>>, %arg4: memref<24x217xf32, #tpu.memory_space<vmem>>, %arg5: memref<1x88x484xf32, #tpu.memory_space<vmem>>, %arg6: memref<16x576xf32, #tpu.memory_space<vmem>>, %arg7: memref<24x576xf32, #tpu.memory_space<vmem>>, %arg8: memref<401x484xf32, #tpu.memory_space<vmem>>, %arg9: memref<217x484xf32, #tpu.memory_space<vmem>>) attributes {dimension_semantics = [#tpu.dimension_semantics<parallel>], iteration_bounds = array<i64: 2>, scalar_prefetch = 0 : i64, scratch_operands = 4 : i64, tpu.core_type = #tpu.core_type<tc>, window_params = [{transform_indices = @transform_0, window_bounds = array<i64: 1, 5, 484>}, {pipeline_mode = #tpu.pipeline_mode<synchronous>, transform_indices = @transform_1, window_bounds = array<i64: 40, 5>}, {pipeline_mode = #tpu.pipeline_mode<synchronous>, transform_indices = @transform_2, window_bounds = array<i64: 48, 401>}, {pipeline_mode = #tpu.pipeline_mode<synchronous>, transform_indices = @transform_3, window_bounds = array<i64: 24, 217>}, {transform_indices = @transform_4, window_bounds = array<i64: 1, 88, 484>}]} {
    %c0 = arith.constant 0 : index
    %c0_0 = arith.constant 0 : index
    %c0_1 = arith.constant 0 : index
    %0 = vector.load %arg1[%c0, %c0_0, %c0_1] : memref<1x5x484xf32, #tpu.memory_space<vmem>>, vector<1x5x484xf32>
    %1 = vector.shape_cast %0 : vector<1x5x484xf32> to vector<5x484xf32>
    %2 = vector.extract_strided_slice %1 {offsets = [4, 0], sizes = [1, 484], strides = [1, 1]} : vector<5x484xf32> to vector<1x484xf32>
    %cst = arith.constant 0.000000e+00 : f32
    %3 = vector.broadcast %cst : f32 to vector<16x46xf32>
    %c0_2 = arith.constant 0 : index
    %c0_3 = arith.constant 0 : index
    %4 = vector.load %arg6[%c0_2, %c0_3] : memref<16x576xf32, #tpu.memory_space<vmem>>, vector<16x46xf32>
    tpu.vector_store %arg6[%c0_2, %c0_3], %3 {strides = array<i32>} : memref<16x576xf32, #tpu.memory_space<vmem>>, vector<16x46xf32>,
    %cst_4 = arith.constant 0.000000e+00 : f32
    %5 = vector.broadcast %cst_4 : f32 to vector<16x46xf32>
    %c0_5 = arith.constant 0 : index
    %c530 = arith.constant 530 : index
    %6 = vector.load %arg6[%c0_5, %c530] : memref<16x576xf32, #tpu.memory_space<vmem>>, vector<16x46xf32>
    tpu.vector_store %arg6[%c0_5, %c530], %5 {strides = array<i32>} : memref<16x576xf32, #tpu.memory_space<vmem>>, vector<16x46xf32>,
    %cst_6 = arith.constant 0.000000e+00 : f32
    %7 = vector.broadcast %cst_6 : f32 to vector<24x46xf32>
    %c0_7 = arith.constant 0 : index
    %c0_8 = arith.constant 0 : index
    %8 = vector.load %arg7[%c0_7, %c0_8] : memref<24x576xf32, #tpu.memory_space<vmem>>, vector<24x46xf32>
    tpu.vector_store %arg7[%c0_7, %c0_8], %7 {strides = array<i32>} : memref<24x576xf32, #tpu.memory_space<vmem>>, vector<24x46xf32>,
    %cst_9 = arith.constant 0.000000e+00 : f32
    %9 = vector.broadcast %cst_9 : f32 to vector<24x46xf32>
    %c0_10 = arith.constant 0 : index
    %c530_11 = arith.constant 530 : index
    %10 = vector.load %arg7[%c0_10, %c530_11] : memref<24x576xf32, #tpu.memory_space<vmem>>, vector<24x46xf32>
    tpu.vector_store %arg7[%c0_10, %c530_11], %9 {strides = array<i32>} : memref<24x576xf32, #tpu.memory_space<vmem>>, vector<24x46xf32>,
    %c0_12 = arith.constant 0 : index
    %c0_13 = arith.constant 0 : index
    %11 = vector.load %arg2[%c0_12, %c0_13] : memref<40x5xf32, #tpu.memory_space<vmem>>, vector<40x5xf32>
    %cst_14 = arith.constant dense<0.000000e+00> : vector<40x484xf32>
    %12 = tpu.matmul %11, %1, %cst_14 {dimension_numbers = #tpu.dot_dimension_numbers<[1], [0], [0], [1], [0, 0, 1, 1], [], []>} : vector<40x5xf32>, vector<5x484xf32>, vector<40x484xf32> -> vector<40x484xf32>
    %13 = vector.extract_strided_slice %12 {offsets = [0, 0], sizes = [24, 484], strides = [1, 1]} : vector<40x484xf32> to vector<24x484xf32>
    %c0_15 = arith.constant 0 : index
    %c0_16 = arith.constant 0 : index
    %c0_17 = arith.constant 0 : index
    %14 = vector.load %arg5[%c0_15, %c0_16, %c0_17] : memref<1x88x484xf32, #tpu.memory_space<vmem>>, vector<1x24x484xf32>
    %15 = vector.shape_cast %14 : vector<1x24x484xf32> to vector<24x484xf32>
    %16 = vector.shape_cast %13 : vector<24x484xf32> to vector<1x24x484xf32>
    tpu.vector_store %arg5[%c0_15, %c0_16, %c0_17], %16 {strides = array<i32>} : memref<1x88x484xf32, #tpu.memory_space<vmem>>, vector<1x24x484xf32>,
    %17 = vector.extract_strided_slice %12 {offsets = [24, 0], sizes = [16, 484], strides = [1, 1]} : vector<40x484xf32> to vector<16x484xf32>
    %c0_18 = arith.constant 0 : index
    %c24 = arith.constant 24 : index
    %c0_19 = arith.constant 0 : index
    %18 = vector.load %arg5[%c0_18, %c24, %c0_19] : memref<1x88x484xf32, #tpu.memory_space<vmem>>, vector<1x16x484xf32>
    %19 = vector.shape_cast %18 : vector<1x16x484xf32> to vector<16x484xf32>
    %20 = vector.shape_cast %17 : vector<16x484xf32> to vector<1x16x484xf32>
    tpu.vector_store %arg5[%c0_18, %c24, %c0_19], %20 {strides = array<i32>} : memref<1x88x484xf32, #tpu.memory_space<vmem>>, vector<1x16x484xf32>,
    %21 = vector.extract_strided_slice %12 {offsets = [24, 0], sizes = [16, 484], strides = [1, 1]} : vector<40x484xf32> to vector<16x484xf32>
    %c0_20 = arith.constant 0 : index
    %c46 = arith.constant 46 : index
    %22 = vector.load %arg6[%c0_20, %c46] : memref<16x576xf32, #tpu.memory_space<vmem>>, vector<16x484xf32>
    tpu.vector_store %arg6[%c0_20, %c46], %21 {strides = array<i32>} : memref<16x576xf32, #tpu.memory_space<vmem>>, vector<16x484xf32>,
    %c0_21 = arith.constant 0 : index
    %c0_22 = arith.constant 0 : index
    %23 = vector.load %arg6[%c0_21, %c0_22] : memref<16x576xf32, #tpu.memory_space<vmem>>, vector<16x484xf32>
    %c0_23 = arith.constant 0 : index
    %c0_24 = arith.constant 0 : index
    %24 = vector.load %arg8[%c0_23, %c0_24] : memref<401x484xf32, #tpu.memory_space<vmem>>, vector<16x484xf32>
    tpu.vector_store %arg8[%c0_23, %c0_24], %23 {strides = array<i32>} : memref<401x484xf32, #tpu.memory_space<vmem>>, vector<16x484xf32>,
    %c0_25 = arith.constant 0 : index
    %c1 = arith.constant 1 : index
    %25 = vector.load %arg6[%c0_25, %c1] : memref<16x576xf32, #tpu.memory_space<vmem>>, vector<16x484xf32>
    %c16 = arith.constant 16 : index
    %c0_26 = arith.constant 0 : index
    %26 = vector.load %arg8[%c16, %c0_26] : memref<401x484xf32, #tpu.memory_space<vmem>>, vector<16x484xf32>
    tpu.vector_store %arg8[%c16, %c0_26], %25 {strides = array<i32>} : memref<401x484xf32, #tpu.memory_space<vmem>>, vector<16x484xf32>,
    %c0_27 = arith.constant 0 : index
    %c2 = arith.constant 2 : index
    %27 = vector.load %arg6[%c0_27, %c2] : memref<16x576xf32, #tpu.memory_space<vmem>>, vector<16x484xf32>
    %c32 = arith.constant 32 : index
    %c0_28 = arith.constant 0 : index
    %28 = vector.load %arg8[%c32, %c0_28] : memref<401x484xf32, #tpu.memory_space<vmem>>, vector<16x484xf32>
    tpu.vector_store %arg8[%c32, %c0_28], %27 {strides = array<i32>} : memref<401x484xf32, #tpu.memory_space<vmem>>, vector<16x484xf32>,
    %c0_29 = arith.constant 0 : index
    %c3 = arith.constant 3 : index
    %29 = vector.load %arg6[%c0_29, %c3] : memref<16x576xf32, #tpu.memory_space<vmem>>, vector<16x484xf32>
    %c48 = arith.constant 48 : index
    %c0_30 = arith.constant 0 : index
    %30 = vector.load %arg8[%c48, %c0_30] : memref<401x484xf32, #tpu.memory_space<vmem>>, vector<16x484xf32>
    tpu.vector_store %arg8[%c48, %c0_30], %29 {strides = array<i32>} : memref<401x484xf32, #tpu.memory_space<vmem>>, vector<16x484xf32>,
    %c0_31 = arith.constant 0 : index
    %c4 = arith.constant 4 : index
    %31 = vector.load %arg6[%c0_31, %c4] : memref<16x576xf32, #tpu.memory_space<vmem>>, vector<16x484xf32>
    %c64 = arith.constant 64 : index
    %c0_32 = arith.constant 0 : index
    %32 = vector.load %arg8[%c64, %c0_32] : memref<401x484xf32, #tpu.memory_space<vmem>>, vector<16x484xf32>
    tpu.vector_store %arg8[%c64, %c0_32], %31 {strides = array<i32>} : memref<401x484xf32, #tpu.memory_space<vmem>>, vector<16x484xf32>,
    %c0_33 = arith.constant 0 : index
    %c22 = arith.constant 22 : index
    %33 = vector.load %arg6[%c0_33, %c22] : memref<16x576xf32, #tpu.memory_space<vmem>>, vector<16x484xf32>
    %c80 = arith.constant 80 : index
    %c0_34 = arith.constant 0 : index
    %34 = vector.load %arg8[%c80, %c0_34] : memref<401x484xf32, #tpu.memory_space<vmem>>, vector<16x484xf32>
    tpu.vector_store %arg8[%c80, %c0_34], %33 {strides = array<i32>} : memref<401x484xf32, #tpu.memory_space<vmem>>, vector<16x484xf32>,
    %c0_35 = arith.constant 0 : index
    %c23 = arith.constant 23 : index
    %35 = vector.load %arg6[%c0_35, %c23] : memref<16x576xf32, #tpu.memory_space<vmem>>, vector<16x484xf32>
    %c96 = arith.constant 96 : index
    %c0_36 = arith.constant 0 : index
    %36 = vector.load %arg8[%c96, %c0_36] : memref<401x484xf32, #tpu.memory_space<vmem>>, vector<16x484xf32>
    tpu.vector_store %arg8[%c96, %c0_36], %35 {strides = array<i32>} : memref<401x484xf32, #tpu.memory_space<vmem>>, vector<16x484xf32>,
    %c0_37 = arith.constant 0 : index
    %c24_38 = arith.constant 24 : index
    %37 = vector.load %arg6[%c0_37, %c24_38] : memref<16x576xf32, #tpu.memory_space<vmem>>, vector<16x484xf32>
    %c112 = arith.constant 112 : index
    %c0_39 = arith.constant 0 : index
    %38 = vector.load %arg8[%c112, %c0_39] : memref<401x484xf32, #tpu.memory_space<vmem>>, vector<16x484xf32>
    tpu.vector_store %arg8[%c112, %c0_39], %37 {strides = array<i32>} : memref<401x484xf32, #tpu.memory_space<vmem>>, vector<16x484xf32>,
    %c0_40 = arith.constant 0 : index
    %c25 = arith.constant 25 : index
    %39 = vector.load %arg6[%c0_40, %c25] : memref<16x576xf32, #tpu.memory_space<vmem>>, vector<16x484xf32>
    %c128 = arith.constant 128 : index
    %c0_41 = arith.constant 0 : index
    %40 = vector.load %arg8[%c128, %c0_41] : memref<401x484xf32, #tpu.memory_space<vmem>>, vector<16x484xf32>
    tpu.vector_store %arg8[%c128, %c0_41], %39 {strides = array<i32>} : memref<401x484xf32, #tpu.memory_space<vmem>>, vector<16x484xf32>,
    %c0_42 = arith.constant 0 : index
    %c26 = arith.constant 26 : index
    %41 = vector.load %arg6[%c0_42, %c26] : memref<16x576xf32, #tpu.memory_space<vmem>>, vector<16x484xf32>
    %c144 = arith.constant 144 : index
    %c0_43 = arith.constant 0 : index
    %42 = vector.load %arg8[%c144, %c0_43] : memref<401x484xf32, #tpu.memory_space<vmem>>, vector<16x484xf32>
    tpu.vector_store %arg8[%c144, %c0_43], %41 {strides = array<i32>} : memref<401x484xf32, #tpu.memory_space<vmem>>, vector<16x484xf32>,
    %c0_44 = arith.constant 0 : index
    %c44 = arith.constant 44 : index
    %43 = vector.load %arg6[%c0_44, %c44] : memref<16x576xf32, #tpu.memory_space<vmem>>, vector<16x484xf32>
    %c160 = arith.constant 160 : index
    %c0_45 = arith.constant 0 : index
    %44 = vector.load %arg8[%c160, %c0_45] : memref<401x484xf32, #tpu.memory_space<vmem>>, vector<16x484xf32>
    tpu.vector_store %arg8[%c160, %c0_45], %43 {strides = array<i32>} : memref<401x484xf32, #tpu.memory_space<vmem>>, vector<16x484xf32>,
    %c0_46 = arith.constant 0 : index
    %c45 = arith.constant 45 : index
    %45 = vector.load %arg6[%c0_46, %c45] : memref<16x576xf32, #tpu.memory_space<vmem>>, vector<16x484xf32>
    %c176 = arith.constant 176 : index
    %c0_47 = arith.constant 0 : index
    %46 = vector.load %arg8[%c176, %c0_47] : memref<401x484xf32, #tpu.memory_space<vmem>>, vector<16x484xf32>
    tpu.vector_store %arg8[%c176, %c0_47], %45 {strides = array<i32>} : memref<401x484xf32, #tpu.memory_space<vmem>>, vector<16x484xf32>,
    %c0_48 = arith.constant 0 : index
    %c46_49 = arith.constant 46 : index
    %47 = vector.load %arg6[%c0_48, %c46_49] : memref<16x576xf32, #tpu.memory_space<vmem>>, vector<16x484xf32>
    %c192 = arith.constant 192 : index
    %c0_50 = arith.constant 0 : index
    %48 = vector.load %arg8[%c192, %c0_50] : memref<401x484xf32, #tpu.memory_space<vmem>>, vector<16x484xf32>
    tpu.vector_store %arg8[%c192, %c0_50], %47 {strides = array<i32>} : memref<401x484xf32, #tpu.memory_space<vmem>>, vector<16x484xf32>,
    %c0_51 = arith.constant 0 : index
    %c47 = arith.constant 47 : index
    %49 = vector.load %arg6[%c0_51, %c47] : memref<16x576xf32, #tpu.memory_space<vmem>>, vector<16x484xf32>
    %c208 = arith.constant 208 : index
    %c0_52 = arith.constant 0 : index
    %50 = vector.load %arg8[%c208, %c0_52] : memref<401x484xf32, #tpu.memory_space<vmem>>, vector<16x484xf32>
    tpu.vector_store %arg8[%c208, %c0_52], %49 {strides = array<i32>} : memref<401x484xf32, #tpu.memory_space<vmem>>, vector<16x484xf32>,
    %c0_53 = arith.constant 0 : index
    %c48_54 = arith.constant 48 : index
    %51 = vector.load %arg6[%c0_53, %c48_54] : memref<16x576xf32, #tpu.memory_space<vmem>>, vector<16x484xf32>
    %c224 = arith.constant 224 : index
    %c0_55 = arith.constant 0 : index
    %52 = vector.load %arg8[%c224, %c0_55] : memref<401x484xf32, #tpu.memory_space<vmem>>, vector<16x484xf32>
    tpu.vector_store %arg8[%c224, %c0_55], %51 {strides = array<i32>} : memref<401x484xf32, #tpu.memory_space<vmem>>, vector<16x484xf32>,
    %c0_56 = arith.constant 0 : index
    %c66 = arith.constant 66 : index
    %53 = vector.load %arg6[%c0_56, %c66] : memref<16x576xf32, #tpu.memory_space<vmem>>, vector<16x484xf32>
    %c240 = arith.constant 240 : index
    %c0_57 = arith.constant 0 : index
    %54 = vector.load %arg8[%c240, %c0_57] : memref<401x484xf32, #tpu.memory_space<vmem>>, vector<16x484xf32>
    tpu.vector_store %arg8[%c240, %c0_57], %53 {strides = array<i32>} : memref<401x484xf32, #tpu.memory_space<vmem>>, vector<16x484xf32>,
    %c0_58 = arith.constant 0 : index
    %c67 = arith.constant 67 : index
    %55 = vector.load %arg6[%c0_58, %c67] : memref<16x576xf32, #tpu.memory_space<vmem>>, vector<16x484xf32>
    %c256 = arith.constant 256 : index
    %c0_59 = arith.constant 0 : index
    %56 = vector.load %arg8[%c256, %c0_59] : memref<401x484xf32, #tpu.memory_space<vmem>>, vector<16x484xf32>
    tpu.vector_store %arg8[%c256, %c0_59], %55 {strides = array<i32>} : memref<401x484xf32, #tpu.memory_space<vmem>>, vector<16x484xf32>,
    %c0_60 = arith.constant 0 : index
    %c68 = arith.constant 68 : index
    %57 = vector.load %arg6[%c0_60, %c68] : memref<16x576xf32, #tpu.memory_space<vmem>>, vector<16x484xf32>
    %c272 = arith.constant 272 : index
    %c0_61 = arith.constant 0 : index
    %58 = vector.load %arg8[%c272, %c0_61] : memref<401x484xf32, #tpu.memory_space<vmem>>, vector<16x484xf32>
    tpu.vector_store %arg8[%c272, %c0_61], %57 {strides = array<i32>} : memref<401x484xf32, #tpu.memory_space<vmem>>, vector<16x484xf32>,
    %c0_62 = arith.constant 0 : index
    %c69 = arith.constant 69 : index
    %59 = vector.load %arg6[%c0_62, %c69] : memref<16x576xf32, #tpu.memory_space<vmem>>, vector<16x484xf32>
    %c288 = arith.constant 288 : index
    %c0_63 = arith.constant 0 : index
    %60 = vector.load %arg8[%c288, %c0_63] : memref<401x484xf32, #tpu.memory_space<vmem>>, vector<16x484xf32>
    tpu.vector_store %arg8[%c288, %c0_63], %59 {strides = array<i32>} : memref<401x484xf32, #tpu.memory_space<vmem>>, vector<16x484xf32>,
    %c0_64 = arith.constant 0 : index
    %c70 = arith.constant 70 : index
    %61 = vector.load %arg6[%c0_64, %c70] : memref<16x576xf32, #tpu.memory_space<vmem>>, vector<16x484xf32>
    %c304 = arith.constant 304 : index
    %c0_65 = arith.constant 0 : index
    %62 = vector.load %arg8[%c304, %c0_65] : memref<401x484xf32, #tpu.memory_space<vmem>>, vector<16x484xf32>
    tpu.vector_store %arg8[%c304, %c0_65], %61 {strides = array<i32>} : memref<401x484xf32, #tpu.memory_space<vmem>>, vector<16x484xf32>,
    %c0_66 = arith.constant 0 : index
    %c88 = arith.constant 88 : index
    %63 = vector.load %arg6[%c0_66, %c88] : memref<16x576xf32, #tpu.memory_space<vmem>>, vector<16x484xf32>
    %c320 = arith.constant 320 : index
    %c0_67 = arith.constant 0 : index
    %64 = vector.load %arg8[%c320, %c0_67] : memref<401x484xf32, #tpu.memory_space<vmem>>, vector<16x484xf32>
    tpu.vector_store %arg8[%c320, %c0_67], %63 {strides = array<i32>} : memref<401x484xf32, #tpu.memory_space<vmem>>, vector<16x484xf32>,
    %c0_68 = arith.constant 0 : index
    %c89 = arith.constant 89 : index
    %65 = vector.load %arg6[%c0_68, %c89] : memref<16x576xf32, #tpu.memory_space<vmem>>, vector<16x484xf32>
    %c336 = arith.constant 336 : index
    %c0_69 = arith.constant 0 : index
    %66 = vector.load %arg8[%c336, %c0_69] : memref<401x484xf32, #tpu.memory_space<vmem>>, vector<16x484xf32>
    tpu.vector_store %arg8[%c336, %c0_69], %65 {strides = array<i32>} : memref<401x484xf32, #tpu.memory_space<vmem>>, vector<16x484xf32>,
    %c0_70 = arith.constant 0 : index
    %c90 = arith.constant 90 : index
    %67 = vector.load %arg6[%c0_70, %c90] : memref<16x576xf32, #tpu.memory_space<vmem>>, vector<16x484xf32>
    %c352 = arith.constant 352 : index
    %c0_71 = arith.constant 0 : index
    %68 = vector.load %arg8[%c352, %c0_71] : memref<401x484xf32, #tpu.memory_space<vmem>>, vector<16x484xf32>
    tpu.vector_store %arg8[%c352, %c0_71], %67 {strides = array<i32>} : memref<401x484xf32, #tpu.memory_space<vmem>>, vector<16x484xf32>,
    %c0_72 = arith.constant 0 : index
    %c91 = arith.constant 91 : index
    %69 = vector.load %arg6[%c0_72, %c91] : memref<16x576xf32, #tpu.memory_space<vmem>>, vector<16x484xf32>
    %c368 = arith.constant 368 : index
    %c0_73 = arith.constant 0 : index
    %70 = vector.load %arg8[%c368, %c0_73] : memref<401x484xf32, #tpu.memory_space<vmem>>, vector<16x484xf32>
    tpu.vector_store %arg8[%c368, %c0_73], %69 {strides = array<i32>} : memref<401x484xf32, #tpu.memory_space<vmem>>, vector<16x484xf32>,
    %c0_74 = arith.constant 0 : index
    %c92 = arith.constant 92 : index
    %71 = vector.load %arg6[%c0_74, %c92] : memref<16x576xf32, #tpu.memory_space<vmem>>, vector<16x484xf32>
    %c384 = arith.constant 384 : index
    %c0_75 = arith.constant 0 : index
    %72 = vector.load %arg8[%c384, %c0_75] : memref<401x484xf32, #tpu.memory_space<vmem>>, vector<16x484xf32>
    tpu.vector_store %arg8[%c384, %c0_75], %71 {strides = array<i32>} : memref<401x484xf32, #tpu.memory_space<vmem>>, vector<16x484xf32>,
    %c400 = arith.constant 400 : index
    %c0_76 = arith.constant 0 : index
    %73 = vector.load %arg8[%c400, %c0_76] : memref<401x484xf32, #tpu.memory_space<vmem>>, vector<1x484xf32>
    tpu.vector_store %arg8[%c400, %c0_76], %2 {strides = array<i32>} : memref<401x484xf32, #tpu.memory_space<vmem>>, vector<1x484xf32>,
    %c0_77 = arith.constant 0 : index
    %c0_78 = arith.constant 0 : index
    %74 = vector.load %arg3[%c0_77, %c0_78] : memref<48x401xf32, #tpu.memory_space<vmem>>, vector<48x401xf32>
    %c0_79 = arith.constant 0 : index
    %c0_80 = arith.constant 0 : index
    %75 = vector.load %arg8[%c0_79, %c0_80] : memref<401x484xf32, #tpu.memory_space<vmem>>, vector<401x484xf32>
    %cst_81 = arith.constant dense<0.000000e+00> : vector<48x484xf32>
    %76 = tpu.matmul %74, %75, %cst_81 {dimension_numbers = #tpu.dot_dimension_numbers<[1], [0], [0], [1], [0, 0, 1, 1], [], []>} : vector<48x401xf32>, vector<401x484xf32>, vector<48x484xf32> -> vector<48x484xf32>
    %77 = vector.extract_strided_slice %76 {offsets = [0, 0], sizes = [24, 484], strides = [1, 1]} : vector<48x484xf32> to vector<24x484xf32>
    %c0_82 = arith.constant 0 : index
    %c40 = arith.constant 40 : index
    %c0_83 = arith.constant 0 : index
    %78 = vector.load %arg5[%c0_82, %c40, %c0_83] : memref<1x88x484xf32, #tpu.memory_space<vmem>>, vector<1x24x484xf32>
    %79 = vector.shape_cast %78 : vector<1x24x484xf32> to vector<24x484xf32>
    %80 = vector.shape_cast %77 : vector<24x484xf32> to vector<1x24x484xf32>
    tpu.vector_store %arg5[%c0_82, %c40, %c0_83], %80 {strides = array<i32>} : memref<1x88x484xf32, #tpu.memory_space<vmem>>, vector<1x24x484xf32>,
    %81 = vector.extract_strided_slice %76 {offsets = [24, 0], sizes = [24, 484], strides = [1, 1]} : vector<48x484xf32> to vector<24x484xf32>
    %82 = vector.broadcast %2 : vector<1x484xf32> to vector<24x484xf32>
    %83 = arith.mulf %81, %82 : vector<24x484xf32>
    %c0_84 = arith.constant 0 : index
    %c46_85 = arith.constant 46 : index
    %84 = vector.load %arg7[%c0_84, %c46_85] : memref<24x576xf32, #tpu.memory_space<vmem>>, vector<24x484xf32>
    tpu.vector_store %arg7[%c0_84, %c46_85], %83 {strides = array<i32>} : memref<24x576xf32, #tpu.memory_space<vmem>>, vector<24x484xf32>,
    %c0_86 = arith.constant 0 : index
    %c23_87 = arith.constant 23 : index
    %85 = vector.load %arg7[%c0_86, %c23_87] : memref<24x576xf32, #tpu.memory_space<vmem>>, vector<24x484xf32>
    %c0_88 = arith.constant 0 : index
    %c0_89 = arith.constant 0 : index
    %86 = vector.load %arg9[%c0_88, %c0_89] : memref<217x484xf32, #tpu.memory_space<vmem>>, vector<24x484xf32>
    tpu.vector_store %arg9[%c0_88, %c0_89], %85 {strides = array<i32>} : memref<217x484xf32, #tpu.memory_space<vmem>>, vector<24x484xf32>,
    %c0_90 = arith.constant 0 : index
    %c24_91 = arith.constant 24 : index
    %87 = vector.load %arg7[%c0_90, %c24_91] : memref<24x576xf32, #tpu.memory_space<vmem>>, vector<24x484xf32>
    %c24_92 = arith.constant 24 : index
    %c0_93 = arith.constant 0 : index
    %88 = vector.load %arg9[%c24_92, %c0_93] : memref<217x484xf32, #tpu.memory_space<vmem>>, vector<24x484xf32>
    tpu.vector_store %arg9[%c24_92, %c0_93], %87 {strides = array<i32>} : memref<217x484xf32, #tpu.memory_space<vmem>>, vector<24x484xf32>,
    %c0_94 = arith.constant 0 : index
    %c25_95 = arith.constant 25 : index
    %89 = vector.load %arg7[%c0_94, %c25_95] : memref<24x576xf32, #tpu.memory_space<vmem>>, vector<24x484xf32>
    %c48_96 = arith.constant 48 : index
    %c0_97 = arith.constant 0 : index
    %90 = vector.load %arg9[%c48_96, %c0_97] : memref<217x484xf32, #tpu.memory_space<vmem>>, vector<24x484xf32>
    tpu.vector_store %arg9[%c48_96, %c0_97], %89 {strides = array<i32>} : memref<217x484xf32, #tpu.memory_space<vmem>>, vector<24x484xf32>,
    %c0_98 = arith.constant 0 : index
    %c45_99 = arith.constant 45 : index
    %91 = vector.load %arg7[%c0_98, %c45_99] : memref<24x576xf32, #tpu.memory_space<vmem>>, vector<24x484xf32>
    %c72 = arith.constant 72 : index
    %c0_100 = arith.constant 0 : index
    %92 = vector.load %arg9[%c72, %c0_100] : memref<217x484xf32, #tpu.memory_space<vmem>>, vector<24x484xf32>
    tpu.vector_store %arg9[%c72, %c0_100], %91 {strides = array<i32>} : memref<217x484xf32, #tpu.memory_space<vmem>>, vector<24x484xf32>,
    %c0_101 = arith.constant 0 : index
    %c46_102 = arith.constant 46 : index
    %93 = vector.load %arg7[%c0_101, %c46_102] : memref<24x576xf32, #tpu.memory_space<vmem>>, vector<24x484xf32>
    %c96_103 = arith.constant 96 : index
    %c0_104 = arith.constant 0 : index
    %94 = vector.load %arg9[%c96_103, %c0_104] : memref<217x484xf32, #tpu.memory_space<vmem>>, vector<24x484xf32>
    tpu.vector_store %arg9[%c96_103, %c0_104], %93 {strides = array<i32>} : memref<217x484xf32, #tpu.memory_space<vmem>>, vector<24x484xf32>,
    %c0_105 = arith.constant 0 : index
    %c47_106 = arith.constant 47 : index
    %95 = vector.load %arg7[%c0_105, %c47_106] : memref<24x576xf32, #tpu.memory_space<vmem>>, vector<24x484xf32>
    %c120 = arith.constant 120 : index
    %c0_107 = arith.constant 0 : index
    %96 = vector.load %arg9[%c120, %c0_107] : memref<217x484xf32, #tpu.memory_space<vmem>>, vector<24x484xf32>
    tpu.vector_store %arg9[%c120, %c0_107], %95 {strides = array<i32>} : memref<217x484xf32, #tpu.memory_space<vmem>>, vector<24x484xf32>,
    %c0_108 = arith.constant 0 : index
    %c67_109 = arith.constant 67 : index
    %97 = vector.load %arg7[%c0_108, %c67_109] : memref<24x576xf32, #tpu.memory_space<vmem>>, vector<24x484xf32>
    %c144_110 = arith.constant 144 : index
    %c0_111 = arith.constant 0 : index
    %98 = vector.load %arg9[%c144_110, %c0_111] : memref<217x484xf32, #tpu.memory_space<vmem>>, vector<24x484xf32>
    tpu.vector_store %arg9[%c144_110, %c0_111], %97 {strides = array<i32>} : memref<217x484xf32, #tpu.memory_space<vmem>>, vector<24x484xf32>,
    %c0_112 = arith.constant 0 : index
    %c68_113 = arith.constant 68 : index
    %99 = vector.load %arg7[%c0_112, %c68_113] : memref<24x576xf32, #tpu.memory_space<vmem>>, vector<24x484xf32>
    %c168 = arith.constant 168 : index
    %c0_114 = arith.constant 0 : index
    %100 = vector.load %arg9[%c168, %c0_114] : memref<217x484xf32, #tpu.memory_space<vmem>>, vector<24x484xf32>
    tpu.vector_store %arg9[%c168, %c0_114], %99 {strides = array<i32>} : memref<217x484xf32, #tpu.memory_space<vmem>>, vector<24x484xf32>,
    %c0_115 = arith.constant 0 : index
    %c69_116 = arith.constant 69 : index
    %101 = vector.load %arg7[%c0_115, %c69_116] : memref<24x576xf32, #tpu.memory_space<vmem>>, vector<24x484xf32>
    %c192_117 = arith.constant 192 : index
    %c0_118 = arith.constant 0 : index
    %102 = vector.load %arg9[%c192_117, %c0_118] : memref<217x484xf32, #tpu.memory_space<vmem>>, vector<24x484xf32>
    tpu.vector_store %arg9[%c192_117, %c0_118], %101 {strides = array<i32>} : memref<217x484xf32, #tpu.memory_space<vmem>>, vector<24x484xf32>,
    %c216 = arith.constant 216 : index
    %c0_119 = arith.constant 0 : index
    %103 = vector.load %arg9[%c216, %c0_119] : memref<217x484xf32, #tpu.memory_space<vmem>>, vector<1x484xf32>
    tpu.vector_store %arg9[%c216, %c0_119], %2 {strides = array<i32>} : memref<217x484xf32, #tpu.memory_space<vmem>>, vector<1x484xf32>,
    %c0_120 = arith.constant 0 : index
    %c0_121 = arith.constant 0 : index
    %104 = vector.load %arg4[%c0_120, %c0_121] : memref<24x217xf32, #tpu.memory_space<vmem>>, vector<24x217xf32>
    %c0_122 = arith.constant 0 : index
    %c0_123 = arith.constant 0 : index
    %105 = vector.load %arg9[%c0_122, %c0_123] : memref<217x484xf32, #tpu.memory_space<vmem>>, vector<217x484xf32>
    %cst_124 = arith.constant dense<0.000000e+00> : vector<24x484xf32>
    %106 = tpu.matmul %104, %105, %cst_124 {dimension_numbers = #tpu.dot_dimension_numbers<[1], [0], [0], [1], [0, 0, 1, 1], [], []>} : vector<24x217xf32>, vector<217x484xf32>, vector<24x484xf32> -> vector<24x484xf32>
    %c0_125 = arith.constant 0 : index
    %c64_126 = arith.constant 64 : index
    %c0_127 = arith.constant 0 : index
    %107 = vector.load %arg5[%c0_125, %c64_126, %c0_127] : memref<1x88x484xf32, #tpu.memory_space<vmem>>, vector<1x24x484xf32>
    %108 = vector.shape_cast %107 : vector<1x24x484xf32> to vector<24x484xf32>
    %109 = vector.shape_cast %106 : vector<24x484xf32> to vector<1x24x484xf32>
    tpu.vector_store %arg5[%c0_125, %c64_126, %c0_127], %109 {strides = array<i32>} : memref<1x88x484xf32, #tpu.memory_space<vmem>>, vector<1x24x484xf32>,
    return
  }
  func.func @transform_0(%arg0: i32) -> (i32, i32, i32) {
    %c0_i32 = arith.constant 0 : i32
    %c0_i32_0 = arith.constant 0 : i32
    %c0_i32_1 = arith.constant 0 : i32
    return %arg0, %c0_i32, %c0_i32_0 : i32, i32, i32
  }
  func.func @transform_1(%arg0: i32) -> (i32, i32) {
    %c0_i32 = arith.constant 0 : i32
    %c0_i32_0 = arith.constant 0 : i32
    %c0_i32_1 = arith.constant 0 : i32
    return %c0_i32, %c0_i32_0 : i32, i32
  }
  func.func @transform_2(%arg0: i32) -> (i32, i32) {
    %c0_i32 = arith.constant 0 : i32
    %c0_i32_0 = arith.constant 0 : i32
    %c0_i32_1 = arith.constant 0 : i32
    return %c0_i32, %c0_i32_0 : i32, i32
  }
  func.func @transform_3(%arg0: i32) -> (i32, i32) {
    %c0_i32 = arith.constant 0 : i32
    %c0_i32_0 = arith.constant 0 : i32
    %c0_i32_1 = arith.constant 0 : i32
    return %c0_i32, %c0_i32_0 : i32, i32
  }
  func.func @transform_4(%arg0: i32) -> (i32, i32, i32) {
    %c0_i32 = arith.constant 0 : i32
    %c0_i32_0 = arith.constant 0 : i32
    %c0_i32_1 = arith.constant 0 : i32
    return %arg0, %c0_i32, %c0_i32_0 : i32, i32, i32
  }
}

</mosaic_0001>

<bundles_post_ra>
// kernel: inspection_a_forward.1
= control target key start
LH: loop header
LB: loop body
LE: loop exit
PB: predicated region body
PF: predicated region fallthrough
CT: control target
= control target key end

     0   :  { %s4298_s15 = smov 0   ;;  %s6725_s0 = inlined_call_operand.vmem [shape: f32[2,5,484], index: 0, kind: input, shape index: {}]   ;;  %s6726_s1 = inlined_call_operand.vmem [shape: f32[40,5], index: 1, kind: input, shape index: {}]   ;;  %s6727_s2 = inlined_call_operand.vmem [shape: f32[48,401], index: 2, kind: input, shape index: {}]   ;;  %s6728_s3 = inlined_call_operand.vmem [shape: f32[24,217], index: 3, kind: input, shape index: {}]   ;;  %s6729_s4 = inlined_call_operand.vmem [shape: f32[2,88,484], index: 4, kind: output, shape index: {}]  }
   0x1 LB: > { %s4116_s16 = sadd.s32 4294967295, %s4245_s15   ;;  %p4120_p0 = scmp.ge.s32.totalorder %s4245_s15, 1  ;;  %s4245_s15 = sphi %s4298_s15, %s14_s15  }
   0x2   : > { %p162_p1 = scmp.lt.s32.totalorder %s4245_s15, 3 }
   0x4   : > { %p163_p2 = pnand %p4120_p0, %p162_p1 }
   0x5   : > { %p188_p3 = scmp.lt.s32.totalorder (!%p163_p2), %s4116_s16, 1  ;;  %s4247_s9 = smov (!%p163_p2), 46  }
   0x6   : > { %166 = sbr.rel (%p163_p2) target bundleno = 1744 (0x6d0), region = 36  ;;  %s4249_s10 = smov (!%p163_p2), 125  }
   0x7   : > { %s4250_s11 = smov (!%p163_p2), 126   ;;  %s4251_s12 = smov (!%p163_p2), 127  }
   0x8   : > { %s4252_s13 = smov (!%p163_p2), 105   ;;  %s4253_s14 = smov (!%p163_p2), 106  }
   0x9   : > { %s4256_s18 = smov (!%p163_p2), 103   ;;  %s4257_s19 = smov (!%p163_p2), 104  }
   0xa   : > { %s4259_s21 = smov (!%p163_p2), 82   ;;  %s4260_s22 = smov (!%p163_p2), 84  }
   0xb   : > { %s6779_s16 = smov (!%p188_p3, %s4116_s16), 1  ;;  %vm235_vm0 = vcmask 1044480   ;;  %v214_v0 = vld [vmem:[%s6726_s1] sm:$0xff]  ;;  %vm219_vm1 = vcmask 39936   ;;  %v1942_v5 = vlaneseq  ;;  %v215_v6 = vld [vmem:[%s6726_s1 + $0x8] sm:$0xff]  ;;  %v216_v9 = vld [vmem:[%s6726_s1 + $0x10] sm:$0xff] }
   0xc   : > { %s4194_s17 = sshll.u32 %s6779_s16, 5  ;;  %v217_v10 = vld [vmem:[%s6726_s1 + $0x18] sm:$0xff]  ;;  %v218_v12 = vld [vmem:[%s6726_s1 + $0x20] sm:$0xff]  ;;  %s4195_s5 = smul.u32 352, %s6779_s16  ;;  %vm379_vm3 = vcmask 818176   ;;  %vm202_vm4 = vcmask 375808  }
   0xd   : > { %s192_s20 = scalar_lea.vmem %s6725_s0, %s4194_s17  ;;  %vm4326_vm2 = vcmp.lt.s32.totalorder %v1942_v5, 484  ;;  %v4248_v29 = vmov 0.0   ;;  %vm437_vm5 = vcmask 1047920   ;;  %s4254_s16 = smov 124   ;;  %vm205_vm6 = vcmask 523408  }
   0xe   : > { %v198_v1 = vld [vmem:[%s192_s20] sm:$0x1f]  ;;  %v199_v2 = vld [vmem:[%s192_s20 + $0x8] sm:$0x1f]  ;;  %v200_v3 = vld [vmem:[%s192_s20 + $0x10] sm:$0x1f]  ;;  %s4363_s8 = scalar_lea.vmem %s6729_s4, %s4195_s5 }
   0xf   : > { %4124 = vmatpush.msk.msra.mxu0 %vm235_vm0, %v198_v1  ;;  %1935 = vst [vmem:[#allocation1] sm:$0xff] %v198_v1  ;;  %4130 = vmatpush.msk.msra.mxu1 %vm235_vm0, %v199_v2  ;;  %v201_v4 = vld [vmem:[%s192_s20 + $0x18] sm:$0x1f]  ;;  %s4255_s17 = smov 102   ;;  %vm6730_vm7 = vcmask 146432   ;;  %s4258_s20 = smov 83  }
  0x10   : > { %4125 = vmatmul.msk.f32.vlgmr.msra.gmra.mxu0 %vm219_vm1, %v214_v0  ;;  %1936 = vst [vmem:[#allocation1 + $0x9] sm:$0xff] %v199_v2  ;;  %4131 = vmatmul.msk.f32.vlgmr.msra.gmra.mxu1 %vm219_vm1, %v214_v0  ;;  %s4261_s23 = smov 81   ;;  %vm552_vm8 = vcmask 1031168   ;;  %vm717_vm9 = vcmask 867328   ;;  %vm607_vm10 = vcmask 1022976   ;;  %vm497_vm11 = vcmask 1039360  }
  0x11   : > { %4136 = vmatpush.msk.msra.mxu2 %vm235_vm0, %v200_v3  ;;  %1937 = vst [vmem:[#allocation1 + $0x12] sm:$0xff] %v200_v3  ;;  %4142 = vmatpush.msk.msra.mxu3 %vm235_vm0, %v201_v4  ;;  %vm6731_vm12 = vcmask 842752   ;;  %vm6733_vm13 = vcmask 859136   ;;  %vm662_vm14 = vcmask 1014784   ;;  %vm1130_vm15 = vcmask 670720   ;;  %s4262_s24 = smov 80  }
  0x12   : > { %4137 = vmatmul.msk.f32.vlgmr.msra.gmra.mxu2 %vm219_vm1, %v214_v0  ;;  %1938 = vst [vmem:[#allocation1 + $0x1b] sm:$0xff] %v201_v4  ;;  %4143 = vmatmul.msk.f32.vlgmr.msra.gmra.mxu3 %vm219_vm1, %v214_v0  ;;  %vm937_vm0 = vcmask 834560   ;;  %s4263_s25 = smov 62   ;;  %s4264_s30 = smov 61  }
  0x13   : > { %203 = vst.msk [vmem:[#allocation2] sm:$0xff] %vm202_vm4, %v4248_v29  ;;  %s4265_s7 = smov 37   ;;  %s4269_s26 = smov 58  }
  0x14   : > { %204 = vst.msk [vmem:[#allocation2 + $0x28] sm:$0xff] %vm202_vm4, %v4248_v29  ;;  %s4270_s27 = smov 59   ;;  %s4271_s28 = smov 60  }
  0x15   : > { %208 = vst.msk [vmem:[#allocation3] sm:$0xff] %vm202_vm4, %v4248_v29  ;;  %s4272_s29 = smov 36  }
  0x16   : > { %209 = vst.msk [vmem:[#allocation3 + $0x28] sm:$0xff] %vm202_vm4, %v4248_v29 }
  0x17   : > { %210 = vst.msk [vmem:[#allocation3 + $0x50] sm:$0xff] %vm202_vm4, %v4248_v29 }
  0x18   : > { %4126 = vmatmul.msk.f32.gmra.mxu0 %vm219_vm1, %v215_v6  ;;  %4132 = vmatmul.msk.f32.gmra.mxu1 %vm219_vm1, %v215_v6  ;;  %206 = vst.msk [vmem:[#allocation2 + $0x20] sm:$0xff] %vm205_vm6, %v4248_v29 }
  0x19   : > { %v1940_v8 = vld [vmem:[#allocation1 + $0x4] ss:$9 sm:$0xff]  ;;  %207 = vst.msk [vmem:[#allocation2 + $0x48] sm:$0xff] %vm205_vm6, %v4248_v29 }
  0x1a   : > { %4138 = vmatmul.msk.f32.gmra.mxu2 %vm219_vm1, %v215_v6  ;;  %1947 = vst.msk [vmem:[#allocation4 + $0x640] ss:$8 sm:$0xf] %vm4326_vm2, %v1940_v8  ;;  %4144 = vmatmul.msk.f32.gmra.mxu3 %vm219_vm1, %v215_v6 }
  0x1b   : > { %3691 = vst [vmem:[#allocation1] sm:$0xff] %v198_v1 }
  0x1c   : > { %3692 = vst [vmem:[#allocation1 + $0x9] sm:$0xff] %v199_v2 }
  0x1d   : > { %3693 = vst [vmem:[#allocation1 + $0x12] sm:$0xff] %v200_v3 }
  0x1e   : > { %3694 = vst [vmem:[#allocation1 + $0x1b] sm:$0xff] %v201_v4 }
  0x1f   : > { %211 = vst.msk [vmem:[#allocation3 + $0x20] sm:$0xff] %vm205_vm6, %v4248_v29 }
  0x20   : > { %4127 = vmatmul.msk.f32.gmra.mxu0 %vm219_vm1, %v216_v9  ;;  %4133 = vmatmul.msk.f32.gmra.mxu1 %vm219_vm1, %v216_v9  ;;  %212 = vst.msk [vmem:[#allocation3 + $0x48] sm:$0xff] %vm205_vm6, %v4248_v29 }
  0x21   : > { %213 = vst.msk [vmem:[#allocation3 + $0x70] sm:$0xff] %vm205_vm6, %v4248_v29  ;;  %vm1000_vm6 = vcmask 687104  }
  0x22   : > { %4139 = vmatmul.msk.f32.gmra.mxu2 %vm219_vm1, %v216_v9  ;;  %4145 = vmatmul.msk.f32.gmra.mxu3 %vm219_vm1, %v216_v9 }
  0x25   : > { %v3696_v11 = vld [vmem:[#allocation1 + $0x4] ss:$9 sm:$0xff] }
  0x26   : > { %3699 = vst.msk [vmem:[#allocation5 + $0x360] ss:$8 sm:$0xf] %vm4326_vm2, %v3696_v11  ;;  %vm6734_vm2 = vcmask 678912  }
  0x28   : > { %4128 = vmatmul.msk.f32.gmra.mxu0 %vm219_vm1, %v217_v10  ;;  %4134 = vmatmul.msk.f32.gmra.mxu1 %vm219_vm1, %v217_v10 }
  0x2a   : > { %4140 = vmatmul.msk.f32.gmra.mxu2 %vm219_vm1, %v217_v10  ;;  %4146 = vmatmul.msk.f32.gmra.mxu3 %vm219_vm1, %v217_v10 }
  0x30   : > { %4129 = vmatmul.msk.f32.gmra.mxu0 %vm219_vm1, %v218_v12  ;;  %4135 = vmatmul.msk.f32.gmra.mxu1 %vm219_vm1, %v218_v12 }
  0x32   : > { %4141 = vmatmul.msk.f32.gmra.mxu2 %vm219_vm1, %v218_v12  ;;  %4147 = vmatmul.msk.f32.gmra.mxu3 %vm219_vm1, %v218_v12  ;;  %vm6732_vm1 = vcmask 850944  }
  0x8d   : > { %v265_v13 = vpop.f32.mrf.mxu0  ;;  %v297_v14 = vpop.f32.mrf.mxu1 }
  0x8e   : > { %376 = vst [vmem:[%s4363_s8] sm:$0xff] %v265_v13 }
  0x8f   : > { %377 = vst [vmem:[%s4363_s8 + $0x8] sm:$0xff] %v297_v14 }
  0x95   : > { %v268_v15 = vpop.f32.mrf.mxu0  ;;  %v300_v16 = vpop.f32.mrf.mxu1 }
  0x96   : > { %381 = vst [vmem:[%s4363_s8 + $0x20] sm:$0xff] %v268_v15  ;;  %v329_v17 = vpop.f32.mrf.mxu2  ;;  %v361_v18 = vpop.f32.mrf.mxu3 }
  0x97   : > { %382 = vst [vmem:[%s4363_s8 + $0x28] sm:$0xff] %v300_v16 }
  0x98   : > { %378 = vst [vmem:[%s4363_s8 + $0x10] sm:$0xff] %v329_v17 }
  0x99   : > { %380 = vst.msk [vmem:[%s4363_s8 + $0x18] sm:$0xff] %vm379_vm3, %v361_v18 }
  0x9d   : > { %v271_v19 = vpop.f32.mrf.mxu0  ;;  %v303_v20 = vpop.f32.mrf.mxu1 }
  0x9e   : > { %385 = vst [vmem:[%s4363_s8 + $0x40] sm:$0xff] %v271_v19  ;;  %v332_v21 = vpop.f32.mrf.mxu2  ;;  %v364_v22 = vpop.f32.mrf.mxu3 }
  0x9f   : > { %386 = vst [vmem:[%s4363_s8 + $0x48] sm:$0xff] %v303_v20 }
  0xa0   : > { %383 = vst [vmem:[%s4363_s8 + $0x30] sm:$0xff] %v332_v21 }
  0xa1   : > { %384 = vst.msk [vmem:[%s4363_s8 + $0x38] sm:$0xff] %vm379_vm3, %v364_v22 }
  0xa5   : > { %v274_v23 = vpop.f32.mrf.mxu0  ;;  %v306_v24 = vpop.f32.mrf.mxu1 }
  0xa6   : > { %389 = vst [vmem:[%s4363_s8 + $0x60] sm:$0xff] %v274_v23  ;;  %405 = vrot.lane.b32.xlu0 %v274_v23, %s4247_s9  ;;  %v335_v25 = vpop.f32.mrf.mxu2  ;;  %v367_v26 = vpop.f32.mrf.mxu3 }
  0xa7   : > { %390 = vst [vmem:[%s4363_s8 + $0x68] sm:$0xff] %v306_v24 }
  0xa8   : > { %387 = vst [vmem:[%s4363_s8 + $0x50] sm:$0xff] %v335_v25 }
  0xa9   : > { %388 = vst.msk [vmem:[%s4363_s8 + $0x58] sm:$0xff] %vm379_vm3, %v367_v26 }
  0xad   : > { %v277_v30 = vpop.f32.mrf.mxu0  ;;  %v309_v31 = vpop.f32.mrf.mxu1 }
  0xae   : > { %407 = vrot.lane.b32.xlu0 %v306_v24, %s4247_s9  ;;  %v338_v27 = vpop.f32.mrf.mxu2  ;;  %v370_v28 = vpop.f32.mrf.mxu3  ;;  %393 = vst [vmem:[%s4363_s8 + $0x80] sm:$0xff] %v277_v30  ;;  %413 = vrot.lane.b32.xlu2 %v277_v30, %s4247_s9 }
  0xaf   : > { %391 = vst [vmem:[%s4363_s8 + $0x70] sm:$0xff] %v338_v27  ;;  %409 = vrot.lane.b32.xlu1 %v338_v27, %s4247_s9 }
  0xb0   : > { %392 = vst.msk [vmem:[%s4363_s8 + $0x78] sm:$0xff] %vm379_vm3, %v370_v28 }
  0xb1   : > { %394 = vst [vmem:[%s4363_s8 + $0x88] sm:$0xff] %v309_v31 }
  0xb6   : > { %v341_v32 = vpop.f32.mrf.mxu2  ;;  %v373_v33 = vpop.f32.mrf.mxu3  ;;  %415 = vrot.lane.b32.xlu2 %v309_v31, %s4247_s9 }
  0xb7   : > { %411 = vrot.lane.b32.xlu1 %v370_v28, %s4247_s9  ;;  %395 = vst [vmem:[%s4363_s8 + $0x90] sm:$0xff] %v341_v32  ;;  %417 = vrot.lane.b32.xlu0 %v341_v32, %s4247_s9 }
  0xb8   : > { %396 = vst.msk [vmem:[%s4363_s8 + $0x98] sm:$0xff] %vm379_vm3, %v373_v33 }
  0xbf   : > { %419 = vrot.lane.b32.xlu1 %v373_v33, %s4247_s9 }
 0x108   : > { %v414_v46 = vpop.permute.xlu2 %413 }
 0x109   : > { %444 = vst.msk [vmem:[#allocation2 + $0x28] sm:$0xff] %vm437_vm5, %v414_v46 }
 0x110   : > { %v416_v47 = vpop.permute.xlu2 %415  ;;  %v4503_v51 = vld [vmem:[#allocation2 + $0x28] sm:$0xff] }
 0x111   : > { %v4486_v48 = vsel %vm202_vm4, %v414_v46, %v416_v47 }
 0x112   : > { %445 = vst [vmem:[#allocation2 + $0x30] sm:$0xff] %v4486_v48 }
 0x118   : > { %v406_v34 = vpop.permute.xlu0 %405 }
 0x119   : > { %438 = vst.msk [vmem:[#allocation2] sm:$0xff] %vm437_vm5, %v406_v34  ;;  %v4515_v54 = vld [vmem:[#allocation2 + $0x30] sm:$0xff] }
 0x11a   : > { %462 = vst [vmem:[#allocation4 + $0x28] sm:$0xff] %v4515_v54 }
 0x120   : > { %v408_v35 = vpop.permute.xlu0 %407  ;;  %v4409_v36 = vld [vmem:[#allocation2] sm:$0xff] }
 0x121   : > { %v4411_v37 = vld [vmem:[#allocation2] sm:$0xff]  ;;  %v4414_v38 = vsel %vm202_vm4, %v406_v34, %v408_v35  ;;  %591 = vrot.lane.b32.xlu0 %v4409_v36, %s4249_s10  ;;  %536 = vrot.lane.b32.xlu1 %v4409_v36, %s4250_s11  ;;  %v410_v39 = vpop.permute.xlu1 %409 }
 0x122   : > { %457 = vst [vmem:[#allocation4] sm:$0xff] %v4411_v37  ;;  %481 = vrot.lane.b32.xlu2 %v4409_v36, %s4251_s12  ;;  %v4425_v40 = vsel %vm202_vm4, %v408_v35, %v410_v39 }
 0x123   : > { %439 = vst [vmem:[#allocation2 + $0x8] sm:$0xff] %v4414_v38 }
 0x124   : > { %440 = vst [vmem:[#allocation2 + $0x10] sm:$0xff] %v4425_v40 }
 0x129   : > { %756 = vrot.lane.b32.xlu0 %v4409_v36, %s4252_s13  ;;  %701 = vrot.lane.b32.xlu1 %v4409_v36, %s4253_s14  ;;  %v412_v43 = vpop.permute.xlu1 %411  ;;  %v418_v50 = vpop.permute.xlu0 %417 }
 0x12a   : > { %v4432_v41 = vld [vmem:[#allocation2 + $0x8] sm:$0xff]  ;;  %646 = vrot.lane.b32.xlu2 %v4409_v36, %s4254_s16  ;;  %v4448_v44 = vsel %vm202_vm4, %v410_v39, %v412_v43  ;;  %443 = vst.msk [vmem:[#allocation2 + $0x20] sm:$0xff] %vm6730_vm7, %v412_v43  ;;  %v4506_v52 = vsel %vm202_vm4, %v416_v47, %v418_v50 }
 0x12b   : > { %458 = vst [vmem:[#allocation4 + $0x8] sm:$0xff] %v4432_v41  ;;  %v4437_v42 = vld [vmem:[#allocation2 + $0x10] sm:$0xff] }
 0x12c   : > { %459 = vst [vmem:[#allocation4 + $0x10] sm:$0xff] %v4437_v42 }
 0x12d   : > { %441 = vst [vmem:[#allocation2 + $0x18] sm:$0xff] %v4448_v44 }
 0x12e   : > { %446 = vst [vmem:[#allocation2 + $0x38] sm:$0xff] %v4506_v52 }
 0x131   : > { %921 = vrot.lane.b32.xlu0 %v4409_v36, %s4255_s17  ;;  %866 = vrot.lane.b32.xlu1 %v4409_v36, %s4256_s18  ;;  %v4495_v49 = vld [vmem:[#allocation2 + $0x20] sm:$0xff]  ;;  %v420_v53 = vpop.permute.xlu1 %419 }
 0x132   : > { %811 = vrot.lane.b32.xlu2 %v4409_v36, %s4257_s19  ;;  %448 = vst.msk [vmem:[#allocation2 + $0x48] sm:$0xff] %vm6730_vm7, %v420_v53  ;;  %v4519_v55 = vsel %vm202_vm4, %v418_v50, %v420_v53  ;;  %vm1195_vm7 = vcmask 662528  }
 0x133   : > { %447 = vst [vmem:[#allocation2 + $0x40] sm:$0xff] %v4519_v55 }
 0x134   : > { %v4462_v45 = vld [vmem:[#allocation2 + $0x18] sm:$0xff] }
 0x135   : > { %460 = vst.msk [vmem:[#allocation4 + $0x18] sm:$0xff] %vm379_vm3, %v4462_v45  ;;  %v455_v56 = vld [vmem:[#allocation2 + $0x38] sm:$0xff] }
 0x136   : > { %463 = vst [vmem:[#allocation4 + $0x30] sm:$0xff] %v455_v56 }
 0x139   : > { %1045 = vrot.lane.b32.xlu0 %v4409_v36, %s4258_s20  ;;  %1110 = vrot.lane.b32.xlu1 %v4409_v36, %s4259_s21 }
 0x13a   : > { %980 = vrot.lane.b32.xlu2 %v4409_v36, %s4260_s22  ;;  %v4529_v57 = vld [vmem:[#allocation2 + $0x40] sm:$0xff] }
 0x13b   : > { %464 = vst.msk [vmem:[#allocation4 + $0x38] sm:$0xff] %vm379_vm3, %v4529_v57 }
 0x141   : > { %593 = vrot.lane.b32.xlu1 %v4414_v38, %s4249_s10  ;;  %483 = vrot.lane.b32.xlu0 %v4414_v38, %s4251_s12 }
 0x142   : > { %1175 = vrot.lane.b32.xlu2 %v4409_v36, %s4261_s23 }
 0x149   : > { %758 = vrot.lane.b32.xlu1 %v4414_v38, %s4252_s13  ;;  %648 = vrot.lane.b32.xlu0 %v4414_v38, %s4254_s16 }
 0x14a   : > { %538 = vrot.lane.b32.xlu2 %v4414_v38, %s4250_s11 }
 0x151   : > { %923 = vrot.lane.b32.xlu1 %v4414_v38, %s4255_s17  ;;  %813 = vrot.lane.b32.xlu0 %v4414_v38, %s4257_s19 }
 0x152   : > { %703 = vrot.lane.b32.xlu2 %v4414_v38, %s4253_s14 }
 0x159   : > { %1047 = vrot.lane.b32.xlu1 %v4414_v38, %s4258_s20  ;;  %982 = vrot.lane.b32.xlu0 %v4414_v38, %s4260_s22 }
 0x15a   : > { %868 = vrot.lane.b32.xlu2 %v4414_v38, %s4256_s18 }
 0x161   : > { %1053 = vrot.lane.b32.xlu1 %v4495_v49, %s4258_s20  ;;  %1177 = vrot.lane.b32.xlu0 %v4414_v38, %s4261_s23 }
 0x162   : > { %1112 = vrot.lane.b32.xlu2 %v4414_v38, %s4259_s21 }
 0x169   : > { %485 = vrot.lane.b32.xlu1 %v4425_v40, %s4251_s12  ;;  %988 = vrot.lane.b32.xlu0 %v4495_v49, %s4260_s22 }
 0x16a   : > { %1118 = vrot.lane.b32.xlu2 %v4495_v49, %s4259_s21 }
 0x171   : > { %542 = vrot.lane.b32.xlu1 %v4448_v44, %s4250_s11  ;;  %540 = vrot.lane.b32.xlu0 %v4425_v40, %s4250_s11 }
 0x172   : > { %487 = vrot.lane.b32.xlu2 %v4448_v44, %s4251_s12 }
 0x179   : > { %650 = vrot.lane.b32.xlu1 %v4425_v40, %s4254_s16  ;;  %597 = vrot.lane.b32.xlu0 %v4448_v44, %s4249_s10 }
 0x17a   : > { %595 = vrot.lane.b32.xlu2 %v4425_v40, %s4249_s10 }
 0x17c   : > { %v482_v58 = vpop.permute.xlu2 %481 }
 0x181   : > { %707 = vrot.lane.b32.xlu1 %v4448_v44, %s4253_s14  ;;  %705 = vrot.lane.b32.xlu0 %v4425_v40, %s4253_s14 }
 0x182   : > { %652 = vrot.lane.b32.xlu2 %v4448_v44, %s4254_s16 }
 0x184   : > { %v647_v59 = vpop.permute.xlu2 %646 }
 0x189   : > { %815 = vrot.lane.b32.xlu1 %v4425_v40, %s4257_s19  ;;  %762 = vrot.lane.b32.xlu0 %v4448_v44, %s4252_s13 }
 0x18a   : > { %760 = vrot.lane.b32.xlu2 %v4425_v40, %s4252_s13 }
 0x18c   : > { %v4551_v60 = vpop.permute.xlu2 %811 }
 0x191   : > { %872 = vrot.lane.b32.xlu1 %v4448_v44, %s4256_s18  ;;  %870 = vrot.lane.b32.xlu0 %v4425_v40, %s4256_s18 }
 0x192   : > { %817 = vrot.lane.b32.xlu2 %v4448_v44, %s4257_s19 }
 0x193   : > { %v537_v61 = vpop.permute.xlu1 %536  ;;  %v592_v62 = vpop.permute.xlu0 %591 }
 0x194   : > { %v4559_v63 = vpop.permute.xlu2 %980 }
 0x199   : > { %984 = vrot.lane.b32.xlu1 %v4425_v40, %s4260_s22  ;;  %927 = vrot.lane.b32.xlu0 %v4448_v44, %s4255_s17 }
 0x19a   : > { %925 = vrot.lane.b32.xlu2 %v4425_v40, %s4255_s17 }
 0x19b   : > { %v702_v0 = vpop.permute.xlu1 %701  ;;  %v757_v1 = vpop.permute.xlu0 %756 }
 0x19c   : > { %v4567_v2 = vpop.permute.xlu2 %1175 }
 0x1a1   : > { %1116 = vrot.lane.b32.xlu1 %v4448_v44, %s4259_s21  ;;  %1051 = vrot.lane.b32.xlu0 %v4448_v44, %s4258_s20 }
 0x1a2   : > { %986 = vrot.lane.b32.xlu2 %v4448_v44, %s4260_s22 }
 0x1a3   : > { %v867_v3 = vpop.permute.xlu1 %866  ;;  %v922_v4 = vpop.permute.xlu0 %921 }
 0x1a4   : > { %v4575_v5 = vpop.permute.xlu2 %538 }
 0x1a5   : > { %v4579_v6 = vsel %vm552_vm8, %v537_v61, %v4575_v5 }
 0x1a9   : > { %1179 = vrot.lane.b32.xlu1 %v4425_v40, %s4261_s23  ;;  %1114 = vrot.lane.b32.xlu0 %v4425_v40, %s4259_s21 }
 0x1aa   : > { %1049 = vrot.lane.b32.xlu2 %v4425_v40, %s4258_s20 }
 0x1ab   : > { %v1111_v7 = vpop.permute.xlu1 %1110  ;;  %v1046_v8 = vpop.permute.xlu0 %1045 }
 0x1ac   : > { %v4587_v9 = vpop.permute.xlu2 %703 }
 0x1ad   : > { %v4591_v10 = vsel %vm717_vm9, %v702_v0, %v4587_v9 }
 0x1b1   : > { %599 = vrot.lane.b32.xlu1 %v4503_v51, %s4249_s10  ;;  %489 = vrot.lane.b32.xlu0 %v4503_v51, %s4251_s12 }
 0x1b2   : > { %1181 = vrot.lane.b32.xlu2 %v4448_v44, %s4261_s23 }
 0x1b3   : > { %v594_v11 = vpop.permute.xlu1 %593  ;;  %v484_v12 = vpop.permute.xlu0 %483 }
 0x1b4   : > { %v4600_v13 = vsel %vm607_vm10, %v592_v62, %v594_v11  ;;  %v4603_v14 = vsel %vm497_vm11, %v482_v58, %v484_v12  ;;  %v4605_v15 = vpop.permute.xlu2 %868 }
 0x1b5   : > { %v883_v16 = vsel %vm6731_vm12, %v867_v3, %v4605_v15 }
 0x1b6   : > { %897 = vst [vmem:[#allocation4 + $0x200] sm:$0xff] %v883_v16 }
 0x1b9   : > { %764 = vrot.lane.b32.xlu1 %v4503_v51, %s4252_s13  ;;  %654 = vrot.lane.b32.xlu0 %v4503_v51, %s4254_s16 }
 0x1ba   : > { %544 = vrot.lane.b32.xlu2 %v4503_v51, %s4250_s11 }
 0x1bb   : > { %v759_v17 = vpop.permute.xlu1 %758  ;;  %v4615_v18 = vpop.permute.xlu0 %648 }
 0x1bc   : > { %v4618_v19 = vsel %vm6733_vm13, %v757_v1, %v759_v17  ;;  %v4622_v20 = vsel %vm662_vm14, %v647_v59, %v4615_v18  ;;  %v4624_v21 = vpop.permute.xlu2 %1112 }
 0x1bd   : > { %v1131_v22 = vsel %vm1130_vm15, %v1111_v7, %v4624_v21  ;;  %v4723_v7 = vld [vmem:[#allocation2 + $0x48] sm:$0xff] }
 0x1be   : > { %1147 = vst [vmem:[#allocation4 + $0x300] sm:$0xff] %v1131_v22 }
 0x1c1   : > { %929 = vrot.lane.b32.xlu1 %v4503_v51, %s4255_s17  ;;  %819 = vrot.lane.b32.xlu0 %v4503_v51, %s4257_s19 }
 0x1c2   : > { %709 = vrot.lane.b32.xlu2 %v4503_v51, %s4253_s14 }
 0x1c3   : > { %v4634_v23 = vpop.permute.xlu1 %923  ;;  %v4636_v24 = vpop.permute.xlu0 %813 }
 0x1c4   : > { %v938_v25 = vsel %vm937_vm0, %v922_v4, %v4634_v23  ;;  %v4643_v26 = vsel %vm6732_vm1, %v4551_v60, %v4636_v24  ;;  %v4645_v27 = vpop.permute.xlu2 %1118 }
 0x1c5   : > { %952 = vst [vmem:[#allocation4 + $0x240] sm:$0xff] %v938_v25 }
 0x1c9   : > { %990 = vrot.lane.b32.xlu1 %v4503_v51, %s4260_s22  ;;  %1120 = vrot.lane.b32.xlu0 %v4503_v51, %s4259_s21 }
 0x1ca   : > { %874 = vrot.lane.b32.xlu2 %v4503_v51, %s4256_s18 }
 0x1cb   : > { %v4653_v28 = vpop.permute.xlu1 %1047  ;;  %v4655_v29 = vpop.permute.xlu0 %982 }
 0x1cc   : > { %v1066_v30 = vsel %vm6734_vm2, %v1046_v8, %v4653_v28  ;;  %v1001_v31 = vsel %vm1000_vm6, %v4559_v63, %v4655_v29  ;;  %v488_v32 = vpop.permute.xlu2 %487 }
 0x1cd   : > { %1082 = vst [vmem:[#allocation4 + $0x2c0] sm:$0xff] %v1066_v30 }
 0x1ce   : > { %1017 = vst [vmem:[#allocation4 + $0x280] sm:$0xff] %v1001_v31 }
 0x1cf   : > { %515 = vst.msk [vmem:[#allocation4 + $0x58] sm:$0xff] %vm379_vm3, %v488_v32 }
 0x1d1   : > { %546 = vrot.lane.b32.xlu0 %v4486_v48, %s4250_s11  ;;  %491 = vrot.lane.b32.xlu1 %v4486_v48, %s4251_s12 }
 0x1d2   : > { %1055 = vrot.lane.b32.xlu2 %v4503_v51, %s4258_s20 }
 0x1d3   : > { %v4669_v33 = vpop.permute.xlu1 %1053  ;;  %v4671_v34 = vpop.permute.xlu0 %1177 }
 0x1d4   : > { %v1196_v35 = vsel %vm1195_vm7, %v4567_v2, %v4671_v34  ;;  %v596_v39 = vpop.permute.xlu2 %595 }
 0x1d5   : > { %1212 = vst [vmem:[#allocation4 + $0x340] sm:$0xff] %v1196_v35  ;;  %v4677_v43 = vsel %vm607_vm10, %v594_v11, %v596_v39 }
 0x1d9   : > { %711 = vrot.lane.b32.xlu0 %v4486_v48, %s4253_s14  ;;  %656 = vrot.lane.b32.xlu1 %v4486_v48, %s4254_s16 }
 0x1da   : > { %601 = vrot.lane.b32.xlu2 %v4486_v48, %s4249_s10 }
 0x1db   : > { %v486_v46 = vpop.permute.xlu1 %485  ;;  %v989_v47 = vpop.permute.xlu0 %988 }
 0x1dc   : > { %v4686_v50 = vsel %vm497_vm11, %v484_v12, %v486_v46  ;;  %v500_v53 = vsel %vm497_vm11, %v486_v46, %v488_v32  ;;  %v653_v56 = vpop.permute.xlu2 %652 }
 0x1dd   : > { %514 = vst [vmem:[#allocation4 + $0x50] sm:$0xff] %v500_v53 }
 0x1de   : > { %680 = vst.msk [vmem:[#allocation4 + $0x118] sm:$0xff] %vm379_vm3, %v653_v56 }
 0x1e1   : > { %876 = vrot.lane.b32.xlu0 %v4486_v48, %s4256_s18  ;;  %821 = vrot.lane.b32.xlu1 %v4486_v48, %s4257_s19 }
 0x1e2   : > { %766 = vrot.lane.b32.xlu2 %v4486_v48, %s4252_s13 }
 0x1e3   : > { %v543_v58 = vpop.permute.xlu1 %542  ;;  %v541_v59 = vpop.permute.xlu0 %540 }
 0x1e4   : > { %570 = vst.msk [vmem:[#allocation4 + $0x98] sm:$0xff] %vm379_vm3, %v543_v58  ;;  %v4699_v60 = vsel %vm552_vm8, %v4575_v5, %v541_v59  ;;  %v555_v61 = vsel %vm552_vm8, %v541_v59, %v543_v58  ;;  %v761_v62 = vpop.permute.xlu2 %760 }
 0x1e5   : > { %v4703_v63 = vsel %vm6733_vm13, %v759_v17, %v761_v62  ;;  %569 = vst [vmem:[#allocation4 + $0x90] sm:$0xff] %v555_v61 }
 0x1e9   : > { %1057 = vrot.lane.b32.xlu0 %v4486_v48, %s4258_s20  ;;  %1122 = vrot.lane.b32.xlu1 %v4486_v48, %s4259_s21 }
 0x1ea   : > { %931 = vrot.lane.b32.xlu2 %v4486_v48, %s4255_s17 }
 0x1eb   : > { %v651_v0 = vpop.permute.xlu1 %650  ;;  %v598_v1 = vpop.permute.xlu0 %597 }
 0x1ec   : > { %v4713_v2 = vsel %vm662_vm14, %v4615_v18, %v651_v0  ;;  %v4716_v3 = vsel %vm662_vm14, %v651_v0, %v653_v56  ;;  %v4719_v4 = vsel %vm607_vm10, %v596_v39, %v598_v1  ;;  %625 = vst.msk [vmem:[#allocation4 + $0xd8] sm:$0xff] %vm379_vm3, %v598_v1  ;;  %v818_v5 = vpop.permute.xlu2 %817 }
 0x1ed   : > { %845 = vst.msk [vmem:[#allocation4 + $0x1d8] sm:$0xff] %vm379_vm3, %v818_v5 }
 0x1f1   : > { %1063 = vrot.lane.b32.xlu0 %v4723_v7, %s4258_s20  ;;  %1128 = vrot.lane.b32.xlu1 %v4723_v7, %s4259_s21 }
 0x1f2   : > { %992 = vrot.lane.b32.xlu2 %v4486_v48, %s4260_s22 }
 0x1f3   : > { %v708_v8 = vpop.permute.xlu1 %707  ;;  %v706_v11 = vpop.permute.xlu0 %705 }
 0x1f4   : > { %735 = vst.msk [vmem:[#allocation4 + $0x158] sm:$0xff] %vm379_vm3, %v708_v8  ;;  %v4734_v12 = vsel %vm717_vm9, %v4587_v9, %v706_v11  ;;  %v4737_v16 = vsel %vm717_vm9, %v706_v11, %v708_v8  ;;  %v926_v17 = vpop.permute.xlu2 %925 }
 0x1f5   : > { %v939_v18 = vsel %vm937_vm0, %v4634_v23, %v926_v17 }
 0x1f6   : > { %953 = vst [vmem:[#allocation4 + $0x248] sm:$0xff] %v939_v18 }
 0x1f9   : > { %495 = vrot.lane.b32.xlu0 %v4519_v55, %s4251_s12  ;;  %548 = vrot.lane.b32.xlu1 %v4506_v52, %s4250_s11 }
 0x1fa   : > { %998 = vrot.lane.b32.xlu2 %v4723_v7, %s4260_s22 }
 0x1fb   : > { %v816_v22 = vpop.permute.xlu1 %815  ;;  %v763_v9 = vpop.permute.xlu0 %762 }
 0x1fc   : > { %v4749_v25 = vsel %vm6732_vm1, %v4636_v24, %v816_v22  ;;  %v4752_v30 = vsel %vm6732_vm1, %v816_v22, %v818_v5  ;;  %v4755_v23 = vsel %vm6733_vm13, %v761_v62, %v763_v9  ;;  %790 = vst.msk [vmem:[#allocation4 + $0x198] sm:$0xff] %vm379_vm3, %v763_v9  ;;  %v987_v31 = vpop.permute.xlu2 %986 }
 0x1fd   : > { %v1004_v32 = vsel %vm1000_vm6, %v987_v31, %v989_v47 }
 0x1fe   : > { %1020 = vst.msk [vmem:[#allocation4 + $0x298] sm:$0xff] %vm379_vm3, %v1004_v32 }
 0x201   : > { %603 = vrot.lane.b32.xlu0 %v4506_v52, %s4249_s10  ;;  %605 = vrot.lane.b32.xlu1 %v4519_v55, %s4249_s10 }
 0x202   : > { %493 = vrot.lane.b32.xlu2 %v4506_v52, %s4251_s12  ;;  %s4266_s12 = smov 38  }
 0x203   : > { %v873_v24 = vpop.permute.xlu1 %872  ;;  %v871_v35 = vpop.permute.xlu0 %870 }
 0x204   : > { %900 = vst.msk [vmem:[#allocation4 + $0x218] sm:$0xff] %vm379_vm3, %v873_v24  ;;  %v884_v39 = vsel %vm6731_vm12, %v4605_v15, %v871_v35  ;;  %v885_v46 = vsel %vm6731_vm12, %v871_v35, %v873_v24  ;;  %v1050_v47 = vpop.permute.xlu2 %1049 }
 0x205   : > { %898 = vst [vmem:[#allocation4 + $0x208] sm:$0xff] %v884_v39  ;;  %v1067_v53 = vsel %vm6734_vm2, %v4653_v28, %v1050_v47 }
 0x206   : > { %899 = vst [vmem:[#allocation4 + $0x210] sm:$0xff] %v885_v46 }
 0x207   : > { %1083 = vst [vmem:[#allocation4 + $0x2c8] sm:$0xff] %v1067_v53 }
 0x209   : > { %660 = vrot.lane.b32.xlu0 %v4519_v55, %s4254_s16  ;;  %713 = vrot.lane.b32.xlu1 %v4506_v52, %s4253_s14 }
 0x20a   : > { %550 = vrot.lane.b32.xlu2 %v4519_v55, %s4250_s11 }
 0x20b   : > { %v985_v56 = vpop.permute.xlu1 %984  ;;  %v928_v15 = vpop.permute.xlu0 %927 }
 0x20c   : > { %v1002_v58 = vsel %vm1000_vm6, %v4655_v29, %v985_v56  ;;  %v1003_v59 = vsel %vm1000_vm6, %v985_v56, %v987_v31  ;;  %v940_v28 = vsel %vm937_vm0, %v926_v17, %v928_v15  ;;  %955 = vst.msk [vmem:[#allocation4 + $0x258] sm:$0xff] %vm379_vm3, %v928_v15  ;;  %v4783_v61 = vpop.permute.xlu2 %1181 }
 0x20d   : > { %1018 = vst [vmem:[#allocation4 + $0x288] sm:$0xff] %v1002_v58 }
 0x20e   : > { %1019 = vst [vmem:[#allocation4 + $0x290] sm:$0xff] %v1003_v59 }
 0x20f   : > { %954 = vst [vmem:[#allocation4 + $0x250] sm:$0xff] %v940_v28 }
 0x211   : > { %768 = vrot.lane.b32.xlu0 %v4506_v52, %s4252_s13  ;;  %770 = vrot.lane.b32.xlu1 %v4519_v55, %s4252_s13 }
 0x212   : > { %658 = vrot.lane.b32.xlu2 %v4506_v52, %s4254_s16 }
 0x213   : > { %v1117_v29 = vpop.permute.xlu1 %1116  ;;  %v1052_v62 = vpop.permute.xlu0 %1051 }
 0x214   : > { %v1134_v0 = vsel %vm1130_vm15, %v1117_v29, %v4645_v27  ;;  %v1068_v1 = vsel %vm6734_vm2, %v1050_v47, %v1052_v62  ;;  %v1069_v5 = vsel %vm6734_vm2, %v1052_v62, %v4669_v33  ;;  %v545_v8 = vpop.permute.xlu2 %544 }
 0x215   : > { %1150 = vst.msk [vmem:[#allocation4 + $0x318] sm:$0xff] %vm379_vm3, %v1134_v0 }
 0x216   : > { %1084 = vst [vmem:[#allocation4 + $0x2d0] sm:$0xff] %v1068_v1 }
 0x217   : > { %1085 = vst.msk [vmem:[#allocation4 + $0x2d8] sm:$0xff] %vm379_vm3, %v1069_v5 }
 0x219   : > { %825 = vrot.lane.b32.xlu0 %v4519_v55, %s4257_s19  ;;  %878 = vrot.lane.b32.xlu1 %v4506_v52, %s4256_s18 }
 0x21a   : > { %715 = vrot.lane.b32.xlu2 %v4519_v55, %s4253_s14 }
 0x21b   : > { %v1180_v27 = vpop.permute.xlu1 %1179  ;;  %v1115_v11 = vpop.permute.xlu0 %1114 }
 0x21c   : > { %v1197_v33 = vsel %vm1195_vm7, %v4671_v34, %v1180_v27  ;;  %v1198_v17 = vsel %vm1195_vm7, %v1180_v27, %v4783_v61  ;;  %v1132_v18 = vsel %vm1130_vm15, %v4624_v21, %v1115_v11  ;;  %v710_v22 = vpop.permute.xlu2 %709  ;;  %v1133_v9 = vsel %vm1130_vm15, %v1115_v11, %v1117_v29 }
 0x21d   : > { %1213 = vst [vmem:[#allocation4 + $0x348] sm:$0xff] %v1197_v33 }
 0x21e   : > { %1214 = vst [vmem:[#allocation4 + $0x350] sm:$0xff] %v1198_v17 }
 0x21f   : > { %1148 = vst [vmem:[#allocation4 + $0x308] sm:$0xff] %v1132_v18 }
 0x220   : > { %1149 = vst [vmem:[#allocation4 + $0x310] sm:$0xff] %v1133_v9 }
 0x221   : > { %933 = vrot.lane.b32.xlu0 %v4506_v52, %s4255_s17  ;;  %935 = vrot.lane.b32.xlu1 %v4519_v55, %s4255_s17  ;;  %s4267_s17 = smov 39  }
 0x222   : > { %823 = vrot.lane.b32.xlu2 %v4506_v52, %s4257_s19 }
 0x223   : > { %v600_v34 = vpop.permute.xlu1 %599  ;;  %v490_v31 = vpop.permute.xlu0 %489 }
 0x224   : > { %v875_v32 = vpop.permute.xlu2 %874 }
 0x229   : > { %994 = vrot.lane.b32.xlu0 %v4506_v52, %s4260_s22  ;;  %996 = vrot.lane.b32.xlu1 %v4519_v55, %s4260_s22 }
 0x22a   : > { %880 = vrot.lane.b32.xlu2 %v4519_v55, %s4256_s18 }
 0x22b   : > { %v765_v21 = vpop.permute.xlu1 %764  ;;  %v655_v24 = vpop.permute.xlu0 %654 }
 0x22c   : > { %v1056_v35 = vpop.permute.xlu2 %1055 }
 0x231   : > { %1126 = vrot.lane.b32.xlu0 %v4519_v55, %s4259_s21  ;;  %1059 = vrot.lane.b32.xlu1 %v4506_v52, %s4258_s20 }
 0x232   : > { %1061 = vrot.lane.b32.xlu2 %v4519_v55, %s4258_s20 }
 0x233   : > { %v930_v39 = vpop.permute.xlu1 %929  ;;  %v820_v46 = vpop.permute.xlu0 %819 }
 0x234   : > { %v4829_v47 = vpop.permute.xlu2 %601 }
 0x235   : > { %v4833_v53 = vsel %vm607_vm10, %v600_v34, %v4829_v47 }
 0x239   : > { %1183 = vrot.lane.b32.xlu0 %v4495_v49, %s4261_s23  ;;  %1185 = vrot.lane.b32.xlu1 %v4503_v51, %s4261_s23 }
 0x23a   : > { %1124 = vrot.lane.b32.xlu2 %v4506_v52, %s4259_s21 }
 0x23b   : > { %v991_v56 = vpop.permute.xlu1 %990  ;;  %v1121_v15 = vpop.permute.xlu0 %1120 }
 0x23c   : > { %v4841_v58 = vpop.permute.xlu2 %766 }
 0x23d   : > { %v776_v59 = vsel %vm6733_vm13, %v765_v21, %v4841_v58 }
 0x241   : > { %1189 = vrot.lane.b32.xlu0 %v4506_v52, %s4261_s23  ;;  %1191 = vrot.lane.b32.xlu1 %v4519_v55, %s4261_s23 }
 0x242   : > { %1187 = vrot.lane.b32.xlu2 %v4486_v48, %s4261_s23 }
 0x243   : > { %v4851_v28 = vpop.permute.xlu0 %546  ;;  %v492_v29 = vpop.permute.xlu1 %491 }
 0x244   : > { %v556_v62 = vsel %vm552_vm8, %v545_v8, %v4851_v28  ;;  %v4856_v0 = vsel %vm497_vm11, %v490_v31, %v492_v29  ;;  %v4858_v1 = vpop.permute.xlu2 %931 }
 0x245   : > { %v941_v5 = vsel %vm937_vm0, %v930_v39, %v4858_v1 }
 0x246   : > { %956 = vst [vmem:[#allocation4 + $0x260] sm:$0xff] %v941_v5 }
 0x249   : > { %1240 = vrot.lane.b32.xlu0 %v4409_v36, %s4262_s24  ;;  %1242 = vrot.lane.b32.xlu1 %v4414_v38, %s4262_s24 }
 0x24a   : > { %1193 = vrot.lane.b32.xlu2 %v4723_v7, %s4261_s23 }
 0x24b   : > { %v4868_v8 = vpop.permute.xlu0 %711  ;;  %v657_v27 = vpop.permute.xlu1 %656 }
 0x24c   : > { %v721_v11 = vsel %vm717_vm9, %v710_v22, %v4868_v8  ;;  %v666_v33 = vsel %vm662_vm14, %v655_v24, %v657_v27  ;;  %v4873_v17 = vpop.permute.xlu2 %992 }
 0x24d   : > { %v1005_v18 = vsel %vm1000_vm6, %v991_v56, %v4873_v17 }
 0x24e   : > { %1021 = vst [vmem:[#allocation4 + $0x2a0] sm:$0xff] %v1005_v18 }
 0x251   : > { %1246 = vrot.lane.b32.xlu0 %v4448_v44, %s4262_s24  ;;  %1248 = vrot.lane.b32.xlu1 %v4495_v49, %s4262_s24 }
 0x252   : > { %1244 = vrot.lane.b32.xlu2 %v4425_v40, %s4262_s24 }
 0x253   : > { %v4883_v38 = vpop.permute.xlu0 %876  ;;  %v4885_v22 = vpop.permute.xlu1 %821 }
 0x254   : > { %v886_v9 = vsel %vm6731_vm12, %v875_v32, %v4883_v38  ;;  %v831_v34 = vsel %vm6732_vm1, %v820_v46, %v4885_v22  ;;  %v4891_v31 = vpop.permute.xlu2 %998 }
 0x255   : > { %901 = vst [vmem:[#allocation4 + $0x220] sm:$0xff] %v886_v9  ;;  %2209 = vmatpush.msrb.mxu0 %v831_v34 }
 0x257   : > { %2210 = vmatpush.msrb.mxu0 %v4643_v26 }
 0x259   : > { %1252 = vrot.lane.b32.xlu0 %v4486_v48, %s4262_s24  ;;  %1254 = vrot.lane.b32.xlu1 %v4506_v52, %s4262_s24 }
 0x25a   : > { %1250 = vrot.lane.b32.xlu2 %v4503_v51, %s4262_s24  ;;  %2211 = vmatpush.msrb.mxu0 %v776_v59 }
 0x25b   : > { %v4900_v32 = vpop.permute.xlu0 %1057  ;;  %v4902_v21 = vpop.permute.xlu1 %1122 }
 0x25c   : > { %v4906_v24 = vsel %vm6734_vm2, %v1056_v35, %v4900_v32  ;;  %v4910_v26 = vsel %vm1130_vm15, %v1121_v15, %v4902_v21  ;;  %v494_v39 = vpop.permute.xlu2 %493  ;;  %2212 = vmatpush.msrb.mxu0 %v4618_v19 }
 0x25d   : > { %v4914_v46 = vsel %vm497_vm11, %v492_v29, %v494_v39 }
 0x25e   : > { %2213 = vmatpush.msrb.mxu0 %v721_v11 }
 0x260   : > { %2214 = vmatpush.msrb.mxu0 %v4591_v10 }
 0x261   : > { %1258 = vrot.lane.b32.xlu0 %v4723_v7, %s4262_s24  ;;  %1305 = vrot.lane.b32.xlu1 %v4409_v36, %s4263_s25 }
 0x262   : > { %1256 = vrot.lane.b32.xlu2 %v4519_v55, %s4262_s24  ;;  %2215 = vmatpush.msrb.mxu0 %v666_v33 }
 0x263   : > { %v4923_v35 = vpop.permute.xlu0 %1063  ;;  %v4925_v19 = vpop.permute.xlu1 %1128 }
 0x264   : > { %v551_v56 = vpop.permute.xlu2 %550  ;;  %2216 = vmatpush.msrb.mxu0 %v4622_v20 }
 0x265   : > { %574 = vst.msk [vmem:[#allocation4 + $0xb8] sm:$0xff] %vm379_vm3, %v551_v56 }
 0x266   : > { %2217 = vmatpush.msrb.mxu0 %v4833_v53 }
 0x268   : > { %2218 = vmatpush.msrb.mxu0 %v4600_v13 }
 0x269   : > { %1309 = vrot.lane.b32.xlu0 %v4425_v40, %s4263_s25  ;;  %1311 = vrot.lane.b32.xlu1 %v4448_v44, %s4263_s25 }
 0x26a   : > { %1307 = vrot.lane.b32.xlu2 %v4432_v41, %s4263_s25  ;;  %2219 = vmatpush.msrb.mxu0 %v556_v62 }
 0x26b   : > { %v496_v36 = vpop.permute.xlu0 %495  ;;  %v549_v10 = vpop.permute.xlu1 %548 }
 0x26c   : > { %v4938_v20 = vsel %vm497_vm11, %v494_v39, %v496_v36  ;;  %519 = vst.msk [vmem:[#allocation4 + $0x78] sm:$0xff] %vm379_vm3, %v496_v36  ;;  %v4943_v13 = vsel %vm552_vm8, %v4851_v28, %v549_v10  ;;  %v4946_v40 = vsel %vm552_vm8, %v549_v10, %v551_v56  ;;  %v659_v53 = vpop.permute.xlu2 %658  ;;  %2220 = vmatpush.msrb.mxu0 %v4579_v6  ;;  %v4964_v6 = vld [vmem:[%s6727_s2] sm:$0xff]  ;;  %vm1260_vm8 = vcmask 654336  }
 0x26d   : > { %v4950_v44 = vsel %vm662_vm14, %v657_v27, %v659_v53  ;;  %v5008_v27 = vld [vmem:[%s6727_s2 + $0x40] sm:$0xff]  ;;  %vm1845_vm11 = vcmask 302080  }
 0x26e   : > { %2221 = vmatpush.msrb.mxu0 %v4856_v0  ;;  %v5060_v56 = vld [vmem:[%s6727_s2 + $0x80] sm:$0xff] }
 0x270   : > { %2222 = vmatpush.msrb.mxu0 %v4603_v14 }
 0x271   : > { %1315 = vrot.lane.b32.xlu0 %v4503_v51, %s4263_s25  ;;  %1317 = vrot.lane.b32.xlu1 %v4486_v48, %s4263_s25 }
 0x272   : > { %1313 = vrot.lane.b32.xlu2 %v4495_v49, %s4263_s25  ;;  %2223 = vmatpush.msrb.mxu0 %v4503_v51  ;;  %v4984_v49 = vld [vmem:[%s6727_s2 + $0x20] sm:$0xff] }
 0x273   : > { %v604_v15 = vpop.permute.xlu0 %603  ;;  %v606_v59 = vpop.permute.xlu1 %605 }
 0x274   : > { %v612_v14 = vsel %vm607_vm10, %v4829_v47, %v604_v15  ;;  %v4969_v28 = vsel %vm607_vm10, %v604_v15, %v606_v59  ;;  %629 = vst.msk [vmem:[#allocation4 + $0xf8] sm:$0xff] %vm379_vm3, %v606_v59  ;;  %v716_v48 = vpop.permute.xlu2 %715  ;;  %2224 = vmatpush.msrb.mxu0 %v4411_v37  ;;  %vm1390_vm10 = vcmask 498688  }
 0x275   : > { %2225 = vmatmul.f32.vlgmr.msrb.gmra.mxu0 %v4964_v6  ;;  %739 = vst.msk [vmem:[#allocation4 + $0x178] sm:$0xff] %vm379_vm3, %v716_v48 }
 0x279   : > { %1321 = vrot.lane.b32.xlu0 %v4519_v55, %s4263_s25  ;;  %1323 = vrot.lane.b32.xlu1 %v4723_v7, %s4263_s25 }
 0x27a   : > { %1319 = vrot.lane.b32.xlu2 %v4506_v52, %s4263_s25  ;;  %s4268_s25 = smov 40  }
 0x27b   : > { %v661_v47 = vpop.permute.xlu0 %660  ;;  %v714_v29 = vpop.permute.xlu1 %713 }
 0x27c   : > { %v4987_v62 = vsel %vm662_vm14, %v659_v53, %v661_v47  ;;  %684 = vst.msk [vmem:[#allocation4 + $0x138] sm:$0xff] %vm379_vm3, %v661_v47  ;;  %v722_v55 = vsel %vm717_vm9, %v4868_v8, %v714_v29  ;;  %v4993_v7 = vsel %vm717_vm9, %v714_v29, %v716_v48  ;;  %v824_v0 = vpop.permute.xlu2 %823  ;;  %vm1325_vm9 = vcmask 506880  }
 0x27d   : > { %v832_v52 = vsel %vm6732_vm1, %v4885_v22, %v824_v0  ;;  %2228 = vmatmul.f32.gmra.mxu0 %v4984_v49  ;;  %vm1780_vm14 = vcmask 310272  }
 0x27e   : > { %2349 = vmatpush.msra.mxu0 %v832_v52  ;;  %v5172_v52 = vld [vmem:[#allocation4 + $0x30] sm:$0xff] }
 0x280   : > { %2350 = vmatpush.msra.mxu0 %v4749_v25 }
 0x281   : > { %1372 = vrot.lane.b32.xlu0 %v4432_v41, %s4264_s30  ;;  %1374 = vrot.lane.b32.xlu1 %v4437_v42, %s4264_s30 }
 0x282   : > { %1370 = vrot.lane.b32.xlu2 %v4411_v37, %s4264_s30 }
 0x283   : > { %v769_v5 = vpop.permute.xlu0 %768  ;;  %v771_v8 = vpop.permute.xlu1 %770 }
 0x284   : > { %v777_v25 = vsel %vm6733_vm13, %v4841_v58, %v769_v5  ;;  %v5013_v11 = vsel %vm6733_vm13, %v769_v5, %v771_v8  ;;  %794 = vst.msk [vmem:[#allocation4 + $0x1b8] sm:$0xff] %vm379_vm3, %v771_v8  ;;  %v881_v33 = vpop.permute.xlu2 %880  ;;  %v5176_v5 = vld [vmem:[#allocation4 + $0x10] sm:$0xff]  ;;  %v4234_v8 = vld [vmem:[#allocation4 + $0x28] sm:$0xff]  ;;  %vm1910_vm13 = vcmask 293888  }
 0x285   : > { %2351 = vmatpush.msra.mxu0 %v777_v25  ;;  %904 = vst.msk [vmem:[#allocation4 + $0x238] sm:$0xff] %vm379_vm3, %v881_v33 }
 0x286   : > { %2231 = vmatmul.f32.gmra.mxu0 %v5008_v27 }
 0x287   : > { %2352 = vmatpush.msra.mxu0 %v4703_v63 }
 0x289   : > { %1837 = vrot.lane.b32.xlu0 %v4515_v54, %s4265_s7  ;;  %1825 = vrot.lane.b32.xlu1 %v4411_v37, %s4265_s7  ;;  %v5036_v37 = vld [vmem:[%s6727_s2 + $0x60] sm:$0xff] }
 0x28a   : > { %1835 = vrot.lane.b32.xlu2 %v4503_v51, %s4265_s7  ;;  %2353 = vmatpush.msra.mxu0 %v722_v55 }
 0x28b   : > { %v826_v42 = vpop.permute.xlu0 %825  ;;  %v879_v58 = vpop.permute.xlu1 %878 }
 0x28c   : > { %v833_v18 = vsel %vm6732_vm1, %v824_v0, %v826_v42  ;;  %849 = vst.msk [vmem:[#allocation4 + $0x1f8] sm:$0xff] %vm379_vm3, %v826_v42  ;;  %v5029_v63 = vsel %vm6731_vm12, %v4883_v38, %v879_v58  ;;  %v888_v22 = vsel %vm6731_vm12, %v879_v58, %v881_v33  ;;  %v1062_v9 = vpop.permute.xlu2 %1061  ;;  %2354 = vmatpush.msra.mxu0 %v4734_v12  ;;  %v2032_v33 = vld [vmem:[#allocation4 + $0x1d8] sm:$0xff]  ;;  %vm2196_vm12 = vcmask 1040384  }
 0x28d   : > { %v1073_v34 = vsel %vm6734_vm2, %v1062_v9, %v4923_v35  ;;  %903 = vst [vmem:[#allocation4 + $0x230] sm:$0xff] %v888_v22  ;;  %v2028_v22 = vld [vmem:[#allocation4 + $0x1b8] sm:$0xff]  ;;  %vm1455_vm1 = vcmask 490496  }
 0x28e   : > { %2355 = vmatpush.msra.mxu0 %v4950_v44  ;;  %1089 = vst.msk [vmem:[#allocation4 + $0x2f8] sm:$0xff] %vm379_vm3, %v1073_v34  ;;  %v2020_v34 = vld [vmem:[#allocation4 + $0x178] sm:$0xff] }
 0x28f   : > { %2234 = vmatmul.f32.gmra.mxu0 %v5036_v37 }
 0x290   : > { %2356 = vmatpush.msra.mxu0 %v4713_v2 }
 0x291   : > { %1770 = vrot.lane.b32.xlu0 %v4503_v51, %s4266_s12  ;;  %1772 = vrot.lane.b32.xlu1 %v4515_v54, %s4266_s12 }
 0x292   : > { %1827 = vrot.lane.b32.xlu2 %v4432_v41, %s4265_s7  ;;  %2357 = vmatpush.msra.mxu0 %v612_v14 }
 0x293   : > { %v934_v12 = vpop.permute.xlu0 %933  ;;  %v936_v38 = vpop.permute.xlu1 %935 }
 0x294   : > { %v5052_v39 = vsel %vm937_vm0, %v4858_v1, %v934_v12  ;;  %v943_v35 = vsel %vm937_vm0, %v934_v12, %v936_v38  ;;  %959 = vst.msk [vmem:[#allocation4 + $0x278] sm:$0xff] %vm379_vm3, %v936_v38  ;;  %v1125_v2 = vpop.permute.xlu2 %1124  ;;  %2358 = vmatpush.msra.mxu0 %v4677_v43  ;;  %v5073_v43 = vld [vmem:[#allocation4] sm:$0xff]  ;;  %vm1715_vm0 = vcmask 318464  }
 0x295   : > { %v5064_v36 = vsel %vm1130_vm15, %v4902_v21, %v1125_v2  ;;  %958 = vst [vmem:[#allocation4 + $0x270] sm:$0xff] %v943_v35  ;;  %v2016_v35 = vld [vmem:[#allocation4 + $0x158] sm:$0xff] }
 0x296   : > { %2359 = vmatpush.msra.mxu0 %v4943_v13  ;;  %v5091_v13 = vld [vmem:[%s6727_s2 + $0xa0] sm:$0xff] }
 0x297   : > { %2237 = vmatmul.f32.gmra.mxu0 %v5060_v56 }
 0x298   : > { %2360 = vmatpush.msra.mxu0 %v4699_v60 }
 0x299   : > { %1762 = vrot.lane.b32.xlu0 %v4432_v41, %s4266_s12  ;;  %1705 = vrot.lane.b32.xlu1 %v4503_v51, %s4267_s17 }
 0x29a   : > { %1760 = vrot.lane.b32.xlu2 %v5073_v43, %s4266_s12  ;;  %2361 = vmatpush.msra.mxu0 %v4914_v46 }
 0x29b   : > { %v995_v1 = vpop.permute.xlu0 %994  ;;  %v997_v21 = vpop.permute.xlu1 %996 }
 0x29c   : > { %v5080_v10 = vsel %vm1000_vm6, %v4873_v17, %v995_v1  ;;  %v5083_v60 = vsel %vm1000_vm6, %v995_v1, %v997_v21  ;;  %v1008_v41 = vsel %vm1000_vm6, %v997_v21, %v4891_v31  ;;  %v1188_v51 = vpop.permute.xlu2 %1187  ;;  %2362 = vmatpush.msra.mxu0 %v4686_v50  ;;  %v5096_v17 = vld [vmem:[#allocation4 + $0x8] sm:$0xff]  ;;  %vm1650_vm6 = vcmask 326656  }
 0x29d   : > { %1024 = vst.msk [vmem:[#allocation4 + $0x2b8] sm:$0xff] %vm379_vm3, %v1008_v41 }
 0x29e   : > { %2363 = vmatpush.msra.mxu0 %v4515_v54 }
 0x29f   : > { %2240 = vmatmul.f32.gmra.mxu0 %v5091_v13 }
 0x2a0   : > { %2364 = vmatpush.msra.mxu0 %v5096_v17 }
 0x2a1   : > { %1695 = vrot.lane.b32.xlu0 %v5073_v43, %s4267_s17  ;;  %1697 = vrot.lane.b32.xlu1 %v5096_v17, %s4267_s17 }
 0x2a2   : > { %1707 = vrot.lane.b32.xlu2 %v4515_v54, %s4267_s17  ;;  %2489 = vmatpush.msrb.mxu0 %v833_v18 }
 0x2a3   : > { %v1127_v50 = vpop.permute.xlu0 %1126  ;;  %v1060_v31 = vpop.permute.xlu1 %1059 }
 0x2a4   : > { %v5106_v46 = vsel %vm1130_vm15, %v1125_v2, %v1127_v50  ;;  %v1138_v53 = vsel %vm1130_vm15, %v1127_v50, %v4925_v19  ;;  %v5112_v44 = vsel %vm6734_vm2, %v4900_v32, %v1060_v31  ;;  %v1194_v15 = vpop.permute.xlu2 %1193  ;;  %2490 = vmatpush.msrb.mxu0 %v4752_v30  ;;  %v5116_v59 = vsel %vm6734_vm2, %v1060_v31, %v1062_v9  ;;  %v5126_v32 = vld [vmem:[#allocation2 + $0x28] sm:$0xff]  ;;  %v2024_v9 = vld [vmem:[#allocation4 + $0x198] sm:$0xff] }
 0x2a5   : > { %1154 = vst.msk [vmem:[#allocation4 + $0x338] sm:$0xff] %vm379_vm3, %v1138_v53  ;;  %v2008_v50 = vld [vmem:[#allocation4 + $0x118] sm:$0xff]  ;;  %vm2177_vm2 = vcmask 138240  }
 0x2a6   : > { %2491 = vmatpush.msrb.mxu0 %v5013_v11  ;;  %v2004_v31 = vld [vmem:[#allocation4 + $0xf8] sm:$0xff] }
 0x2a7   : > { %2365 = vmatmul.f32.vlgmr.msra.gmra.mxu0 %v4964_v6 }
 0x2a8   : > { %2492 = vmatpush.msrb.mxu0 %v4755_v23 }
 0x2a9   : > { %1642 = vrot.lane.b32.xlu0 %v4515_v54, %s4268_s25  ;;  %1630 = vrot.lane.b32.xlu1 %v5073_v43, %s4268_s25 }
 0x2aa   : > { %1640 = vrot.lane.b32.xlu2 %v5126_v32, %s4268_s25  ;;  %2493 = vmatpush.msrb.mxu0 %v4993_v7 }
 0x2ab   : > { %v1184_v30 = vpop.permute.xlu0 %1183  ;;  %v1186_v19 = vpop.permute.xlu1 %1185 }
 0x2ac   : > { %v1199_v14 = vsel %vm1195_vm7, %v4783_v61, %v1184_v30  ;;  %v5134_v23 = vsel %vm1195_vm7, %v1186_v19, %v1188_v51  ;;  %v1245_v48 = vpop.permute.xlu2 %1244  ;;  %2494 = vmatpush.msrb.mxu0 %v4737_v16  ;;  %v2000_v30 = vld [vmem:[#allocation4 + $0xd8] sm:$0xff] }
 0x2ad   : > { %1215 = vst.msk [vmem:[#allocation4 + $0x358] sm:$0xff] %vm379_vm3, %v1199_v14 }
 0x2ae   : > { %2495 = vmatpush.msrb.mxu0 %v4987_v62 }
 0x2af   : > { %2368 = vmatmul.f32.gmra.mxu0 %v4984_v49 }
 0x2b0   : > { %2496 = vmatpush.msrb.mxu0 %v4716_v3 }
 0x2b1   : > { %1575 = vrot.lane.b32.xlu0 %v5126_v32, %s4269_s26  ;;  %1577 = vrot.lane.b32.xlu1 %v4515_v54, %s4269_s26  ;;  %v1991_v54 = vld [vmem:[#allocation4 + $0x90] sm:$0xff] }
 0x2b2   : > { %1632 = vrot.lane.b32.xlu2 %v5096_v17, %s4268_s25  ;;  %2497 = vmatpush.msrb.mxu0 %v4969_v28  ;;  %v1983_v28 = vld [vmem:[#allocation4 + $0x50] sm:$0xff] }
 0x2b3   : > { %v1190_v16 = vpop.permute.xlu0 %1189  ;;  %v1192_v61 = vpop.permute.xlu1 %1191 }
 0x2b4   : > { %v5149_v47 = vsel %vm1195_vm7, %v1188_v51, %v1190_v16  ;;  %v5152_v29 = vsel %vm1195_vm7, %v1190_v16, %v1192_v61  ;;  %v1203_v3 = vsel %vm1195_vm7, %v1192_v61, %v1194_v15  ;;  %v1251_v62 = vpop.permute.xlu2 %1250  ;;  %2498 = vmatpush.msrb.mxu0 %v4719_v4  ;;  %v2012_v51 = vld [vmem:[#allocation4 + $0x138] sm:$0xff] }
 0x2b5   : > { %1219 = vst.msk [vmem:[#allocation4 + $0x378] sm:$0xff] %vm379_vm3, %v1203_v3  ;;  %v1996_v16 = vld [vmem:[#allocation4 + $0xb8] sm:$0xff] }
 0x2b6   : > { %2499 = vmatpush.msrb.mxu0 %v4946_v40  ;;  %v1992_v61 = vld [vmem:[#allocation4 + $0x98] sm:$0xff] }
 0x2b7   : > { %2371 = vmatmul.f32.gmra.mxu0 %v5008_v27  ;;  %v1988_v3 = vld [vmem:[#allocation4 + $0x78] sm:$0xff] }
 0x2b8   : > { %2500 = vmatpush.msrb.mxu0 %v1991_v54 }
 0x2b9   : > { %1567 = vrot.lane.b32.xlu0 %v5096_v17, %s4269_s26  ;;  %1510 = vrot.lane.b32.xlu1 %v5126_v32, %s4270_s27 }
 0x2ba   : > { %1565 = vrot.lane.b32.xlu2 %v5073_v43, %s4269_s26  ;;  %2501 = vmatpush.msrb.mxu0 %v4938_v20  ;;  %v2036_v20 = vld [vmem:[#allocation4 + $0x1f8] sm:$0xff] }
 0x2bb   : > { %v1241_v4 = vpop.permute.xlu0 %1240  ;;  %v1243_v40 = vpop.permute.xlu1 %1242 }
 0x2bc   : > { %v5167_v55 = vsel %vm1260_vm8, %v1241_v4, %v1243_v40  ;;  %v5170_v7 = vsel %vm1260_vm8, %v1243_v40, %v1245_v48  ;;  %v1257_v0 = vpop.permute.xlu2 %1256  ;;  %2502 = vmatpush.msrb.mxu0 %v1983_v28  ;;  %v1984_v4 = vld [vmem:[#allocation4 + $0x58] sm:$0xff] }
 0x2be   : > { %2503 = vmatpush.msrb.mxu0 %v5172_v52 }
 0x2bf   : > { %2374 = vmatmul.f32.gmra.mxu0 %v5036_v37 }
 0x2c0   : > { %2504 = vmatpush.msrb.mxu0 %v5176_v5 }
 0x2c1   : > { %1500 = vrot.lane.b32.xlu0 %v5073_v43, %s4270_s27  ;;  %1502 = vrot.lane.b32.xlu1 %v5096_v17, %s4270_s27 }
 0x2c2   : > { %1512 = vrot.lane.b32.xlu2 %v4234_v8, %s4270_s27  ;;  %2629 = vmatpush.msra.mxu0 %v2036_v20 }
 0x2c3   : > { %v1247_v25 = vpop.permute.xlu0 %1246  ;;  %v1249_v11 = vpop.permute.xlu1 %1248 }
 0x2c4   : > { %v5185_v42 = vsel %vm1260_vm8, %v1245_v48, %v1247_v25  ;;  %v1264_v58 = vsel %vm1260_vm8, %v1247_v25, %v1249_v11  ;;  %v1308_v18 = vpop.permute.xlu2 %1307  ;;  %2630 = vmatpush.msra.mxu0 %v2032_v33 }
 0x2c5   : > { %1280 = vst.msk [vmem:[#allocation4 + $0x398] sm:$0xff] %vm379_vm3, %v1264_v58 }
 0x2c6   : > { %2631 = vmatpush.msra.mxu0 %v2028_v22 }
 0x2c7   : > { %2377 = vmatmul.f32.gmra.mxu0 %v5060_v56 }
 0x2c8   : > { %2632 = vmatpush.msra.mxu0 %v2024_v9 }
 0x2c9   : > { %1447 = vrot.lane.b32.xlu0 %v4234_v8, %s4271_s28  ;;  %1435 = vrot.lane.b32.xlu1 %v5073_v43, %s4271_s28 }
 0x2ca   : > { %1445 = vrot.lane.b32.xlu2 %v5126_v32, %s4271_s28  ;;  %2633 = vmatpush.msra.mxu0 %v2020_v34 }
 0x2cb   : > { %v1253_v12 = vpop.permute.xlu0 %1252  ;;  %v1255_v38 = vpop.permute.xlu1 %1254 }
 0x2cc   : > { %v1265_v2 = vsel %vm1260_vm8, %v1251_v62, %v1253_v12  ;;  %v5197_v1 = vsel %vm1260_vm8, %v1253_v12, %v1255_v38  ;;  %v5200_v21 = vsel %vm1260_vm8, %v1255_v38, %v1257_v0  ;;  %v1314_v41 = vpop.permute.xlu2 %1313  ;;  %2634 = vmatpush.msra.mxu0 %v2016_v35  ;;  %v2077_v12 = vld [vmem:[#allocation4 + $0x340] sm:$0xff] }
 0x2ce   : > { %2635 = vmatpush.msra.mxu0 %v2012_v51  ;;  %v2061_v51 = vld [vmem:[#allocation4 + $0x2c0] sm:$0xff] }
 0x2cf   : > { %2380 = vmatmul.f32.gmra.mxu0 %v5091_v13 }
 0x2d0   : > { %2636 = vmatpush.msra.mxu0 %v2008_v50 }
 0x2d1   : > { %1380 = vrot.lane.b32.xlu0 %v5126_v32, %s4264_s30  ;;  %1382 = vrot.lane.b32.xlu1 %v4234_v8, %s4264_s30 }
 0x2d2   : > { %1437 = vrot.lane.b32.xlu2 %v5096_v17, %s4271_s28  ;;  %2637 = vmatpush.msra.mxu0 %v2004_v31 }
 0x2d3   : > { %v1259_v53 = vpop.permute.xlu0 %1258  ;;  %v1306_v15 = vpop.permute.xlu1 %1305 }
 0x2d4   : > { %v1268_v19 = vsel %vm1260_vm8, %v1257_v0, %v1259_v53  ;;  %v1326_v14 = vsel %vm1325_vm9, %v1306_v15, %v1308_v18  ;;  %v1320_v48 = vpop.permute.xlu2 %1319  ;;  %2638 = vmatpush.msra.mxu0 %v2000_v30  ;;  %vm1585_vm8 = vcmask 474112  }
 0x2d5   : > { %1284 = vst.msk [vmem:[#allocation4 + $0x3b8] sm:$0xff] %vm379_vm3, %v1268_v19  ;;  %v2049_v19 = vld [vmem:[#allocation4 + $0x260] sm:$0xff] }
 0x2d6   : > { %2639 = vmatpush.msra.mxu0 %v1996_v16 }
 0x2d7   : > { %2505 = vmatmul.f32.vlgmr.msrb.gmra.mxu0 %v4964_v6 }
 0x2d8   : > { %2640 = vmatpush.msra.mxu0 %v1992_v61 }
 0x2d9   : > { %1902 = vrot.lane.b32.xlu0 %v4234_v8, %s4272_s29  ;;  %1890 = vrot.lane.b32.xlu1 %v5073_v43, %s4272_s29  ;;  %v1980_v8 = vld [vmem:[#allocation4 + $0x38] sm:$0xff] }
 0x2da   : > { %1900 = vrot.lane.b32.xlu2 %v5126_v32, %s4272_s29  ;;  %2641 = vmatpush.msra.mxu0 %v1988_v3  ;;  %v1976_v43 = vld [vmem:[#allocation4 + $0x18] sm:$0xff]  ;;  %v2037_v3 = vld [vmem:[#allocation4 + $0x200] sm:$0xff] }
 0x2db   : > { %v1310_v62 = vpop.permute.xlu0 %1309  ;;  %v1312_v54 = vpop.permute.xlu1 %1311 }
 0x2dc   : > { %v5218_v40 = vsel %vm1325_vm9, %v1308_v18, %v1310_v62  ;;  %v5221_v28 = vsel %vm1325_vm9, %v1310_v62, %v1312_v54  ;;  %v1329_v0 = vsel %vm1325_vm9, %v1312_v54, %v1314_v41  ;;  %v1371_v20 = vpop.permute.xlu2 %1370  ;;  %2642 = vmatpush.msra.mxu0 %v1984_v4  ;;  %v5297_v62 = vld [vmem:[%s6727_s2 + $0x8] sm:$0xff] }
 0x2dd   : > { %1345 = vst.msk [vmem:[#allocation4 + $0x3d8] sm:$0xff] %vm379_vm3, %v1329_v0 }
 0x2de   : > { %2643 = vmatpush.msra.mxu0 %v1980_v8 }
 0x2df   : > { %2508 = vmatmul.f32.gmra.mxu0 %v4984_v49 }
 0x2e0   : > { %2644 = vmatpush.msra.mxu0 %v1976_v43 }
 0x2e1   : > { %1839 = vrot.lane.b32.xlu0 %v5172_v52, %s4265_s7  ;;  %1829 = vrot.lane.b32.xlu1 %v5176_v5, %s4265_s7 }
 0x2e2   : > { %1892 = vrot.lane.b32.xlu2 %v5096_v17, %s4272_s29 }
 0x2e3   : > { %v1316_v32 = vpop.permute.xlu0 %1315  ;;  %v1318_v25 = vpop.permute.xlu1 %1317 }
 0x2e4   : > { %v1330_v11 = vsel %vm1325_vm9, %v1316_v32, %v1318_v25  ;;  %v5234_v33 = vsel %vm1325_vm9, %v1318_v25, %v1320_v48  ;;  %v1836_v58 = vpop.permute.xlu2 %1835  ;;  %v2062_v25 = vld [vmem:[#allocation4 + $0x2c8] sm:$0xff] }
 0x2e5   : > { %2244 = vmatpush.msrb.mxu1 %v1330_v11  ;;  %v2054_v11 = vld [vmem:[#allocation4 + $0x288] sm:$0xff] }
 0x2e7   : > { %2245 = vmatpush.msrb.mxu1 %v1326_v14  ;;  %2511 = vmatmul.f32.gmra.mxu0 %v5008_v27  ;;  %v2045_v14 = vld [vmem:[#allocation4 + $0x240] sm:$0xff] }
 0x2e9   : > { %1764 = vrot.lane.b32.xlu0 %v5176_v5, %s4266_s12  ;;  %1709 = vrot.lane.b32.xlu1 %v5172_v52, %s4267_s17 }
 0x2ea   : > { %1774 = vrot.lane.b32.xlu2 %v5172_v52, %s4266_s12  ;;  %2246 = vmatpush.msrb.mxu1 %v1265_v2 }
 0x2eb   : > { %v1322_v17 = vpop.permute.xlu0 %1321  ;;  %v1324_v18 = vpop.permute.xlu1 %1323 }
 0x2ec   : > { %v5244_v22 = vsel %vm1325_vm9, %v1320_v48, %v1322_v17  ;;  %v1333_v9 = vsel %vm1325_vm9, %v1322_v17, %v1324_v18  ;;  %v5247_v34 = vpop.permute.xlu2 %1827  ;;  %2247 = vmatpush.msrb.mxu1 %v5167_v55  ;;  %v2041_v48 = vld [vmem:[#allocation4 + $0x220] sm:$0xff]  ;;  %v5366_v17 = vld [vmem:[%s6727_s2 + $0x68] sm:$0xff]  ;;  %vm1520_vm9 = vcmask 482304  }
 0x2ed   : > { %1349 = vst.msk [vmem:[#allocation4 + $0x3f8] sm:$0xff] %vm379_vm3, %v1333_v9  ;;  %v2038_v9 = vld [vmem:[#allocation4 + $0x208] sm:$0xff] }
 0x2ee   : > { %2248 = vmatpush.msrb.mxu1 %v5134_v23  ;;  %v2069_v23 = vld [vmem:[#allocation4 + $0x300] sm:$0xff] }
 0x2ef   : > { %2514 = vmatmul.f32.gmra.mxu0 %v5036_v37 }
 0x2f0   : > { %2249 = vmatpush.msrb.mxu1 %v2077_v12 }
 0x2f1   : > { %1644 = vrot.lane.b32.xlu0 %v5172_v52, %s4268_s25  ;;  %1634 = vrot.lane.b32.xlu1 %v5176_v5, %s4268_s25 }
 0x2f2   : > { %1699 = vrot.lane.b32.xlu2 %v5176_v5, %s4267_s17  ;;  %2250 = vmatpush.msrb.mxu1 %v4910_v26  ;;  %v2057_v26 = vld [vmem:[#allocation4 + $0x2a0] sm:$0xff] }
 0x2f3   : > { %v1373_v55 = vpop.permute.xlu0 %1372  ;;  %v5260_v38 = vpop.permute.xlu1 %1374 }
 0x2f4   : > { %v5263_v35 = vsel %vm1390_vm10, %v1371_v20, %v1373_v55  ;;  %v5267_v2 = vsel %vm1390_vm10, %v1373_v55, %v5260_v38  ;;  %v1761_v41 = vpop.permute.xlu2 %1760  ;;  %2251 = vmatpush.msrb.mxu1 %v2069_v23  ;;  %v5386_v55 = vld [vmem:[%s6727_s2 + $0x88] sm:$0xff] }
 0x2f6   : > { %2252 = vmatpush.msrb.mxu1 %v4906_v24  ;;  %v2053_v24 = vld [vmem:[#allocation4 + $0x280] sm:$0xff] }
 0x2f7   : > { %2517 = vmatmul.f32.gmra.mxu0 %v5060_v56 }
 0x2f8   : > { %2253 = vmatpush.msrb.mxu1 %v2061_v51  ;;  %v5412_v51 = vld [vmem:[%s6727_s2 + $0xa8] sm:$0xff] }
 0x2f9   : > { %1569 = vrot.lane.b32.xlu0 %v5176_v5, %s4269_s26  ;;  %1514 = vrot.lane.b32.xlu1 %v5172_v52, %s4270_s27 }
 0x2fa   : > { %1579 = vrot.lane.b32.xlu2 %v5172_v52, %s4269_s26  ;;  %2254 = vmatpush.msrb.mxu1 %v2057_v26  ;;  %v2071_v26 = vld [vmem:[#allocation4 + $0x310] sm:$0xff] }
 0x2fb   : > { %v5277_v50 = vpop.permute.xlu0 %1837  ;;  %v1826_v31 = vpop.permute.xlu1 %1825 }
 0x2fc   : > { %v1850_v53 = vsel %vm1845_vm11, %v1836_v58, %v5277_v50  ;;  %v1846_v15 = vsel %vm1845_vm11, %v1826_v31, %v5247_v34  ;;  %v5283_v30 = vpop.permute.xlu2 %1707  ;;  %2255 = vmatpush.msrb.mxu1 %v2053_v24  ;;  %v2063_v24 = vld [vmem:[#allocation4 + $0x2d0] sm:$0xff] }
 0x2fd   : > { %2279 = vmatpush.msrb.mxu2 %v1850_v53 }
 0x2fe   : > { %2256 = vmatpush.msrb.mxu1 %v2049_v19 }
 0x2ff   : > { %2280 = vmatpush.msrb.mxu2 %v1846_v15  ;;  %2520 = vmatmul.f32.gmra.mxu0 %v5091_v13  ;;  %v2055_v15 = vld [vmem:[#allocation4 + $0x290] sm:$0xff] }
 0x300   : > { %2257 = vmatpush.msrb.mxu1 %v2045_v14  ;;  %v2051_v14 = vld [vmem:[#allocation4 + $0x270] sm:$0xff] }
 0x301   : > { %1449 = vrot.lane.b32.xlu0 %v5172_v52, %s4271_s28  ;;  %1439 = vrot.lane.b32.xlu1 %v5176_v5, %s4271_s28 }
 0x302   : > { %1504 = vrot.lane.b32.xlu2 %v5176_v5, %s4270_s27  ;;  %2258 = vmatpush.msrb.mxu1 %v2041_v48  ;;  %v5446_v48 = vld [vmem:[#allocation2 + $0x48] sm:$0xff] }
 0x303   : > { %v1771_v16 = vpop.permute.xlu0 %1770  ;;  %v5292_v61 = vpop.permute.xlu1 %1772 }
 0x304   : > { %v1785_v54 = vsel %vm1780_vm14, %v1771_v16, %v5292_v61  ;;  %v1641_v4 = vpop.permute.xlu2 %1640  ;;  %2259 = vmatpush.msrb.mxu1 %v2037_v3  ;;  %v2043_v16 = vld [vmem:[#allocation4 + $0x230] sm:$0xff] }
 0x305   : > { %2281 = vmatpush.msrb.mxu2 %v1785_v54  ;;  %2260 = vmatmul.f32.vlgmr.msrb.gmra.mxu1 %v5297_v62 }
 0x306   : > { %2384 = vmatpush.msra.mxu1 %v5234_v33 }
 0x307   : > { %2645 = vmatmul.f32.vlgmr.msra.gmra.mxu0 %v4964_v6 }
 0x308   : > { %2385 = vmatpush.msra.mxu1 %v5218_v40 }
 0x309   : > { %1904 = vrot.lane.b32.xlu0 %v5172_v52, %s4272_s29  ;;  %1894 = vrot.lane.b32.xlu1 %v5176_v5, %s4272_s29  ;;  %v5324_v5 = vld [vmem:[%s6727_s2 + $0x28] sm:$0xff] }
 0x30a   : > { %1384 = vrot.lane.b32.xlu2 %v5172_v52, %s4264_s30  ;;  %2386 = vmatpush.msra.mxu1 %v5197_v1  ;;  %v2078_v52 = vld [vmem:[#allocation4 + $0x348] sm:$0xff] }
 0x30b   : > { %v5312_v0 = vpop.permute.xlu0 %1762  ;;  %v1706_v20 = vpop.permute.xlu1 %1705  ;;  %v2070_v1 = vld [vmem:[#allocation4 + $0x308] sm:$0xff] }
 0x30c   : > { %v1781_v40 = vsel %vm1780_vm14, %v1761_v41, %v5312_v0  ;;  %v1720_v6 = vsel %vm1715_vm0, %v1706_v20, %v5283_v30  ;;  %v5318_v8 = vpop.permute.xlu2 %1632  ;;  %2387 = vmatpush.msra.mxu1 %v5170_v7 }
 0x30d   : > { %2282 = vmatpush.msrb.mxu2 %v1781_v40  ;;  %2263 = vmatmul.f32.gmra.mxu1 %v5324_v5 }
 0x30e   : > { %2388 = vmatpush.msra.mxu1 %v5149_v47 }
 0x30f   : > { %2283 = vmatpush.msrb.mxu2 %v1720_v6  ;;  %2648 = vmatmul.f32.gmra.mxu0 %v4984_v49  ;;  %v5343_v49 = vld [vmem:[%s6727_s2 + $0x48] sm:$0xff] }
 0x310   : > { %2389 = vmatpush.msra.mxu1 %v2078_v52  ;;  %v2100_v6 = vld [vmem:[#allocation4 + $0x3f8] sm:$0xff] }
 0x311   : > { %1831 = vrot.lane.b32.xlu0 %v4462_v45, %s4265_s7  ;;  %1776 = vrot.lane.b32.xlu1 %v4529_v57, %s4266_s12 }
 0x312   : > { %1841 = vrot.lane.b32.xlu2 %v4529_v57, %s4265_s7  ;;  %2390 = vmatpush.msra.mxu1 %v5064_v36 }
 0x313   : > { %v1696_v7 = vpop.permute.xlu0 %1695  ;;  %v5336_v47 = vpop.permute.xlu1 %1697 }
 0x314   : > { %v1716_v43 = vsel %vm1715_vm0, %v1696_v7, %v5336_v47  ;;  %v1566_v32 = vpop.permute.xlu2 %1565  ;;  %2391 = vmatpush.msra.mxu1 %v2070_v1  ;;  %v5469_v7 = vld [vmem:[%s6727_s2 + $0x10] sm:$0xff]  ;;  %v2096_v1 = vld [vmem:[#allocation4 + $0x3d8] sm:$0xff] }
 0x315   : > { %2284 = vmatpush.msrb.mxu2 %v1716_v43  ;;  %2266 = vmatmul.f32.gmra.mxu1 %v5343_v49 }
 0x316   : > { %2392 = vmatpush.msra.mxu1 %v5112_v44 }
 0x317   : > { %2651 = vmatmul.f32.gmra.mxu0 %v5008_v27 }
 0x318   : > { %2393 = vmatpush.msra.mxu1 %v2062_v25  ;;  %v2088_v25 = vld [vmem:[#allocation4 + $0x398] sm:$0xff] }
 0x319   : > { %1711 = vrot.lane.b32.xlu0 %v4529_v57, %s4267_s17  ;;  %1701 = vrot.lane.b32.xlu1 %v4462_v45, %s4267_s17 }
 0x31a   : > { %1766 = vrot.lane.b32.xlu2 %v4462_v45, %s4266_s12  ;;  %2394 = vmatpush.msra.mxu1 %v5080_v10  ;;  %v2046_v10 = vld [vmem:[#allocation4 + $0x248] sm:$0xff] }
 0x31b   : > { %v5355_v36 = vpop.permute.xlu0 %1642  ;;  %v1631_v44 = vpop.permute.xlu1 %1630 }
 0x31c   : > { %v1655_v33 = vsel %vm1650_vm6, %v1641_v4, %v5355_v36  ;;  %v1651_v27 = vsel %vm1650_vm6, %v1631_v44, %v5318_v8  ;;  %v5361_v58 = vpop.permute.xlu2 %1512  ;;  %2395 = vmatpush.msra.mxu1 %v2054_v11  ;;  %v2039_v4 = vld [vmem:[#allocation4 + $0x210] sm:$0xff] }
 0x31d   : > { %2285 = vmatpush.msrb.mxu2 %v1655_v33  ;;  %2269 = vmatmul.f32.gmra.mxu1 %v5366_v17 }
 0x31e   : > { %2396 = vmatpush.msra.mxu1 %v5052_v39 }
 0x31f   : > { %2286 = vmatpush.msrb.mxu2 %v1651_v27  ;;  %2654 = vmatmul.f32.gmra.mxu0 %v5036_v37  ;;  %v2084_v27 = vld [vmem:[#allocation4 + $0x378] sm:$0xff] }
 0x320   : > { %2397 = vmatpush.msra.mxu1 %v2046_v10  ;;  %v5496_v10 = vld [vmem:[%s6727_s2 + $0x18] sm:$0xff] }
 0x321   : > { %1636 = vrot.lane.b32.xlu0 %v4462_v45, %s4268_s25  ;;  %1581 = vrot.lane.b32.xlu1 %v4529_v57, %s4269_s26 }
 0x322   : > { %1646 = vrot.lane.b32.xlu2 %v4529_v57, %s4268_s25  ;;  %2398 = vmatpush.msra.mxu1 %v5029_v63  ;;  %v2173_v63 = vld [vmem:[#allocation4 + $0x640] sm:$0x1] }
 0x323   : > { %v1576_v39 = vpop.permute.xlu0 %1575  ;;  %v5378_v18 = vpop.permute.xlu1 %1577  ;;  %4148 = vmatpush.msk.msrb.mxu3 %vm2196_vm12, %v2173_v63  ;;  %v2072_v63 = vld [vmem:[#allocation4 + $0x318] sm:$0xff] }
 0x324   : > { %v1590_v12 = vsel %vm1585_vm8, %v1576_v39, %v5378_v18  ;;  %v1446_v37 = vpop.permute.xlu2 %1445  ;;  %2399 = vmatpush.msra.mxu1 %v2038_v9  ;;  %v2080_v39 = vld [vmem:[#allocation4 + $0x358] sm:$0xff] }
 0x325   : > { %2287 = vmatpush.msrb.mxu2 %v1590_v12  ;;  %2272 = vmatmul.f32.gmra.mxu1 %v5386_v55  ;;  %v2076_v9 = vld [vmem:[#allocation4 + $0x338] sm:$0xff] }
 0x326   : > { %2524 = vmatpush.msrb.mxu1 %v5244_v22 }
 0x327   : > { %2657 = vmatmul.f32.gmra.mxu0 %v5060_v56 }
 0x328   : > { %2525 = vmatpush.msrb.mxu1 %v5221_v28 }
 0x329   : > { %1516 = vrot.lane.b32.xlu0 %v4529_v57, %s4270_s27  ;;  %1506 = vrot.lane.b32.xlu1 %v4462_v45, %s4270_s27 }
 0x32a   : > { %1571 = vrot.lane.b32.xlu2 %v4462_v45, %s4269_s26  ;;  %2526 = vmatpush.msrb.mxu1 %v5200_v21  ;;  %v2079_v21 = vld [vmem:[#allocation4 + $0x350] sm:$0xff] }
 0x32b   : > { %v5398_v22 = vpop.permute.xlu0 %1567  ;;  %v1511_v28 = vpop.permute.xlu1 %1510 }
 0x32c   : > { %v1586_v56 = vsel %vm1585_vm8, %v1566_v32, %v5398_v22  ;;  %v1525_v23 = vsel %vm1520_vm9, %v1511_v28, %v5361_v58  ;;  %v5405_v41 = vpop.permute.xlu2 %1437  ;;  %2527 = vmatpush.msrb.mxu1 %v5185_v42 }
 0x32d   : > { %2288 = vmatpush.msrb.mxu2 %v1586_v56  ;;  %2275 = vmatmul.f32.gmra.mxu1 %v5412_v51 }
 0x32e   : > { %2528 = vmatpush.msrb.mxu1 %v5152_v29 }
 0x32f   : > { %2289 = vmatpush.msrb.mxu2 %v1525_v23  ;;  %2660 = vmatmul.f32.gmra.mxu0 %v5091_v13 }
 0x330   : > { %2529 = vmatpush.msrb.mxu1 %v2079_v21 }
 0x331   : > { %1441 = vrot.lane.b32.xlu0 %v4462_v45, %s4271_s28  ;;  %1386 = vrot.lane.b32.xlu1 %v4529_v57, %s4264_s30 }
 0x332   : > { %1451 = vrot.lane.b32.xlu2 %v4529_v57, %s4271_s28  ;;  %2530 = vmatpush.msrb.mxu1 %v5106_v46 }
 0x333   : > { %v1501_v29 = vpop.permute.xlu0 %1500  ;;  %v5422_v42 = vpop.permute.xlu1 %1502 }
 0x334   : > { %v1521_v13 = vsel %vm1520_vm9, %v1501_v29, %v5422_v42  ;;  %v1901_v31 = vpop.permute.xlu2 %1900  ;;  %2531 = vmatpush.msrb.mxu1 %v2071_v26  ;;  %v2068_v29 = vld [vmem:[#allocation4 + $0x2f8] sm:$0xff]  ;;  %v5531_v26 = vld [vmem:[%s6727_s2 + $0x38] sm:$0xff] }
 0x335   : > { %2290 = vmatpush.msrb.mxu2 %v1521_v13  ;;  %2400 = vmatmul.f32.vlgmr.msra.gmra.mxu1 %v5297_v62  ;;  %v5542_v13 = vld [vmem:[%s6727_s2 + $0x50] sm:$0xff] }
 0x336   : > { %2532 = vmatpush.msrb.mxu1 %v5116_v59 }
 0x338   : > { %2533 = vmatpush.msrb.mxu1 %v2063_v24 }
 0x339   : > { %1906 = vrot.lane.b32.xlu0 %v4529_v57, %s4272_s29  ;;  %1896 = vrot.lane.b32.xlu1 %v4462_v45, %s4272_s29 }
 0x33a   : > { %1376 = vrot.lane.b32.xlu2 %v4462_v45, %s4264_s30  ;;  %2534 = vmatpush.msrb.mxu1 %v5083_v60  ;;  %v2047_v45 = vld [vmem:[#allocation4 + $0x250] sm:$0xff]  ;;  %v5444_v60 = vld [vmem:[#allocation2 + $0x20] sm:$0xff] }
 0x33b   : > { %v5435_v46 = vpop.permute.xlu0 %1447  ;;  %v1436_v53 = vpop.permute.xlu1 %1435 }
 0x33c   : > { %v1460_v59 = vsel %vm1455_vm1, %v1446_v37, %v5435_v46  ;;  %v1456_v57 = vsel %vm1455_vm1, %v1436_v53, %v5405_v41  ;;  %v5442_v19 = vpop.permute.xlu2 %1892  ;;  %2535 = vmatpush.msrb.mxu1 %v2055_v15  ;;  %v2056_v53 = vld [vmem:[#allocation4 + $0x298] sm:$0xff] }
 0x33d   : > { %2291 = vmatpush.msrb.mxu2 %v1460_v59  ;;  %2403 = vmatmul.f32.gmra.mxu1 %v5324_v5 }
 0x33e   : > { %2536 = vmatpush.msrb.mxu1 %v2051_v14 }
 0x33f   : > { %2292 = vmatpush.msrb.mxu2 %v1456_v57 }
 0x340   : > { %2537 = vmatpush.msrb.mxu1 %v2047_v45  ;;  %v2052_v45 = vld [vmem:[#allocation4 + $0x278] sm:$0xff] }
 0x341   : > { %1833 = vrot.lane.b32.xlu0 %v5444_v60, %s4265_s7  ;;  %1778 = vrot.lane.b32.xlu1 %v5446_v48, %s4266_s12 }
 0x342   : > { %1843 = vrot.lane.b32.xlu2 %v5446_v48, %s4265_s7  ;;  %2538 = vmatpush.msrb.mxu1 %v2043_v16  ;;  %v5567_v16 = vld [vmem:[%s6727_s2 + $0x58] sm:$0xff] }
 0x343   : > { %v1381_v3 = vpop.permute.xlu0 %1380  ;;  %v5454_v54 = vpop.permute.xlu1 %1382 }
 0x344   : > { %v1395_v20 = vsel %vm1390_vm10, %v1381_v3, %v5454_v54  ;;  %v5459_v40 = vpop.permute.xlu2 %1774  ;;  %2539 = vmatpush.msrb.mxu1 %v2039_v4 }
 0x345   : > { %v5464_v52 = vsel %vm1780_vm14, %v5292_v61, %v5459_v40  ;;  %2293 = vmatpush.msrb.mxu2 %v1395_v20  ;;  %v2092_v61 = vld [vmem:[#allocation4 + $0x3b8] sm:$0xff]  ;;  %2406 = vmatmul.f32.gmra.mxu1 %v5343_v49 }
 0x346   : > { %2664 = vmatpush.msra.mxu1 %v2100_v6  ;;  %v2040_v20 = vld [vmem:[#allocation4 + $0x218] sm:$0xff] }
 0x347   : > { %2294 = vmatpush.msrb.mxu2 %v5263_v35 }
 0x348   : > { %2665 = vmatpush.msra.mxu1 %v2096_v1  ;;  %2295 = vmatmul.f32.vlgmr.msrb.gmra.mxu2 %v5469_v7 }
 0x349   : > { %1713 = vrot.lane.b32.xlu0 %v5446_v48, %s4267_s17  ;;  %1703 = vrot.lane.b32.xlu1 %v5444_v60, %s4267_s17 }
 0x34a   : > { %1768 = vrot.lane.b32.xlu2 %v5444_v60, %s4266_s12  ;;  %2666 = vmatpush.msra.mxu1 %v2092_v61 }
 0x34b   : > { %v5479_v43 = vpop.permute.xlu0 %1902  ;;  %v1891_v32 = vpop.permute.xlu1 %1890 }
 0x34c   : > { %v1915_v35 = vsel %vm1910_vm13, %v1901_v31, %v5479_v43  ;;  %v1911_v44 = vsel %vm1910_vm13, %v1891_v32, %v5442_v19  ;;  %v5486_v11 = vpop.permute.xlu2 %1699  ;;  %2667 = vmatpush.msra.mxu1 %v2088_v25  ;;  %v5600_v32 = vld [vmem:[%s6727_s2 + $0x78] sm:$0xff] }
 0x34d   : > { %v5491_v33 = vsel %vm1715_vm0, %v5336_v47, %v5486_v11  ;;  %2328 = vmatpush.msrb.mxu3 %v1915_v35  ;;  %v5503_v47 = vld [vmem:[%s6727_s2 + $0x30] sm:$0xff]  ;;  %2409 = vmatmul.f32.gmra.mxu1 %v5366_v17 }
 0x34e   : > { %2668 = vmatpush.msra.mxu1 %v2084_v27 }
 0x34f   : > { %2329 = vmatpush.msrb.mxu3 %v1911_v44 }
 0x350   : > { %2669 = vmatpush.msra.mxu1 %v2080_v39  ;;  %4149 = vmatmul.msk.f32.vlgmr.msrb.gmra.mxu3 %vm2177_vm2, %v5496_v10 }
 0x351   : > { %1638 = vrot.lane.b32.xlu0 %v5444_v60, %s4268_s25  ;;  %1583 = vrot.lane.b32.xlu1 %v5446_v48, %s4269_s26 }
 0x352   : > { %1648 = vrot.lane.b32.xlu2 %v5446_v48, %s4268_s25  ;;  %2670 = vmatpush.msra.mxu1 %v2076_v9 }
 0x353   : > { %v5511_v12 = vpop.permute.xlu0 %1839  ;;  %v5513_v37 = vpop.permute.xlu1 %1829  ;;  %2298 = vmatmul.f32.gmra.mxu2 %v5503_v47 }
 0x354   : > { %v1851_v28 = vsel %vm1845_vm11, %v5277_v50, %v5511_v12  ;;  %v1847_v56 = vsel %vm1845_vm11, %v5247_v34, %v5513_v37  ;;  %v5523_v23 = vpop.permute.xlu2 %1579  ;;  %2671 = vmatpush.msra.mxu1 %v2072_v63  ;;  %v2064_v50 = vld [vmem:[#allocation4 + $0x2d8] sm:$0xff]  ;;  %v2174_v34 = vld [vmem:[#allocation4 + $0x648] sm:$0x1] }
 0x355   : > { %v1591_v21 = vsel %vm1585_vm8, %v5378_v18, %v5523_v23  ;;  %2419 = vmatpush.msra.mxu2 %v1851_v28  ;;  %v2060_v18 = vld [vmem:[#allocation4 + $0x2b8] sm:$0xff]  ;;  %4155 = vmatpush.msk.msra.mxu3 %vm2196_vm12, %v2174_v34  ;;  %v5658_v63 = vld [vmem:[%s6727_s2 + $0xb8] sm:$0xff] }
 0x356   : > { %2672 = vmatpush.msra.mxu1 %v2068_v29 }
 0x357   : > { %2420 = vmatpush.msra.mxu2 %v1847_v56  ;;  %2412 = vmatmul.f32.gmra.mxu1 %v5386_v55 }
 0x358   : > { %2673 = vmatpush.msra.mxu1 %v2064_v50  ;;  %4150 = vmatmul.msk.f32.gmra.mxu3 %vm2177_vm2, %v5531_v26 }
 0x359   : > { %1518 = vrot.lane.b32.xlu0 %v5446_v48, %s4270_s27  ;;  %1508 = vrot.lane.b32.xlu1 %v5444_v60, %s4270_s27 }
 0x35a   : > { %1573 = vrot.lane.b32.xlu2 %v5444_v60, %s4269_s26  ;;  %2674 = vmatpush.msra.mxu1 %v2060_v18 }
 0x35b   : > { %v5546_v31 = vpop.permute.xlu0 %1764  ;;  %v5548_v24 = vpop.permute.xlu1 %1709  ;;  %2421 = vmatpush.msra.mxu2 %v5464_v52 }
 0x35c   : > { %v1782_v15 = vsel %vm1780_vm14, %v5312_v0, %v5546_v31  ;;  %v1721_v59 = vsel %vm1715_vm0, %v5283_v30, %v5548_v24  ;;  %v5558_v57 = vpop.permute.xlu2 %1504  ;;  %2675 = vmatpush.msra.mxu1 %v2056_v53  ;;  %2301 = vmatmul.f32.gmra.mxu2 %v5542_v13  ;;  %v2048_v30 = vld [vmem:[#allocation4 + $0x258] sm:$0xff] }
 0x35d   : > { %v1522_v14 = vsel %vm1520_vm9, %v5422_v42, %v5558_v57  ;;  %2422 = vmatpush.msra.mxu2 %v1782_v15  ;;  %v2044_v0 = vld [vmem:[#allocation4 + $0x238] sm:$0xff]  ;;  %v5579_v42 = vld [vmem:[%s6727_s2 + $0x70] sm:$0xff] }
 0x35e   : > { %2676 = vmatpush.msra.mxu1 %v2052_v45 }
 0x35f   : > { %2423 = vmatpush.msra.mxu2 %v1721_v59  ;;  %2415 = vmatmul.f32.gmra.mxu1 %v5412_v51 }
 0x360   : > { %2677 = vmatpush.msra.mxu1 %v2048_v30  ;;  %4151 = vmatmul.msk.f32.gmra.mxu3 %vm2177_vm2, %v5567_v16 }
 0x361   : > { %1443 = vrot.lane.b32.xlu0 %v5444_v60, %s4271_s28  ;;  %1388 = vrot.lane.b32.xlu1 %v5446_v48, %s4264_s30 }
 0x362   : > { %1453 = vrot.lane.b32.xlu2 %v5446_v48, %s4271_s28  ;;  %2678 = vmatpush.msra.mxu1 %v2044_v0 }
 0x363   : > { %v1645_v3 = vpop.permute.xlu0 %1644  ;;  %v5583_v4 = vpop.permute.xlu1 %1634  ;;  %2424 = vmatpush.msra.mxu2 %v5491_v33 }
 0x364   : > { %v1656_v6 = vsel %vm1650_vm6, %v5355_v36, %v1645_v3  ;;  %v1652_v52 = vsel %vm1650_vm6, %v5318_v8, %v5583_v4  ;;  %v5591_v1 = vpop.permute.xlu2 %1384  ;;  %2679 = vmatpush.msra.mxu1 %v2040_v20  ;;  %2304 = vmatmul.f32.gmra.mxu2 %v5579_v42  ;;  %v5612_v8 = vld [vmem:[%s6727_s2 + $0x90] sm:$0xff] }
 0x365   : > { %v1396_v61 = vsel %vm1390_vm10, %v5454_v54, %v5591_v1  ;;  %2425 = vmatpush.msra.mxu2 %v1656_v6 }
 0x367   : > { %2426 = vmatpush.msra.mxu2 %v1652_v52  ;;  %2540 = vmatmul.f32.vlgmr.msrb.gmra.mxu1 %v5297_v62 }
 0x368   : > { %4152 = vmatmul.msk.f32.gmra.mxu3 %vm2177_vm2, %v5600_v32 }
 0x369   : > { %1908 = vrot.lane.b32.xlu0 %v5446_v48, %s4272_s29  ;;  %1898 = vrot.lane.b32.xlu1 %v5444_v60, %s4272_s29 }
 0x36a   : > { %1378 = vrot.lane.b32.xlu2 %v5444_v60, %s4264_s30  ;;  %2427 = vmatpush.msra.mxu2 %v1591_v21  ;;  %v5632_v60 = vld [vmem:[%s6727_s2 + $0x98] sm:$0xff] }
 0x36b   : > { %v1570_v36 = vpop.permute.xlu0 %1569  ;;  %v5616_v54 = vpop.permute.xlu1 %1514 }
 0x36c   : > { %v1587_v25 = vsel %vm1585_vm8, %v5398_v22, %v1570_v36  ;;  %v1526_v48 = vsel %vm1520_vm9, %v5361_v58, %v5616_v54  ;;  %v5623_v35 = vpop.permute.xlu2 %1841  ;;  %2307 = vmatmul.f32.gmra.mxu2 %v5612_v8  ;;  %v5640_v58 = vld [vmem:[%s6727_s2 + $0xb0] sm:$0xff] }
 0x36d   : > { %v1852_v44 = vsel %vm1845_vm11, %v5511_v12, %v5623_v35  ;;  %2428 = vmatpush.msra.mxu2 %v1587_v25 }
 0x36f   : > { %2429 = vmatpush.msra.mxu2 %v1526_v48  ;;  %2543 = vmatmul.f32.gmra.mxu1 %v5324_v5 }
 0x370   : > { %4153 = vmatmul.msk.f32.gmra.mxu3 %vm2177_vm2, %v5632_v60 }
 0x371   : > { %2430 = vmatpush.msra.mxu2 %v1522_v14 }
 0x373   : > { %v1450_v22 = vpop.permute.xlu0 %1449  ;;  %v5642_v33 = vpop.permute.xlu1 %1439 }
 0x374   : > { %v1461_v27 = vsel %vm1455_vm1, %v5435_v46, %v1450_v22  ;;  %v1457_v39 = vsel %vm1455_vm1, %v5405_v41, %v5642_v33  ;;  %v5649_v9 = vpop.permute.xlu2 %1766  ;;  %2310 = vmatmul.f32.gmra.mxu2 %v5640_v58 }
 0x375   : > { %v1783_v12 = vsel %vm1780_vm14, %v5546_v31, %v5649_v9  ;;  %2431 = vmatpush.msra.mxu2 %v1461_v27  ;;  %v2175_v31 = vld [vmem:[#allocation4 + $0x650] sm:$0x1] }
 0x377   : > { %2432 = vmatpush.msra.mxu2 %v1457_v39  ;;  %2546 = vmatmul.f32.gmra.mxu1 %v5343_v49 }
 0x378   : > { %4154 = vmatmul.msk.f32.gmra.mxu3 %vm2177_vm2, %v5658_v63 }
 0x379   : > { %2433 = vmatpush.msra.mxu2 %v1396_v61 }
 0x37b   : > { %v5663_v41 = vpop.permute.xlu0 %1904  ;;  %v5665_v46 = vpop.permute.xlu1 %1894  ;;  %2434 = vmatpush.msra.mxu2 %v5267_v2 }
 0x37c   : > { %v1916_v28 = vsel %vm1910_vm13, %v5479_v43, %v5663_v41  ;;  %v1912_v56 = vsel %vm1910_vm13, %v5442_v19, %v5665_v46  ;;  %v5674_v21 = vpop.permute.xlu2 %1646  ;;  %2435 = vmatmul.f32.vlgmr.msra.gmra.mxu2 %v5469_v7 }
 0x37d   : > { %2559 = vmatpush.msrb.mxu2 %v1852_v44  ;;  %v1657_v29 = vsel %vm1650_vm6, %v1645_v3, %v5674_v21  ;;  %2468 = vmatpush.msra.mxu3 %v1916_v28 }
 0x37f   : > { %2469 = vmatpush.msra.mxu3 %v1912_v56  ;;  %2549 = vmatmul.f32.gmra.mxu1 %v5366_v17 }
 0x380   : > { %4156 = vmatmul.msk.f32.vlgmr.msra.gmra.mxu3 %vm2177_vm2, %v5496_v10 }
 0x381   : > { %4162 = vmatpush.msk.msrb.mxu3 %vm2196_vm12, %v2175_v31 }
 0x382   : > { %v2261_v28 = vpop.f32.mrf.mxu1 }
 0x383   : > { %v5682_v2 = vpop.permute.xlu0 %1831  ;;  %v5684_v43 = vpop.permute.xlu1 %1776 }
 0x384   : > { %v1848_v19 = vsel %vm1845_vm11, %v5513_v37, %v5682_v2  ;;  %v1787_v50 = vsel %vm1780_vm14, %v5459_v40, %v5684_v43  ;;  %v5692_v34 = vpop.permute.xlu2 %1571  ;;  %2438 = vmatmul.f32.gmra.mxu2 %v5503_v47 }
 0x385   : > { %v1588_v18 = vsel %vm1585_vm8, %v1570_v36, %v5692_v34  ;;  %2560 = vmatpush.msrb.mxu2 %v1848_v19 }
 0x387   : > { %2561 = vmatpush.msrb.mxu2 %v1787_v50  ;;  %2552 = vmatmul.f32.gmra.mxu1 %v5386_v55 }
 0x388   : > { %4157 = vmatmul.msk.f32.gmra.mxu3 %vm2177_vm2, %v5531_v26 }
 0x389   : > { %2562 = vmatpush.msrb.mxu2 %v1783_v12 }
 0x38b   : > { %v5701_v37 = vpop.permute.xlu0 %1711  ;;  %v5703_v40 = vpop.permute.xlu1 %1701 }
 0x38c   : > { %v1722_v53 = vsel %vm1715_vm0, %v5548_v24, %v5701_v37  ;;  %v1718_v15 = vsel %vm1715_vm0, %v5486_v11, %v5703_v40  ;;  %v5711_v59 = vpop.permute.xlu2 %1451  ;;  %2441 = vmatmul.f32.gmra.mxu2 %v5542_v13 }
 0x38d   : > { %v1462_v14 = vsel %vm1455_vm1, %v1450_v22, %v5711_v59  ;;  %2563 = vmatpush.msrb.mxu2 %v1722_v53 }
 0x38f   : > { %2564 = vmatpush.msrb.mxu2 %v1718_v15  ;;  %2555 = vmatmul.f32.gmra.mxu1 %v5412_v51 }
 0x390   : > { %4158 = vmatmul.msk.f32.gmra.mxu3 %vm2177_vm2, %v5567_v16 }
 0x391   : > { %2565 = vmatpush.msrb.mxu2 %v1657_v29 }
 0x393   : > { %v5719_v24 = vpop.permute.xlu0 %1636  ;;  %v5721_v45 = vpop.permute.xlu1 %1581 }
 0x394   : > { %v1653_v11 = vsel %vm1650_vm6, %v5583_v4, %v5719_v24  ;;  %v1592_v30 = vsel %vm1585_vm8, %v5523_v23, %v5721_v45  ;;  %v5729_v0 = vpop.permute.xlu2 %1376  ;;  %2444 = vmatmul.f32.gmra.mxu2 %v5579_v42 }
 0x395   : > { %v1393_v3 = vsel %vm1390_vm10, %v5260_v38, %v5729_v0  ;;  %2566 = vmatpush.msrb.mxu2 %v1653_v11 }
 0x397   : > { %2567 = vmatpush.msrb.mxu2 %v1592_v30  ;;  %2680 = vmatmul.f32.vlgmr.msra.gmra.mxu1 %v5297_v62 }
 0x398   : > { %4159 = vmatmul.msk.f32.gmra.mxu3 %vm2177_vm2, %v5600_v32 }
 0x399   : > { %2568 = vmatpush.msrb.mxu2 %v1588_v18 }
 0x39b   : > { %v5738_v4 = vpop.permute.xlu0 %1516  ;;  %v5740_v20 = vpop.permute.xlu1 %1506 }
 0x39c   : > { %v1527_v23 = vsel %vm1520_vm9, %v5616_v54, %v5738_v4  ;;  %v1523_v38 = vsel %vm1520_vm9, %v5558_v57, %v5740_v20  ;;  %v1844_v6 = vpop.permute.xlu2 %1843  ;;  %2447 = vmatmul.f32.gmra.mxu2 %v5612_v8 }
 0x39d   : > { %v1853_v52 = vsel %vm1845_vm11, %v5623_v35, %v1844_v6  ;;  %2569 = vmatpush.msrb.mxu2 %v1527_v23 }
 0x39e   : > { %1869 = vst.msk [vmem:[#allocation4 + $0x5f8] sm:$0xff] %vm379_vm3, %v1853_v52 }
 0x39f   : > { %2570 = vmatpush.msrb.mxu2 %v1523_v38  ;;  %2683 = vmatmul.f32.gmra.mxu1 %v5324_v5 }
 0x3a0   : > { %4160 = vmatmul.msk.f32.gmra.mxu3 %vm2177_vm2, %v5632_v60 }
 0x3a1   : > { %2571 = vmatpush.msrb.mxu2 %v1462_v14 }
 0x3a3   : > { %v5755_v61 = vpop.permute.xlu0 %1441  ;;  %v5757_v36 = vpop.permute.xlu1 %1386 }
 0x3a4   : > { %v1458_v57 = vsel %vm1455_vm1, %v5642_v33, %v5755_v61  ;;  %v1397_v54 = vsel %vm1390_vm10, %v5591_v1, %v5757_v36  ;;  %v1769_v62 = vpop.permute.xlu2 %1768  ;;  %2450 = vmatmul.f32.gmra.mxu2 %v5640_v58 }
 0x3a5   : > { %v1784_v25 = vsel %vm1780_vm14, %v5649_v9, %v1769_v62  ;;  %2572 = vmatpush.msrb.mxu2 %v1458_v57  ;;  %v2164_v48 = vld [vmem:[#allocation4 + $0x5f8] sm:$0xff] }
 0x3a6   : > { %1800 = vst.msk [vmem:[#allocation4 + $0x598] sm:$0xff] %vm379_vm3, %v1784_v25 }
 0x3a7   : > { %2573 = vmatpush.msrb.mxu2 %v1397_v54  ;;  %2686 = vmatmul.f32.gmra.mxu1 %v5343_v49 }
 0x3a8   : > { %4161 = vmatmul.msk.f32.gmra.mxu3 %vm2177_vm2, %v5658_v63 }
 0x3a9   : > { %2574 = vmatpush.msrb.mxu2 %v1393_v3 }
 0x3ab   : > { %2699 = vmatpush.msra.mxu2 %v2164_v48  ;;  %v5772_v35 = vpop.permute.xlu0 %1906  ;;  %v5774_v1 = vpop.permute.xlu1 %1896 }
 0x3ac   : > { %v1917_v44 = vsel %vm1910_vm13, %v5663_v41, %v5772_v35  ;;  %v1913_v5 = vsel %vm1910_vm13, %v5665_v46, %v5774_v1  ;;  %v1649_v22 = vpop.permute.xlu2 %1648  ;;  %2575 = vmatmul.f32.vlgmr.msrb.gmra.mxu2 %v5469_v7  ;;  %v2226_v46 = vpop.f32.mrf.mxu0 }
 0x3ad   : > { %v1658_v33 = vsel %vm1650_vm6, %v5674_v21, %v1649_v22  ;;  %2608 = vmatpush.msrb.mxu3 %v1917_v44  ;;  %v2152_v31 = vld [vmem:[#allocation4 + $0x598] sm:$0xff] }
 0x3ae   : > { %1674 = vst.msk [vmem:[#allocation4 + $0x538] sm:$0xff] %vm379_vm3, %v1658_v33 }
 0x3af   : > { %2609 = vmatpush.msrb.mxu3 %v1913_v5  ;;  %2689 = vmatmul.f32.gmra.mxu1 %v5366_v17 }
 0x3b0   : > { %4163 = vmatmul.msk.f32.vlgmr.msrb.gmra.mxu3 %vm2177_vm2, %v5496_v10 }
 0x3b3   : > { %v1834_v27 = vpop.permute.xlu0 %1833  ;;  %v1779_v39 = vpop.permute.xlu1 %1778 }
 0x3b4   : > { %v1849_v9 = vsel %vm1845_vm11, %v5682_v2, %v1834_v27  ;;  %v1788_v12 = vsel %vm1780_vm14, %v5684_v43, %v1779_v39  ;;  %v1574_v41 = vpop.permute.xlu2 %1573  ;;  %2578 = vmatmul.f32.gmra.mxu2 %v5503_v47  ;;  %v5806_v50 = vpop.f32.mrf.mxu0  ;;  %vm6741_vm14 = vcmask 859136  }
 0x3b5   : > { %1865 = vst.msk [vmem:[#allocation4 + $0x5d8] sm:$0xff] %vm379_vm3, %v1849_v9  ;;  %v1589_v49 = vsel %vm1585_vm8, %v5692_v34, %v1574_v41  ;;  %v2264_v34 = vpop.f32.mrf.mxu1 }
 0x3b6   : > { %1804 = vst.msk [vmem:[#allocation4 + $0x5b8] sm:$0xff] %vm379_vm3, %v1788_v12  ;;  %v2265_v12 = vadd.f32 %v2264_v34, %v5806_v50 }
 0x3b7   : > { %1605 = vst.msk [vmem:[#allocation4 + $0x4d8] sm:$0xff] %vm379_vm3, %v1589_v49  ;;  %2692 = vmatmul.f32.gmra.mxu1 %v5386_v55 }
 0x3b8   : > { %4164 = vmatmul.msk.f32.gmra.mxu3 %vm2177_vm2, %v5531_v26 }
 0x3bb   : > { %v1714_v56 = vpop.permute.xlu0 %1713  ;;  %v1704_v21 = vpop.permute.xlu1 %1703 }
 0x3bc   : > { %v1723_v29 = vsel %vm1715_vm0, %v5701_v37, %v1714_v56  ;;  %v1719_v2 = vsel %vm1715_vm0, %v5703_v40, %v1704_v21  ;;  %v1454_v43 = vpop.permute.xlu2 %1453  ;;  %v2160_v19 = vld [vmem:[#allocation4 + $0x5d8] sm:$0xff]  ;;  %2581 = vmatmul.f32.gmra.mxu2 %v5542_v13  ;;  %v5822_v11 = vpop.f32.mrf.mxu0  ;;  %vm6742_vm0 = vmmov %vm6741_vm14 }
 0x3bd   : > { %1739 = vst.msk [vmem:[#allocation4 + $0x578] sm:$0xff] %vm379_vm3, %v1723_v29  ;;  %v1463_v17 = vsel %vm1455_vm1, %v5711_v59, %v1454_v43  ;;  %2700 = vmatpush.msra.mxu2 %v2160_v19  ;;  %v2156_v18 = vld [vmem:[#allocation4 + $0x5b8] sm:$0xff]  ;;  %v2267_v3 = vpop.f32.mrf.mxu1 }
 0x3be   : > { %1735 = vst.msk [vmem:[#allocation4 + $0x558] sm:$0xff] %vm379_vm3, %v1719_v2  ;;  %v2176_v37 = vld [vmem:[#allocation4 + $0x658] sm:$0x1] }
 0x3bf   : > { %1479 = vst.msk [vmem:[#allocation4 + $0x478] sm:$0xff] %vm379_vm3, %v1463_v17  ;;  %2701 = vmatpush.msra.mxu2 %v2156_v18  ;;  %4169 = vmatpush.msk.msra.mxu3 %vm2196_vm12, %v2176_v37  ;;  %v2128_v48 = vld [vmem:[#allocation4 + $0x4d8] sm:$0xff]  ;;  %v2268_v17 = vadd.f32 %v2267_v3, %v5822_v11  ;;  %v4235_v3 = vld [vmem:[#allocation1] sm:$0xff] }
 0x3c0   : > { %4165 = vmatmul.msk.f32.gmra.mxu3 %vm2177_vm2, %v5567_v16  ;;  %2695 = vmatmul.f32.gmra.mxu1 %v5412_v51  ;;  %v2262_v51 = vadd.f32 %v2261_v28, %v2226_v46 }
 0x3c1   : > { %2702 = vmatpush.msra.mxu2 %v2152_v31 }
 0x3c3   : > { %v1639_v40 = vpop.permute.xlu0 %1638  ;;  %v1584_v53 = vpop.permute.xlu1 %1583 }
 0x3c4   : > { %v1654_v15 = vsel %vm1650_vm6, %v5719_v24, %v1639_v40  ;;  %v1593_v59 = vsel %vm1585_vm8, %v5721_v45, %v1584_v53  ;;  %v1379_v55 = vpop.permute.xlu2 %1378  ;;  %v2148_v14 = vld [vmem:[#allocation4 + $0x578] sm:$0xff]  ;;  %2584 = vmatmul.f32.gmra.mxu2 %v5579_v42  ;;  %v2235_v54 = vpop.f32.mrf.mxu0  ;;  %vm6745_vm8 = vmmov %vm6742_vm0 }
 0x3c5   : > { %1670 = vst.msk [vmem:[#allocation4 + $0x518] sm:$0xff] %vm379_vm3, %v1654_v15  ;;  %v1394_v30 = vsel %vm1390_vm10, %v5729_v0, %v1379_v55  ;;  %2703 = vmatpush.msra.mxu2 %v2148_v14  ;;  %v2144_v23 = vld [vmem:[#allocation4 + $0x558] sm:$0xff]  ;;  %v2270_v62 = vpop.f32.mrf.mxu1 }
 0x3c6   : > { %1609 = vst.msk [vmem:[#allocation4 + $0x4f8] sm:$0xff] %vm379_vm3, %v1593_v59  ;;  %v2140_v24 = vld [vmem:[#allocation4 + $0x538] sm:$0xff]  ;;  %v2271_v59 = vadd.f32 %v2270_v62, %v2235_v54 }
 0x3c7   : > { %1410 = vst.msk [vmem:[#allocation4 + $0x418] sm:$0xff] %vm379_vm3, %v1394_v30  ;;  %2704 = vmatpush.msra.mxu2 %v2144_v23  ;;  %v2781_v23 = vperm.slane %v4235_v3, 4 }
 0x3c8   : > { %4166 = vmatmul.msk.f32.gmra.mxu3 %vm2177_vm2, %v5600_v32 }
 0x3c9   : > { %2705 = vmatpush.msra.mxu2 %v2140_v24 }
 0x3cb   : > { %v1519_v45 = vpop.permute.xlu0 %1518  ;;  %v1509_v38 = vpop.permute.xlu1 %1508 }
 0x3cc   : > { %v1528_v0 = vsel %vm1520_vm9, %v5738_v4, %v1519_v45  ;;  %v1524_v6 = vsel %vm1520_vm9, %v5740_v20, %v1509_v38  ;;  %v2136_v52 = vld [vmem:[#allocation4 + $0x518] sm:$0xff]  ;;  %v2296_v57 = vpop.f32.mrf.mxu2  ;;  %2587 = vmatmul.f32.gmra.mxu2 %v5612_v8  ;;  %v2238_v39 = vpop.f32.mrf.mxu0 }
 0x3cd   : > { %1544 = vst.msk [vmem:[#allocation4 + $0x4b8] sm:$0xff] %vm379_vm3, %v1528_v0  ;;  %2706 = vmatpush.msra.mxu2 %v2136_v52  ;;  %v2132_v25 = vld [vmem:[#allocation4 + $0x4f8] sm:$0xff]  ;;  %v2297_v4 = vadd.f32 %v2296_v57, %v2262_v51  ;;  %v2273_v41 = vpop.f32.mrf.mxu1 }
 0x3ce   : > { %1540 = vst.msk [vmem:[#allocation4 + $0x498] sm:$0xff] %vm379_vm3, %v1524_v6  ;;  %v2104_v31 = vld [vmem:[#allocation4 + $0x418] sm:$0xff]  ;;  %v2274_v45 = vadd.f32 %v2273_v41, %v2238_v39 }
 0x3cf   : > { %2707 = vmatpush.msra.mxu2 %v2132_v25 }
 0x3d0   : > { %4167 = vmatmul.msk.f32.gmra.mxu3 %vm2177_vm2, %v5632_v60 }
 0x3d1   : > { %2708 = vmatpush.msra.mxu2 %v2128_v48 }
 0x3d3   : > { %v1444_v20 = vpop.permute.xlu0 %1443  ;;  %v1389_v44 = vpop.permute.xlu1 %1388 }
 0x3d4   : > { %v1459_v5 = vsel %vm1455_vm1, %v5755_v61, %v1444_v20  ;;  %v1398_v22 = vsel %vm1390_vm10, %v5757_v36, %v1389_v44  ;;  %v2124_v33 = vld [vmem:[#allocation4 + $0x4b8] sm:$0xff]  ;;  %v2331_v27 = vpop.f32.mrf.mxu3  ;;  %2590 = vmatmul.f32.gmra.mxu2 %v5640_v58  ;;  %v2241_v19 = vpop.f32.mrf.mxu0 }
 0x3d5   : > { %1475 = vst.msk [vmem:[#allocation4 + $0x458] sm:$0xff] %vm379_vm3, %v1459_v5  ;;  %2709 = vmatpush.msra.mxu2 %v2124_v33  ;;  %v2332_v9 = vadd.f32 %v2331_v27, %v2297_v4  ;;  %v2120_v46 = vld [vmem:[#allocation4 + $0x498] sm:$0xff]  ;;  %v2276_v34 = vpop.f32.mrf.mxu1 }
 0x3d6   : > { %1414 = vst.msk [vmem:[#allocation4 + $0x438] sm:$0xff] %vm379_vm3, %v1398_v22  ;;  %v2299_v49 = vpop.f32.mrf.mxu2  ;;  %v2116_v61 = vld [vmem:[#allocation4 + $0x478] sm:$0xff] }
 0x3d7   : > { %2710 = vmatpush.msra.mxu2 %v2120_v46  ;;  %2769 = vst [vmem:[%s4363_s8 + $0xa0] sm:$0xff] %v2332_v9  ;;  %v2300_v36 = vadd.f32 %v2299_v49, %v2265_v12 }
 0x3d8   : > { %4168 = vmatmul.msk.f32.gmra.mxu3 %vm2177_vm2, %v5658_v63 }
 0x3d9   : > { %2711 = vmatpush.msra.mxu2 %v2116_v61 }
 0x3db   : > { %v1909_v28 = vpop.permute.xlu0 %1908  ;;  %v1899_v56 = vpop.permute.xlu1 %1898 }
 0x3dc   : > { %v1918_v21 = vsel %vm1910_vm13, %v5772_v35, %v1909_v28  ;;  %v1914_v29 = vsel %vm1910_vm13, %v5774_v1, %v1899_v56  ;;  %v2112_v2 = vld [vmem:[#allocation4 + $0x458] sm:$0xff]  ;;  %v2334_v43 = vpop.f32.mrf.mxu3  ;;  %v2366_v53 = vpop.f32.mrf.mxu0  ;;  %vm6738_vm13 = vcmask 678912  }
 0x3dd   : > { %1934 = vst.msk [vmem:[#allocation4 + $0x638] sm:$0xff] %vm379_vm3, %v1918_v21  ;;  %2712 = vmatpush.msra.mxu2 %v2112_v2  ;;  %v2335_v50 = vadd.f32 %v2334_v43, %v2300_v36  ;;  %v2108_v18 = vld [vmem:[#allocation4 + $0x438] sm:$0xff]  ;;  %v2401_v55 = vpop.f32.mrf.mxu1 }
 0x3de   : > { %1930 = vst.msk [vmem:[#allocation4 + $0x618] sm:$0xff] %vm379_vm3, %v1914_v29  ;;  %v2402_v44 = vadd.f32 %v2401_v55, %v2366_v53 }
 0x3df   : > { %2713 = vmatpush.msra.mxu2 %v2108_v18  ;;  %2773 = vst [vmem:[%s4363_s8 + $0xc0] sm:$0xff] %v2335_v50  ;;  %v2302_v35 = vpop.f32.mrf.mxu2 }
 0x3e0   : > { %v2303_v1 = vadd.f32 %v2302_v35, %v2268_v17 }
 0x3e1   : > { %2714 = vmatpush.msra.mxu2 %v2104_v31 }
 0x3e2   : > { %2715 = vmatmul.f32.vlgmr.msra.gmra.mxu2 %v5469_v7 }
 0x3e4   : > { %v2172_v37 = vld [vmem:[#allocation4 + $0x638] sm:$0xff]  ;;  %v2337_v40 = vpop.f32.mrf.mxu3  ;;  %v2369_v38 = vpop.f32.mrf.mxu0 }
 0x3e5   : > { %2748 = vmatpush.msra.mxu3 %v2172_v37  ;;  %v2338_v15 = vadd.f32 %v2337_v40, %v2303_v1  ;;  %v2168_v14 = vld [vmem:[#allocation4 + $0x618] sm:$0xff]  ;;  %v2404_v52 = vpop.f32.mrf.mxu1 }
 0x3e6   : > { %v2405_v9 = vadd.f32 %v2404_v52, %v2369_v38 }
 0x3e7   : > { %2749 = vmatpush.msra.mxu3 %v2168_v14  ;;  %2777 = vst [vmem:[%s4363_s8 + $0xe0] sm:$0xff] %v2338_v15  ;;  %v2305_v11 = vpop.f32.mrf.mxu2 }
 0x3e8   : > { %4170 = vmatmul.msk.f32.vlgmr.msra.gmra.mxu3 %vm2177_vm2, %v5496_v10  ;;  %v2306_v30 = vadd.f32 %v2305_v11, %v2271_v59 }
 0x3ea   : > { %2718 = vmatmul.f32.gmra.mxu2 %v5503_v47  ;;  %v2277_v47 = vadd.f32 %v2276_v34, %v2241_v19 }
 0x3ec   : > { %v2340_v7 = vpop.f32.mrf.mxu3  ;;  %v2372_v25 = vpop.f32.mrf.mxu0 }
 0x3ed   : > { %v2341_v24 = vadd.f32 %v2340_v7, %v2306_v30  ;;  %v2407_v4 = vpop.f32.mrf.mxu1 }
 0x3ee   : > { %v2408_v61 = vadd.f32 %v2407_v4, %v2372_v25 }
 0x3ef   : > { %v2785_v0 = vmul.f32 %v2781_v23, %v2341_v24  ;;  %v2308_v6 = vpop.f32.mrf.mxu2 }
 0x3f0   : > { %4171 = vmatmul.msk.f32.gmra.mxu3 %vm2177_vm2, %v5531_v26  ;;  %v2309_v57 = vadd.f32 %v2308_v6, %v2274_v45 }
 0x3f1   : > { %2809 = vrot.lane.b32.xlu2 %v2785_v0, %s4247_s9 }
 0x3f2   : > { %2721 = vmatmul.f32.gmra.mxu2 %v5542_v13 }
 0x3f4   : > { %v2343_v10 = vpop.f32.mrf.mxu3 }
 0x3f5   : > { %v2344_v54 = vadd.f32 %v2343_v10, %v2309_v57  ;;  %v2410_v33 = vpop.f32.mrf.mxu1 }
 0x3f7   : > { %v2789_v51 = vmul.f32 %v2781_v23, %v2344_v54  ;;  %v2311_v62 = vpop.f32.mrf.mxu2 }
 0x3f8   : > { %4172 = vmatmul.msk.f32.gmra.mxu3 %vm2177_vm2, %v5567_v16  ;;  %v2312_v48 = vadd.f32 %v2311_v62, %v2277_v47  ;;  %v2375_v16 = vpop.f32.mrf.mxu0 }
 0x3f9   : > { %2817 = vrot.lane.b32.xlu0 %v2789_v51, %s4247_s9  ;;  %v2411_v21 = vadd.f32 %v2410_v33, %v2375_v16 }
 0x3fa   : > { %2724 = vmatmul.f32.gmra.mxu2 %v5579_v42 }
 0x3fc   : > { %v2346_v26 = vpop.f32.mrf.mxu3 }
 0x3fd   : > { %v2347_v20 = vadd.f32 %v2346_v26, %v2312_v48  ;;  %v2413_v49 = vpop.f32.mrf.mxu1 }
 0x3ff   : > { %v2793_v13 = vmul.f32 %v2781_v23, %v2347_v20  ;;  %v2436_v5 = vpop.f32.mrf.mxu2 }
 0x400   : > { %4173 = vmatmul.msk.f32.gmra.mxu3 %vm2177_vm2, %v5600_v32  ;;  %v2437_v22 = vadd.f32 %v2436_v5, %v2402_v44  ;;  %v2378_v41 = vpop.f32.mrf.mxu0 }
 0x401   : > { %2825 = vrot.lane.b32.xlu1 %v2793_v13, %s4247_s9  ;;  %v2414_v34 = vadd.f32 %v2413_v49, %v2378_v41 }
 0x402   : > { %2727 = vmatmul.f32.gmra.mxu2 %v5612_v8 }
 0x404   : > { %v2471_v27 = vpop.f32.mrf.mxu3 }
 0x405   : > { %v2472_v39 = vadd.f32 %v2471_v27, %v2437_v22  ;;  %v2416_v29 = vpop.f32.mrf.mxu1  ;;  %v4237_v27 = vld [vmem:[#allocation1 + $0x12] sm:$0xff] }
 0x407   : > { %2770 = vst [vmem:[%s4363_s8 + $0xa8] sm:$0xff] %v2472_v39  ;;  %v2439_v42 = vpop.f32.mrf.mxu2  ;;  %v2783_v39 = vperm.slane %v4237_v27, 4 }
 0x408   : > { %4174 = vmatmul.msk.f32.gmra.mxu3 %vm2177_vm2, %v5632_v60  ;;  %v2440_v12 = vadd.f32 %v2439_v42, %v2405_v9  ;;  %v2381_v60 = vpop.f32.mrf.mxu0 }
 0x409   : > { %v2417_v53 = vadd.f32 %v2416_v29, %v2381_v60 }
 0x40a   : > { %2730 = vmatmul.f32.gmra.mxu2 %v5640_v58  ;;  %v4236_v58 = vld [vmem:[#allocation1 + $0x9] sm:$0xff] }
 0x40b   : > { %v2782_v19 = vperm.slane %v4236_v58, 4 }
 0x40c   : > { %v2474_v32 = vpop.f32.mrf.mxu3 }
 0x40d   : > { %v2475_v46 = vadd.f32 %v2474_v32, %v2440_v12  ;;  %v2541_v31 = vpop.f32.mrf.mxu1 }
 0x40f   : > { %2774 = vst [vmem:[%s4363_s8 + $0xc8] sm:$0xff] %v2475_v46  ;;  %v2442_v8 = vpop.f32.mrf.mxu2 }
 0x410   : > { %4175 = vmatmul.msk.f32.gmra.mxu3 %vm2177_vm2, %v5658_v63  ;;  %v2443_v36 = vadd.f32 %v2442_v8, %v2408_v61  ;;  %v2506_v35 = vpop.f32.mrf.mxu0 }
 0x411   : > { %v2542_v23 = vadd.f32 %v2541_v31, %v2506_v35 }
 0x414   : > { %v2477_v28 = vpop.f32.mrf.mxu3 }
 0x415   : > { %v2478_v56 = vadd.f32 %v2477_v28, %v2443_v36  ;;  %v2544_v11 = vpop.f32.mrf.mxu1 }
 0x417   : > { %2778 = vst [vmem:[%s4363_s8 + $0xe8] sm:$0xff] %v2478_v56  ;;  %v2445_v2 = vpop.f32.mrf.mxu2 }
 0x418   : > { %v2446_v43 = vadd.f32 %v2445_v2, %v2411_v21  ;;  %v2509_v14 = vpop.f32.mrf.mxu0 }
 0x419   : > { %v2545_v57 = vadd.f32 %v2544_v11, %v2509_v14 }
 0x41c   : > { %v2480_v50 = vpop.f32.mrf.mxu3 }
 0x41d   : > { %v2481_v17 = vadd.f32 %v2480_v50, %v2446_v43  ;;  %v2547_v52 = vpop.f32.mrf.mxu1 }
 0x41f   : > { %v2786_v18 = vmul.f32 %v2782_v19, %v2481_v17  ;;  %v2448_v63 = vpop.f32.mrf.mxu2 }
 0x420   : > { %v2449_v1 = vadd.f32 %v2448_v63, %v2414_v34  ;;  %v2512_v0 = vpop.f32.mrf.mxu0 }
 0x421   : > { %2811 = vrot.lane.b32.xlu0 %v2786_v18, %s4247_s9  ;;  %v2548_v62 = vadd.f32 %v2547_v52, %v2512_v0 }
 0x424   : > { %v2483_v37 = vpop.f32.mrf.mxu3 }
 0x425   : > { %v2484_v40 = vadd.f32 %v2483_v37, %v2449_v1  ;;  %v2550_v48 = vpop.f32.mrf.mxu1 }
 0x427   : > { %v2790_v15 = vmul.f32 %v2782_v19, %v2484_v40  ;;  %v2451_v59 = vpop.f32.mrf.mxu2 }
 0x428   : > { %v2452_v55 = vadd.f32 %v2451_v59, %v2417_v53  ;;  %v2515_v25 = vpop.f32.mrf.mxu0 }
 0x429   : > { %2819 = vrot.lane.b32.xlu1 %v2790_v15, %s4247_s9  ;;  %v2551_v13 = vadd.f32 %v2550_v48, %v2515_v25 }
 0x42c   : > { %v2486_v30 = vpop.f32.mrf.mxu3 }
 0x42d   : > { %v2487_v3 = vadd.f32 %v2486_v30, %v2452_v55  ;;  %v2553_v16 = vpop.f32.mrf.mxu1 }
 0x42f   : > { %v2794_v7 = vmul.f32 %v2782_v19, %v2487_v3  ;;  %v2576_v24 = vpop.f32.mrf.mxu2 }
 0x430   : > { %v2577_v45 = vadd.f32 %v2576_v24, %v2542_v23  ;;  %v2518_v5 = vpop.f32.mrf.mxu0 }
 0x431   : > { %2827 = vrot.lane.b32.xlu2 %v2794_v7, %s4247_s9  ;;  %v2554_v32 = vadd.f32 %v2553_v16, %v2518_v5 }
 0x434   : > { %v2611_v38 = vpop.f32.mrf.mxu3 }
 0x435   : > { %v2612_v6 = vadd.f32 %v2611_v38, %v2577_v45  ;;  %v2556_v8 = vpop.f32.mrf.mxu1 }
 0x437   : > { %2771 = vst [vmem:[%s4363_s8 + $0xb0] sm:$0xff] %v2612_v6  ;;  %v2579_v10 = vpop.f32.mrf.mxu2 }
 0x438   : > { %v2580_v54 = vadd.f32 %v2579_v10, %v2545_v57  ;;  %v2521_v61 = vpop.f32.mrf.mxu0 }
 0x439   : > { %v2557_v56 = vadd.f32 %v2556_v8, %v2521_v61 }
 0x43c   : > { %v2614_v47 = vpop.f32.mrf.mxu3 }
 0x43d   : > { %v2615_v51 = vadd.f32 %v2614_v47, %v2580_v54  ;;  %v2681_v58 = vpop.f32.mrf.mxu1  ;;  %v4238_v47 = vld [vmem:[#allocation1 + $0x1b] sm:$0xff] }
 0x43f   : > { %2775 = vst [vmem:[%s4363_s8 + $0xd0] sm:$0xff] %v2615_v51  ;;  %v2582_v4 = vpop.f32.mrf.mxu2  ;;  %v2784_v51 = vperm.slane %v4238_v47, 4 }
 0x440   : > { %v2583_v26 = vadd.f32 %v2582_v4, %v2548_v62  ;;  %v2646_v43 = vpop.f32.mrf.mxu0 }
 0x441   : > { %v2682_v34 = vadd.f32 %v2681_v58, %v2646_v43 }
 0x444   : > { %v2617_v20 = vpop.f32.mrf.mxu3 }
 0x445   : > { %v2618_v44 = vadd.f32 %v2617_v20, %v2583_v26  ;;  %v2684_v63 = vpop.f32.mrf.mxu1 }
 0x447   : > { %2779 = vst [vmem:[%s4363_s8 + $0xf0] sm:$0xff] %v2618_v44  ;;  %v2585_v22 = vpop.f32.mrf.mxu2 }
 0x448   : > { %v2586_v33 = vadd.f32 %v2585_v22, %v2551_v13  ;;  %v2649_v18 = vpop.f32.mrf.mxu0 }
 0x449   : > { %v2685_v53 = vadd.f32 %v2684_v63, %v2649_v18 }
 0x44b   : > { %v5892_v9 = vpop.permute.xlu2 %2809 }
 0x44c   : > { %v2620_v42 = vpop.f32.mrf.mxu3  ;;  %2857 = vst.msk [vmem:[#allocation3] sm:$0xff] %vm437_vm5, %v5892_v9 }
 0x44d   : > { %v2621_v12 = vadd.f32 %v2620_v42, %v2586_v33  ;;  %v2687_v55 = vpop.f32.mrf.mxu1 }
 0x44f   : > { %v2787_v41 = vmul.f32 %v2783_v39, %v2621_v12  ;;  %v2588_v46 = vpop.f32.mrf.mxu2 }
 0x450   : > { %v2589_v49 = vadd.f32 %v2588_v46, %v2554_v32  ;;  %v2652_v59 = vpop.f32.mrf.mxu0 }
 0x451   : > { %2813 = vrot.lane.b32.xlu1 %v2787_v41, %s4247_s9  ;;  %v2688_v7 = vadd.f32 %v2687_v55, %v2652_v59 }
 0x453   : > { %v5897_v60 = vld [vmem:[#allocation3] sm:$0xff] }
 0x454   : > { %v2623_v36 = vpop.f32.mrf.mxu3 }
 0x455   : > { %v2624_v28 = vadd.f32 %v2623_v36, %v2589_v49  ;;  %v2690_v0 = vpop.f32.mrf.mxu1 }
 0x457   : > { %v2791_v21 = vmul.f32 %v2783_v39, %v2624_v28  ;;  %v2591_v29 = vpop.f32.mrf.mxu2 }
 0x458   : > { %v2592_v2 = vadd.f32 %v2591_v29, %v2557_v56  ;;  %v2655_v38 = vpop.f32.mrf.mxu0 }
 0x459   : > { %2821 = vrot.lane.b32.xlu2 %v2791_v21, %s4247_s9  ;;  %3337 = vrot.lane.b32.xlu1 %v5897_v60, %s4261_s23  ;;  %v2691_v57 = vadd.f32 %v2690_v0, %v2655_v38 }
 0x45c   : > { %v2626_v19 = vpop.f32.mrf.mxu3 }
 0x45d   : > { %v2627_v50 = vadd.f32 %v2626_v19, %v2592_v2  ;;  %v2693_v13 = vpop.f32.mrf.mxu1 }
 0x45f   : > { %v2795_v17 = vmul.f32 %v2783_v39, %v2627_v50 }
 0x460   : > { %v2658_v44 = vpop.f32.mrf.mxu0 }
 0x461   : > { %2829 = vrot.lane.b32.xlu0 %v2795_v17, %s4247_s9  ;;  %2896 = vrot.lane.b32.xlu2 %v5897_v60, %s4252_s13  ;;  %v2694_v33 = vadd.f32 %v2693_v13, %v2658_v44 }
 0x462   : > { %3241 = vrot.lane.b32.xlu1 %v5897_v60, %s4259_s21 }
 0x465   : > { %v2716_v35 = vpop.f32.mrf.mxu2  ;;  %v2696_v12 = vpop.f32.mrf.mxu1 }
 0x466   : > { %v2717_v31 = vadd.f32 %v2716_v35, %v2682_v34 }
 0x468   : > { %v2661_v42 = vpop.f32.mrf.mxu0 }
 0x469   : > { %2977 = vrot.lane.b32.xlu2 %v5897_v60, %s4257_s19  ;;  %3625 = vrot.lane.b32.xlu0 %v5897_v60, %s4270_s27  ;;  %v2697_v46 = vadd.f32 %v2696_v12, %v2661_v42  ;;  %v3815_v12 = vld [vmem:[#allocation5 + $0x360] sm:$0x1] }
 0x46a   : > { %3529 = vrot.lane.b32.xlu1 %v5897_v60, %s4271_s28  ;;  %4176 = vmatpush.msk.msrb.mxu1 %vm2196_vm12, %v3815_v12 }
 0x46b   : > { %v2818_v1 = vpop.permute.xlu0 %2817  ;;  %v2751_v37 = vpop.f32.mrf.mxu3 }
 0x46c   : > { %2862 = vst.msk [vmem:[#allocation3 + $0x28] sm:$0xff] %vm437_vm5, %v2818_v1  ;;  %v2752_v40 = vadd.f32 %v2751_v37, %v2717_v31 }
 0x46d   : > { %v2719_v15 = vpop.f32.mrf.mxu2 }
 0x46e   : > { %2772 = vst.msk [vmem:[%s4363_s8 + $0xb8] sm:$0xff] %vm379_vm3, %v2752_v40  ;;  %v2720_v14 = vadd.f32 %v2719_v15, %v2685_v53 }
 0x471   : > { %3058 = vrot.lane.b32.xlu2 %v5897_v60, %s4256_s18 }
 0x473   : > { %v2754_v11 = vpop.f32.mrf.mxu3  ;;  %v5918_v30 = vld [vmem:[#allocation3 + $0x28] sm:$0xff]  ;;  %v2826_v3 = vpop.permute.xlu1 %2825 }
 0x474   : > { %v2755_v23 = vadd.f32 %v2754_v11, %v2720_v14  ;;  %2904 = vrot.lane.b32.xlu0 %v5918_v30, %s4252_s13  ;;  %3155 = vrot.lane.b32.xlu1 %v5918_v30, %s4258_s20  ;;  %2867 = vst.msk [vmem:[#allocation3 + $0x50] sm:$0xff] %vm437_vm5, %v2826_v3  ;;  %vm6737_vm5 = vcmask 146432  }
 0x475   : > { %v2722_v24 = vpop.f32.mrf.mxu2  ;;  %vm6739_vm2 = vmmov %vm6737_vm5 }
 0x476   : > { %2776 = vst.msk [vmem:[%s4363_s8 + $0xd8] sm:$0xff] %vm379_vm3, %v2755_v23  ;;  %v2723_v45 = vadd.f32 %v2722_v24, %v2688_v7  ;;  %vm6740_vm11 = vmmov %vm6739_vm2 }
 0x479   : > { %3145 = vrot.lane.b32.xlu2 %v5897_v60, %s4258_s20 }
 0x47b   : > { %v2757_v6 = vpop.f32.mrf.mxu3  ;;  %v5937_v25 = vld [vmem:[#allocation3 + $0x50] sm:$0xff] }
 0x47c   : > { %v2758_v52 = vadd.f32 %v2757_v6, %v2723_v45  ;;  %2985 = vrot.lane.b32.xlu0 %v5918_v30, %s4257_s19  ;;  %3251 = vrot.lane.b32.xlu1 %v5918_v30, %s4259_s21 }
 0x47d   : > { %v2725_v10 = vpop.f32.mrf.mxu2 }
 0x47e   : > { %2780 = vst.msk [vmem:[%s4363_s8 + $0xf8] sm:$0xff] %vm379_vm3, %v2758_v52  ;;  %v2726_v54 = vadd.f32 %v2725_v10, %v2691_v57 }
 0x481   : > { %3539 = vrot.lane.b32.xlu2 %v5918_v30, %s4271_s28 }
 0x483   : > { %v2760_v62 = vpop.f32.mrf.mxu3 }
 0x484   : > { %v2761_v48 = vadd.f32 %v2760_v62, %v2726_v54  ;;  %3066 = vrot.lane.b32.xlu0 %v5918_v30, %s4256_s18  ;;  %2912 = vrot.lane.b32.xlu1 %v5937_v25, %s4252_s13 }
 0x485   : > { %v2728_v22 = vpop.f32.mrf.mxu2 }
 0x486   : > { %v2788_v4 = vmul.f32 %v2784_v51, %v2761_v48  ;;  %v2729_v39 = vadd.f32 %v2728_v22, %v2694_v33 }
 0x489   : > { %2815 = vrot.lane.b32.xlu2 %v2788_v4, %s4247_s9 }
 0x48b   : > { %v2828_v26 = vpop.permute.xlu2 %2827  ;;  %v2763_v27 = vpop.f32.mrf.mxu3 }
 0x48c   : > { %3635 = vrot.lane.b32.xlu0 %v5918_v30, %s4270_s27  ;;  %2993 = vrot.lane.b32.xlu1 %v5937_v25, %s4257_s19  ;;  %v5949_v20 = vsel %vm202_vm4, %v2826_v3, %v2828_v26 }
 0x48d   : > { %v2731_v49 = vpop.f32.mrf.mxu2 }
 0x48e   : > { %v2732_v8 = vadd.f32 %v2731_v49, %v2697_v46 }
 0x493   : > { %v2812_v5 = vpop.permute.xlu0 %2811  ;;  %v2766_v36 = vpop.f32.mrf.mxu3 }
 0x494   : > { %v2833_v16 = vsel %vm202_vm4, %v5892_v9, %v2812_v5  ;;  %3645 = vrot.lane.b32.xlu0 %v5937_v25, %s4270_s27  ;;  %3074 = vrot.lane.b32.xlu1 %v5937_v25, %s4256_s18  ;;  %v2764_v9 = vadd.f32 %v2763_v27, %v2729_v39  ;;  %v2767_v28 = vadd.f32 %v2766_v36, %v2732_v8 }
 0x495   : > { %3339 = vrot.lane.b32.xlu2 %v2833_v16, %s4261_s23 }
 0x496   : > { %v2792_v61 = vmul.f32 %v2784_v51, %v2764_v9  ;;  %v2796_v56 = vmul.f32 %v2784_v51, %v2767_v28 }
 0x49b   : > { %v2820_v32 = vpop.permute.xlu1 %2819 }
 0x49c   : > { %v5959_v41 = vsel %vm202_vm4, %v2818_v1, %v2820_v32  ;;  %3549 = vrot.lane.b32.xlu0 %v5937_v25, %s4271_s28  ;;  %3261 = vrot.lane.b32.xlu1 %v5937_v25, %s4259_s21 }
 0x49d   : > { %3243 = vrot.lane.b32.xlu2 %v2833_v16, %s4259_s21 }
 0x4a4   : > { %2823 = vrot.lane.b32.xlu0 %v2792_v61, %s4247_s9  ;;  %3165 = vrot.lane.b32.xlu1 %v5937_v25, %s4258_s20 }
 0x4a5   : > { %3627 = vrot.lane.b32.xlu2 %v2833_v16, %s4270_s27 }
 0x4ac   : > { %2831 = vrot.lane.b32.xlu1 %v2796_v56, %s4247_s9  ;;  %2898 = vrot.lane.b32.xlu0 %v2833_v16, %s4252_s13 }
 0x4ad   : > { %3435 = vrot.lane.b32.xlu2 %v2833_v16, %s4264_s30 }
 0x4b3   : > { %v5973_v21 = vpop.permute.xlu2 %2821 }
 0x4b4   : > { %v5977_v29 = vsel %vm202_vm4, %v2820_v32, %v5973_v21  ;;  %3531 = vrot.lane.b32.xlu1 %v2833_v16, %s4271_s28  ;;  %2979 = vrot.lane.b32.xlu0 %v2833_v16, %s4257_s19 }
 0x4b5   : > { %3157 = vrot.lane.b32.xlu2 %v5959_v41, %s4258_s20 }
 0x4bb   : > { %v5983_v2 = vpop.permute.xlu2 %2896 }
 0x4bc   : > { %2906 = vrot.lane.b32.xlu1 %v5959_v41, %s4252_s13  ;;  %3060 = vrot.lane.b32.xlu0 %v2833_v16, %s4256_s18 }
 0x4bd   : > { %3637 = vrot.lane.b32.xlu2 %v5959_v41, %s4270_s27 }
 0x4c3   : > { %v2814_v43 = vpop.permute.xlu1 %2813  ;;  %v5990_v58 = vpop.permute.xlu2 %2977 }
 0x4c4   : > { %v2834_v19 = vsel %vm202_vm4, %v2812_v5, %v2814_v43  ;;  %2987 = vrot.lane.b32.xlu1 %v5959_v41, %s4257_s19  ;;  %3147 = vrot.lane.b32.xlu0 %v2833_v16, %s4258_s20 }
 0x4c5   : > { %2914 = vrot.lane.b32.xlu2 %v5949_v20, %s4252_s13 }
 0x4cb   : > { %v5998_v50 = vpop.permute.xlu2 %3058  ;;  %v3338_v17 = vpop.permute.xlu1 %3337 }
 0x4cc   : > { %3068 = vrot.lane.b32.xlu1 %v5959_v41, %s4256_s18  ;;  %3253 = vrot.lane.b32.xlu0 %v5959_v41, %s4259_s21 }
 0x4cd   : > { %2995 = vrot.lane.b32.xlu2 %v5949_v20, %s4257_s19 }
 0x4d3   : > { %v6006_v34 = vpop.permute.xlu0 %2829  ;;  %v6008_v18 = vpop.permute.xlu2 %3145 }
 0x4d4   : > { %v6012_v35 = vsel %vm202_vm4, %v2828_v26, %v6006_v34  ;;  %3541 = vrot.lane.b32.xlu1 %v5959_v41, %s4271_s28  ;;  %3445 = vrot.lane.b32.xlu0 %v5959_v41, %s4264_s30  ;;  %v3242_v63 = vpop.permute.xlu1 %3241 }
 0x4d5   : > { %3076 = vrot.lane.b32.xlu2 %v5949_v20, %s4256_s18 }
 0x4db   : > { %v6020_v31 = vpop.permute.xlu2 %3539  ;;  %v3626_v1 = vpop.permute.xlu0 %3625 }
 0x4dc   : > { %3341 = vrot.lane.b32.xlu0 %v2834_v19, %s4261_s23  ;;  %3263 = vrot.lane.b32.xlu1 %v5949_v20, %s4259_s21  ;;  %v6027_v37 = vpop.permute.xlu1 %3529 }
 0x4dd   : > { %3167 = vrot.lane.b32.xlu2 %v5949_v20, %s4258_s20 }
 0x4e3   : > { %v2816_v40 = vpop.permute.xlu2 %2815 }
 0x4e4   : > { %v6030_v53 = vsel %vm202_vm4, %v2814_v43, %v2816_v40  ;;  %2861 = vst.msk [vmem:[#allocation3 + $0x20] sm:$0xff] %vm6737_vm5, %v2816_v40  ;;  %3245 = vrot.lane.b32.xlu0 %v2834_v19, %s4259_s21  ;;  %3551 = vrot.lane.b32.xlu1 %v5949_v20, %s4271_s28  ;;  %vm6746_vm5 = vcmask 842752  }
 0x4e5   : > { %3647 = vrot.lane.b32.xlu2 %v5949_v20, %s4270_s27 }
 0x4e6   : > { %v6038_v15 = vpop.permute.xlu0 %2904  ;;  %v3156_v59 = vpop.permute.xlu1 %3155 }
 0x4eb   : > { %v6187_v43 = vld [vmem:[#allocation3 + $0x20] sm:$0xff] }
 0x4ec   : > { %3629 = vrot.lane.b32.xlu0 %v2834_v19, %s4270_s27  ;;  %3455 = vrot.lane.b32.xlu1 %v5949_v20, %s4264_s30 }
 0x4ed   : > { %3533 = vrot.lane.b32.xlu2 %v2834_v19, %s4271_s28 }
 0x4ee   : > { %v6044_v55 = vpop.permute.xlu0 %2985  ;;  %v6046_v14 = vpop.permute.xlu1 %3251 }
 0x4ef   : > { %v6048_v11 = vpop.permute.xlu2 %3339 }
 0x4f0   : > { %v3367_v3 = vsel %vm1195_vm7, %v3338_v17, %v6048_v11 }
 0x4f1   : > { %3841 = vmatpush.msrb.mxu0 %v3367_v3 }
 0x4f4   : > { %3437 = vrot.lane.b32.xlu0 %v2834_v19, %s4264_s30  ;;  %2900 = vrot.lane.b32.xlu1 %v2834_v19, %s4252_s13 }
 0x4f5   : > { %2908 = vrot.lane.b32.xlu2 %v5977_v29, %s4252_s13 }
 0x4f6   : > { %v6056_v23 = vpop.permute.xlu0 %3066  ;;  %v2913_v7 = vpop.permute.xlu1 %2912 }
 0x4f7   : > { %v6058_v24 = vpop.permute.xlu2 %3243 }
 0x4f8   : > { %v6062_v45 = vsel %vm1130_vm15, %v3242_v63, %v6058_v24 }
 0x4fc   : > { %2981 = vrot.lane.b32.xlu1 %v2834_v19, %s4257_s19  ;;  %3159 = vrot.lane.b32.xlu0 %v5977_v29, %s4258_s20 }
 0x4fd   : > { %2989 = vrot.lane.b32.xlu2 %v5977_v29, %s4257_s19 }
 0x4fe   : > { %v3636_v38 = vpop.permute.xlu0 %3635  ;;  %v2994_v0 = vpop.permute.xlu1 %2993 }
 0x4ff   : > { %v6069_v6 = vpop.permute.xlu2 %3627 }
 0x500   : > { %v6073_v52 = vsel %vm1520_vm9, %v3626_v1, %v6069_v6 }
 0x504   : > { %3062 = vrot.lane.b32.xlu1 %v2834_v19, %s4256_s18  ;;  %3639 = vrot.lane.b32.xlu0 %v5977_v29, %s4270_s27 }
 0x505   : > { %3070 = vrot.lane.b32.xlu2 %v5977_v29, %s4256_s18 }
 0x506   : > { %v6080_v57 = vpop.permute.xlu0 %3645  ;;  %v3075_v10 = vpop.permute.xlu1 %3074 }
 0x507   : > { %v6082_v54 = vpop.permute.xlu2 %3435 }
 0x50c   : > { %3149 = vrot.lane.b32.xlu1 %v2834_v19, %s4258_s20  ;;  %3453 = vrot.lane.b32.xlu0 %v5937_v25, %s4264_s30 }
 0x50d   : > { %3543 = vrot.lane.b32.xlu2 %v5977_v29, %s4271_s28 }
 0x50e   : > { %v6089_v47 = vpop.permute.xlu0 %3549  ;;  %v6091_v51 = vpop.permute.xlu1 %3261 }
 0x50f   : > { %v6093_v62 = vpop.permute.xlu2 %3157 }
 0x510   : > { %v6097_v48 = vsel %vm6738_vm13, %v3156_v59, %v6093_v62  ;;  %vm6747_vm13 = vmmov %vm6746_vm5 }
 0x514   : > { %3255 = vrot.lane.b32.xlu1 %v5977_v29, %s4259_s21  ;;  %2916 = vrot.lane.b32.xlu0 %v6012_v35, %s4252_s13 }
 0x515   : > { %3265 = vrot.lane.b32.xlu2 %v6012_v35, %s4259_s21 }
 0x516   : > { %v2824_v4 = vpop.permute.xlu0 %2823  ;;  %v3166_v26 = vpop.permute.xlu1 %3165 }
 0x517   : > { %v6107_v44 = vsel %vm202_vm4, %v5973_v21, %v2824_v4  ;;  %2866 = vst.msk [vmem:[#allocation3 + $0x48] sm:$0xff] %vm6739_vm2, %v2824_v4  ;;  %v6110_v13 = vpop.permute.xlu2 %3637 }
 0x518   : > { %v3659_v5 = vsel %vm1520_vm9, %v3636_v38, %v6110_v13 }
 0x51c   : > { %3447 = vrot.lane.b32.xlu1 %v5977_v29, %s4264_s30  ;;  %2997 = vrot.lane.b32.xlu0 %v6012_v35, %s4257_s19 }
 0x51d   : > { %3553 = vrot.lane.b32.xlu2 %v6012_v35, %s4271_s28 }
 0x51e   : > { %v2832_v22 = vpop.permute.xlu1 %2831  ;;  %v6120_v16 = vpop.permute.xlu0 %2898 }
 0x51f   : > { %v6124_v33 = vsel %vm202_vm4, %v6006_v34, %v2832_v22  ;;  %2871 = vst.msk [vmem:[#allocation3 + $0x70] sm:$0xff] %vm6740_vm11, %v2832_v22  ;;  %v6130_v27 = vsel %vm6741_vm14, %v5983_v2, %v6120_v16  ;;  %v6132_v39 = vpop.permute.xlu2 %2914  ;;  %vm6743_vm4 = vcmask 850944   ;;  %vm6749_vm11 = vcmask 678912  }
 0x520   : > { %v6136_v42 = vsel %vm6742_vm0, %v2913_v7, %v6132_v39  ;;  %vm6744_vm6 = vmmov %vm6743_vm4 }
 0x521   : > { %vm6748_vm2 = vmmov %vm6743_vm4 }
 0x522   : > { %vm6750_vm14 = vmmov %vm6749_vm11 }
 0x523   : > { %vm6751_vm0 = vmmov %vm6746_vm5 }
 0x524   : > { %3359 = vrot.lane.b32.xlu1 %v5949_v20, %s4261_s23  ;;  %3078 = vrot.lane.b32.xlu0 %v6012_v35, %s4256_s18 }
 0x525   : > { %3457 = vrot.lane.b32.xlu2 %v6012_v35, %s4264_s30 }
 0x526   : > { %v3532_v32 = vpop.permute.xlu1 %3531  ;;  %v6145_v9 = vpop.permute.xlu0 %2979  ;;  %v6204_v63 = vld [vmem:[#allocation3 + $0x70] sm:$0xff] }
 0x527   : > { %v6149_v46 = vsel %vm1455_vm1, %v6027_v37, %v3532_v32  ;;  %v6154_v49 = vsel %vm6743_vm4, %v5990_v58, %v6145_v9  ;;  %v6156_v61 = vpop.permute.xlu2 %2995  ;;  %vm6752_vm4 = vmmov %vm6745_vm8 }
 0x528   : > { %v6160_v20 = vsel %vm6744_vm6, %v2994_v0, %v6156_v61  ;;  %vm6753_vm6 = vmmov %vm6748_vm2 }
 0x52c   : > { %3169 = vrot.lane.b32.xlu0 %v6012_v35, %s4258_s20  ;;  %3343 = vrot.lane.b32.xlu1 %v6030_v53, %s4261_s23 }
 0x52d   : > { %3361 = vrot.lane.b32.xlu2 %v6012_v35, %s4261_s23 }
 0x52e   : > { %v2907_v8 = vpop.permute.xlu1 %2906  ;;  %v6168_v36 = vpop.permute.xlu0 %3060 }
 0x52f   : > { %v6172_v28 = vsel %vm6745_vm8, %v6038_v15, %v2907_v8  ;;  %v6177_v56 = vsel %vm6746_vm5, %v5998_v50, %v6168_v36  ;;  %v6179_v21 = vpop.permute.xlu2 %3076  ;;  %vm6754_vm8 = vmmov %vm6751_vm0 }
 0x530   : > { %v3088_v2 = vsel %vm6747_vm13, %v3075_v10, %v6179_v21  ;;  %vm6755_vm5 = vmmov %vm6752_vm4 }
 0x531   : > { %vm6756_vm13 = vmmov %vm6748_vm2 }
 0x534   : > { %3649 = vrot.lane.b32.xlu0 %v6012_v35, %s4270_s27  ;;  %3247 = vrot.lane.b32.xlu1 %v6030_v53, %s4259_s21 }
 0x535   : > { %3345 = vrot.lane.b32.xlu2 %v6187_v43, %s4261_s23 }
 0x536   : > { %v2988_v58 = vpop.permute.xlu1 %2987  ;;  %v6191_v19 = vpop.permute.xlu0 %3147 }
 0x537   : > { %v6195_v50 = vsel %vm6748_vm2, %v6044_v55, %v2988_v58  ;;  %v3175_v17 = vsel %vm6749_vm11, %v6008_v18, %v6191_v19  ;;  %v6200_v34 = vpop.permute.xlu2 %3167  ;;  %v6224_v55 = vld [vmem:[#allocation3 + $0x48] sm:$0xff]  ;;  %vm6757_vm2 = vmmov %vm6749_vm11 }
 0x538   : > { %v3183_v35 = vsel %vm6750_vm14, %v3166_v26, %v6200_v34  ;;  %vm6758_vm11 = vmmov %vm6751_vm0 }
 0x539   : > { %vm6759_vm14 = vmmov %vm6757_vm2 }
 0x53c   : > { %3153 = vrot.lane.b32.xlu0 %v6187_v43, %s4258_s20  ;;  %3269 = vrot.lane.b32.xlu1 %v6204_v63, %s4259_s21 }
 0x53d   : > { %2902 = vrot.lane.b32.xlu2 %v6030_v53, %s4252_s13 }
 0x53e   : > { %v3069_v1 = vpop.permute.xlu1 %3068  ;;  %v6212_v37 = vpop.permute.xlu0 %3253 }
 0x53f   : > { %v3085_v18 = vsel %vm6751_vm0, %v6056_v23, %v3069_v1  ;;  %v3275_v40 = vsel %vm1130_vm15, %v6046_v14, %v6212_v37  ;;  %v6219_v15 = vpop.permute.xlu2 %3647  ;;  %vm6760_vm0 = vmmov %vm6752_vm4 }
 0x540   : > { %v3663_v59 = vsel %vm1520_vm9, %v6080_v57, %v6219_v15 }
 0x541   : > { %3872 = vmatpush.msrb.mxu1 %v3663_v59 }
 0x543   : > { %3873 = vmatpush.msrb.mxu1 %v3659_v5 }
 0x544   : > { %3259 = vrot.lane.b32.xlu0 %v6224_v55, %s4259_s21  ;;  %2918 = vrot.lane.b32.xlu1 %v6124_v33, %s4252_s13 }
 0x545   : > { %2983 = vrot.lane.b32.xlu2 %v6030_v53, %s4257_s19  ;;  %3874 = vmatpush.msrb.mxu1 %v6073_v52 }
 0x546   : > { %v3542_v14 = vpop.permute.xlu1 %3541  ;;  %v6233_v3 = vpop.permute.xlu0 %3445 }
 0x547   : > { %v3563_v23 = vsel %vm1455_vm1, %v6020_v31, %v3542_v14  ;;  %v6237_v7 = vpop.permute.xlu2 %3533 }
 0x548   : > { %v6241_v38 = vsel %vm1455_vm1, %v3532_v32, %v6237_v7 }
 0x54c   : > { %2910 = vrot.lane.b32.xlu0 %v6107_v44, %s4252_s13  ;;  %2999 = vrot.lane.b32.xlu1 %v6124_v33, %s4257_s19 }
 0x54d   : > { %3064 = vrot.lane.b32.xlu2 %v6030_v53, %s4256_s18 }
 0x54e   : > { %v6249_v0 = vpop.permute.xlu0 %3341  ;;  %v3264_v52 = vpop.permute.xlu1 %3263 }
 0x54f   : > { %v3368_v31 = vsel %vm1195_vm7, %v6048_v11, %v6249_v0  ;;  %v3279_v57 = vsel %vm1130_vm15, %v6091_v51, %v3264_v52  ;;  %v6256_v10 = vpop.permute.xlu2 %2908 }
 0x550   : > { %v6260_v4 = vsel %vm6752_vm4, %v2907_v8, %v6256_v10  ;;  %3842 = vmatpush.msrb.mxu0 %v3279_v57  ;;  %3893 = vmatpush.msrb.mxu2 %v3368_v31  ;;  %vm6761_vm4 = vmmov %vm6753_vm6 }
 0x552   : > { %3843 = vmatpush.msrb.mxu0 %v3275_v40 }
 0x554   : > { %2991 = vrot.lane.b32.xlu0 %v6107_v44, %s4257_s19  ;;  %3080 = vrot.lane.b32.xlu1 %v6124_v33, %s4256_s18 }
 0x555   : > { %3844 = vmatpush.msrb.mxu0 %v6062_v45  ;;  %3151 = vrot.lane.b32.xlu2 %v6030_v53, %s4258_s20 }
 0x556   : > { %v6269_v11 = vpop.permute.xlu0 %3245  ;;  %v3552_v51 = vpop.permute.xlu1 %3551 }
 0x557   : > { %v6274_v26 = vsel %vm1130_vm15, %v6058_v24, %v6269_v11  ;;  %v3567_v5 = vsel %vm1455_vm1, %v6089_v47, %v3552_v51  ;;  %3845 = vmatpush.msrb.mxu0 %v3183_v35  ;;  %v6278_v22 = vpop.permute.xlu2 %2989 }
 0x558   : > { %v6282_v45 = vsel %vm6753_vm6, %v2988_v58, %v6278_v22  ;;  %3875 = vmatpush.msrb.mxu1 %v3567_v5  ;;  %vm6762_vm6 = vmmov %vm6754_vm8 }
 0x559   : > { %3846 = vmatpush.msrb.mxu0 %v6097_v48 }
 0x55a   : > { %3876 = vmatpush.msrb.mxu1 %v3563_v23  ;;  %v3816_v23 = vld [vmem:[#allocation5 + $0x368] sm:$0x1] }
 0x55b   : > { %3847 = vmatpush.msrb.mxu0 %v3175_v17  ;;  %4180 = vmatpush.msk.msrb.mxu3 %vm2196_vm12, %v3816_v23 }
 0x55c   : > { %3072 = vrot.lane.b32.xlu0 %v6107_v44, %s4256_s18  ;;  %3351 = vrot.lane.b32.xlu1 %v5977_v29, %s4261_s23 }
 0x55d   : > { %3848 = vmatpush.msrb.mxu0 %v3088_v2  ;;  %3877 = vmatpush.msrb.mxu1 %v6149_v46 }
 0x55e   : > { %v6290_v24 = vpop.permute.xlu0 %3629  ;;  %v3456_v47 = vpop.permute.xlu1 %3455  ;;  %3257 = vrot.lane.b32.xlu2 %v6107_v44, %s4259_s21 }
 0x55f   : > { %v6297_v48 = vsel %vm1520_vm9, %v6069_v6, %v6290_v24  ;;  %3849 = vmatpush.msrb.mxu0 %v3085_v18  ;;  %v6299_v12 = vpop.permute.xlu2 %3070 }
 0x560   : > { %v6303_v29 = vsel %vm6754_vm8, %v3069_v1, %v6299_v12  ;;  %vm6763_vm8 = vmmov %vm6760_vm0 }
 0x561   : > { %3850 = vmatpush.msrb.mxu0 %v6177_v56 }
 0x563   : > { %3851 = vmatpush.msrb.mxu0 %v6160_v20 }
 0x564   : > { %3267 = vrot.lane.b32.xlu0 %v6124_v33, %s4259_s21  ;;  %3173 = vrot.lane.b32.xlu1 %v6204_v63, %s4258_s20 }
 0x565   : > { %3852 = vmatpush.msrb.mxu0 %v6195_v50 }
 0x566   : > { %v6312_v6 = vpop.permute.xlu0 %3437  ;;  %v6314_v32 = vpop.permute.xlu1 %2900  ;;  %3249 = vrot.lane.b32.xlu2 %v6187_v43, %s4259_s21 }
 0x567   : > { %v6321_v46 = vsel %vm1390_vm10, %v6082_v54, %v6312_v6  ;;  %v6326_v20 = vsel %vm6755_vm5, %v6120_v16, %v6314_v32  ;;  %3853 = vmatpush.msrb.mxu0 %v6154_v49  ;;  %v6329_v8 = vpop.permute.xlu2 %3543  ;;  %vm6764_vm5 = vmmov %vm6757_vm2 }
 0x568   : > { %v6333_v56 = vsel %vm1455_vm1, %v3542_v14, %v6329_v8 }
 0x569   : > { %3854 = vmatpush.msrb.mxu0 %v6136_v42 }
 0x56b   : > { %3855 = vmatpush.msrb.mxu0 %v6172_v28 }
 0x56c   : > { %3349 = vrot.lane.b32.xlu0 %v5959_v41, %s4261_s23  ;;  %3163 = vrot.lane.b32.xlu1 %v6224_v55, %s4258_s20 }
 0x56d   : > { %3856 = vmatpush.msrb.mxu0 %v6130_v27 }
 0x56e   : > { %v6342_v16 = vpop.permute.xlu1 %2981  ;;  %v6344_v49 = vpop.permute.xlu0 %3159  ;;  %3443 = vrot.lane.b32.xlu2 %v5918_v30, %s4264_s30 }
 0x56f   : > { %v6351_v42 = vsel %vm6756_vm13, %v6145_v9, %v6342_v16  ;;  %v6356_v41 = vsel %vm6757_vm2, %v6093_v62, %v6344_v49  ;;  %v6358_v28 = vpop.permute.xlu2 %3265  ;;  %vm6765_vm13 = vmmov %vm6761_vm4 }
 0x570   : > { %v3280_v27 = vsel %vm1130_vm15, %v3264_v52, %v6358_v28  ;;  %vm6766_vm2 = vmmov %vm6762_vm6 }
 0x571   : > { %3894 = vmatpush.msrb.mxu2 %v3280_v27 }
 0x574   : > { %3171 = vrot.lane.b32.xlu0 %v6124_v33, %s4258_s20  ;;  %3653 = vrot.lane.b32.xlu1 %v6204_v63, %s4270_s27 }
 0x576   : > { %v6366_v2 = vpop.permute.xlu1 %3062  ;;  %v6368_v9 = vpop.permute.xlu0 %3639  ;;  %3433 = vrot.lane.b32.xlu2 %v5897_v60, %s4264_s30 }
 0x577   : > { %v6375_v62 = vsel %vm6758_vm11, %v6168_v36, %v6366_v2  ;;  %v6380_v58 = vsel %vm1520_vm9, %v6110_v13, %v6368_v9  ;;  %v6382_v50 = vpop.permute.xlu2 %3553  ;;  %vm6767_vm11 = vmmov %vm6764_vm5 }
 0x578   : > { %v6386_v17 = vsel %vm1455_vm1, %v3552_v51, %v6382_v50 }
 0x57c   : > { %3161 = vrot.lane.b32.xlu0 %v6107_v44, %s4258_s20  ;;  %3643 = vrot.lane.b32.xlu1 %v6224_v55, %s4270_s27 }
 0x57e   : > { %v6392_v60 = vpop.permute.xlu1 %3149  ;;  %v3454_v36 = vpop.permute.xlu0 %3453  ;;  %3357 = vrot.lane.b32.xlu2 %v5937_v25, %s4261_s23 }
 0x57f   : > { %v3176_v13 = vsel %vm6759_vm14, %v6191_v19, %v6392_v60  ;;  %v3471_v35 = vsel %vm1390_vm10, %v3454_v36, %v3456_v47  ;;  %v6400_v1 = vpop.permute.xlu2 %3457  ;;  %vm6768_vm14 = vmmov %vm6764_vm5 }
 0x580   : > { %v6404_v18 = vsel %vm1390_vm10, %v3456_v47, %v6400_v1  ;;  %3878 = vmatpush.msrb.mxu1 %v3471_v35 }
 0x584   : > { %3651 = vrot.lane.b32.xlu0 %v6124_v33, %s4270_s27  ;;  %3555 = vrot.lane.b32.xlu1 %v6124_v33, %s4271_s28 }
 0x586   : > { %v6410_v25 = vpop.permute.xlu1 %3255  ;;  %v6412_v40 = vpop.permute.xlu0 %2916  ;;  %3347 = vrot.lane.b32.xlu2 %v5918_v30, %s4261_s23 }
 0x587   : > { %v3276_v19 = vsel %vm1130_vm15, %v6212_v37, %v6410_v25  ;;  %v6422_v59 = vsel %vm6760_vm0, %v6132_v39, %v6412_v40  ;;  %v6424_v14 = vpop.permute.xlu2 %3361 }
 0x588   : > { %3895 = vmatpush.msrb.mxu2 %v3276_v19 }
 0x58a   : > { %3896 = vmatpush.msrb.mxu2 %v6274_v26 }
 0x58c   : > { %3641 = vrot.lane.b32.xlu0 %v6107_v44, %s4270_s27  ;;  %3547 = vrot.lane.b32.xlu1 %v6224_v55, %s4271_s28 }
 0x58e   : > { %v6432_v30 = vpop.permute.xlu1 %3447  ;;  %v6434_v37 = vpop.permute.xlu0 %2997  ;;  %3631 = vrot.lane.b32.xlu2 %v6030_v53, %s4270_s27 }
 0x58f   : > { %v6441_v39 = vsel %vm1390_vm10, %v6233_v3, %v6432_v30  ;;  %v3008_v52 = vsel %vm6761_vm4, %v6156_v61, %v6434_v37  ;;  %v3346_v31 = vpop.permute.xlu2 %3345  ;;  %vm6769_vm4 = vmmov %vm6760_vm0 }
 0x594   : > { %3633 = vrot.lane.b32.xlu0 %v6187_v43, %s4270_s27  ;;  %3459 = vrot.lane.b32.xlu1 %v6124_v33, %s4264_s30 }
 0x596   : > { %v6450_v57 = vpop.permute.xlu1 %3359  ;;  %v6452_v51 = vpop.permute.xlu0 %3078  ;;  %3557 = vrot.lane.b32.xlu2 %v6204_v63, %s4271_s28 }
 0x597   : > { %v6459_v26 = vsel %vm1195_vm7, %v6450_v57, %v6424_v14  ;;  %v3089_v61 = vsel %vm6762_vm6, %v6179_v21, %v6452_v51  ;;  %v2903_v5 = vpop.permute.xlu2 %2902  ;;  %vm6770_vm6 = vmmov %vm6765_vm13 }
 0x598   : > { %v6466_v47 = vsel %vm6763_vm8, %v6314_v32, %v2903_v5  ;;  %2944 = vst.msk [vmem:[#allocation5 + $0x18] sm:$0xff] %vm379_vm3, %v2903_v5  ;;  %vm6771_vm8 = vmmov %vm6770_vm6 }
 0x59c   : > { %3545 = vrot.lane.b32.xlu0 %v6107_v44, %s4271_s28  ;;  %3451 = vrot.lane.b32.xlu1 %v6224_v55, %s4264_s30 }
 0x59e   : > { %v6473_v27 = vpop.permute.xlu0 %3169  ;;  %v3344_v36 = vpop.permute.xlu1 %3343  ;;  %3535 = vrot.lane.b32.xlu2 %v6030_v53, %s4271_s28 }
 0x59f   : > { %v3184_v21 = vsel %vm6764_vm5, %v6200_v34, %v6473_v27  ;;  %v3369_v32 = vsel %vm1195_vm7, %v6249_v0, %v3344_v36  ;;  %v3370_v35 = vsel %vm1195_vm7, %v3344_v36, %v3346_v31  ;;  %v2984_v19 = vpop.permute.xlu2 %2983  ;;  %vm6772_vm5 = vmmov %vm6766_vm2 }
 0x5a0   : > { %v6485_v23 = vsel %vm6765_vm13, %v6342_v16, %v2984_v19  ;;  %3897 = vmatpush.msrb.mxu2 %v3184_v21  ;;  %3945 = vmatpush.msra.mxu0 %v3369_v32  ;;  %3394 = vst.msk [vmem:[#allocation5 + $0x1f8] sm:$0xff] %vm379_vm3, %v3370_v35  ;;  %vm6773_vm13 = vmmov %vm6766_vm2  ;;  %v3817_v21 = vld [vmem:[#allocation5 + $0x370] sm:$0x1]  ;;  %v3818_v35 = vld [vmem:[#allocation5 + $0x378] sm:$0x1] }
 0x5a1   : > { %3025 = vst.msk [vmem:[#allocation5 + $0x78] sm:$0xff] %vm379_vm3, %v2984_v19 }
 0x5a2   : > { %3898 = vmatpush.msrb.mxu2 %v6356_v41 }
 0x5a4   : > { %3537 = vrot.lane.b32.xlu0 %v6187_v43, %s4271_s28  ;;  %3363 = vrot.lane.b32.xlu1 %v6124_v33, %s4261_s23 }
 0x5a5   : > { %3899 = vmatpush.msrb.mxu2 %v3176_v13 }
 0x5a6   : > { %v6494_v34 = vpop.permute.xlu0 %3649  ;;  %v3248_v0 = vpop.permute.xlu1 %3247  ;;  %3461 = vrot.lane.b32.xlu2 %v6204_v63, %s4264_s30 }
 0x5a7   : > { %v3664_v16 = vsel %vm1520_vm9, %v6219_v15, %v6494_v34  ;;  %v6503_v41 = vsel %vm1130_vm15, %v6269_v11, %v3248_v0  ;;  %3900 = vmatpush.msrb.mxu2 %v3089_v61  ;;  %v3065_v31 = vpop.permute.xlu2 %3064 }
 0x5a8   : > { %v6507_v33 = vsel %vm6766_vm2, %v6366_v2, %v3065_v31  ;;  %3924 = vmatpush.msrb.mxu3 %v3664_v16  ;;  %3106 = vst.msk [vmem:[#allocation5 + $0xd8] sm:$0xff] %vm379_vm3, %v3065_v31  ;;  %vm6775_vm2 = vmmov %vm6767_vm11 }
 0x5a9   : > { %3901 = vmatpush.msrb.mxu2 %v6303_v29 }
 0x5aa   : > { %3925 = vmatpush.msrb.mxu3 %v6380_v58 }
 0x5ab   : > { %3902 = vmatpush.msrb.mxu2 %v6375_v62 }
 0x5ac   : > { %3449 = vrot.lane.b32.xlu0 %v6107_v44, %s4264_s30  ;;  %3355 = vrot.lane.b32.xlu1 %v6224_v55, %s4261_s23 }
 0x5ad   : > { %3903 = vmatpush.msrb.mxu2 %v3008_v52  ;;  %3926 = vmatpush.msrb.mxu3 %v6297_v48 }
 0x5ae   : > { %v3154_v15 = vpop.permute.xlu0 %3153  ;;  %v3270_v11 = vpop.permute.xlu1 %3269  ;;  %3439 = vrot.lane.b32.xlu2 %v6030_v53, %s4264_s30 }
 0x5af   : > { %3904 = vmatpush.msrb.mxu2 %v6282_v45  ;;  %3927 = vmatpush.msrb.mxu3 %v6386_v17  ;;  %v3152_v29 = vpop.permute.xlu2 %3151 }
 0x5b0   : > { %v6524_v2 = vsel %vm6767_vm11, %v6392_v60, %v3152_v29  ;;  %v3178_v62 = vsel %vm6768_vm14, %v3152_v29, %v3154_v15  ;;  %vm3819_vm14 = vcmask 728064  }
 0x5b1   : > { %3905 = vmatpush.msrb.mxu2 %v6351_v42  ;;  %3928 = vmatpush.msrb.mxu3 %v6333_v56  ;;  %3202 = vst.msk [vmem:[#allocation5 + $0x138] sm:$0xff] %vm379_vm3, %v3178_v62 }
 0x5b3   : > { %3906 = vmatpush.msrb.mxu2 %v6422_v59  ;;  %3929 = vmatpush.msrb.mxu3 %v6241_v38 }
 0x5b4   : > { %3441 = vrot.lane.b32.xlu0 %v6187_v43, %s4264_s30  ;;  %v3770_v43 = vld [vmem:[#allocation5 + $0x1f8] sm:$0xff] }
 0x5b5   : > { %3907 = vmatpush.msrb.mxu2 %v6260_v4  ;;  %3930 = vmatpush.msrb.mxu3 %v6404_v18 }
 0x5b6   : > { %v3260_v53 = vpop.permute.xlu0 %3259  ;;  %v2919_v55 = vpop.permute.xlu1 %2918  ;;  %3365 = vrot.lane.b32.xlu2 %v6204_v63, %s4261_s23 }
 0x5b7   : > { %v6540_v45 = vsel %vm6760_vm0, %v6412_v40, %v2919_v55  ;;  %2952 = vst.msk [vmem:[#allocation5 + $0x58] sm:$0xff] %vm379_vm3, %v2919_v55  ;;  %3908 = vmatpush.msrb.mxu2 %v6326_v20  ;;  %3931 = vmatpush.msrb.mxu3 %v6441_v39 }
 0x5b8   : > { %v3258_v38 = vpop.permute.xlu2 %3257 }
 0x5b9   : > { %3997 = vmatpush.msra.mxu2 %v3770_v43  ;;  %v3277_v4 = vsel %vm1130_vm15, %v6410_v25, %v3258_v38  ;;  %v3278_v48 = vsel %vm1130_vm15, %v3258_v38, %v3260_v53  ;;  %3932 = vmatpush.msrb.mxu3 %v6321_v46 }
 0x5ba   : > { %3302 = vst.msk [vmem:[#allocation5 + $0x1b8] sm:$0xff] %vm379_vm3, %v3278_v48 }
 0x5bb   : > { %3933 = vmatpush.msrb.mxu3 %v6459_v26 }
 0x5bc   : > { %3353 = vrot.lane.b32.xlu0 %v6107_v44, %s4261_s23 }
 0x5be   : > { %v2911_v63 = vpop.permute.xlu0 %2910  ;;  %v3000_v20 = vpop.permute.xlu1 %2999 }
 0x5bf   : > { %v6555_v56 = vsel %vm6769_vm4, %v6256_v10, %v2911_v63  ;;  %2948 = vst.msk [vmem:[#allocation5 + $0x38] sm:$0xff] %vm379_vm3, %v2911_v63  ;;  %v6560_v42 = vsel %vm6770_vm6, %v6434_v37, %v3000_v20 }
 0x5c0   : > { %v3250_v46 = vpop.permute.xlu2 %3249  ;;  %3033 = vst.msk [vmem:[#allocation5 + $0xb8] sm:$0xff] %vm379_vm3, %v3000_v20 }
 0x5c1   : > { %v3274_v58 = vsel %vm1130_vm15, %v3248_v0, %v3250_v46  ;;  %v3762_v19 = vld [vmem:[#allocation5 + $0x1b8] sm:$0xff] }
 0x5c2   : > { %3298 = vst.msk [vmem:[#allocation5 + $0x198] sm:$0xff] %vm379_vm3, %v3274_v58 }
 0x5c6   : > { %v2992_v44 = vpop.permute.xlu0 %2991  ;;  %v3081_v17 = vpop.permute.xlu1 %3080 }
 0x5c7   : > { %v6567_v60 = vsel %vm6771_vm8, %v6278_v22, %v2992_v44  ;;  %3029 = vst.msk [vmem:[#allocation5 + $0x98] sm:$0xff] %vm379_vm3, %v2992_v44  ;;  %v3090_v10 = vsel %vm6772_vm5, %v6452_v51, %v3081_v17 }
 0x5c8   : > { %v3444_v13 = vpop.permute.xlu2 %3443  ;;  %3114 = vst.msk [vmem:[#allocation5 + $0x118] sm:$0xff] %vm379_vm3, %v3081_v17 }
 0x5c9   : > { %v3467_v18 = vsel %vm1390_vm10, %v3444_v13, %v6233_v3 }
 0x5ca   : > { %3879 = vmatpush.msrb.mxu1 %v3467_v18 }
 0x5ce   : > { %v3073_v25 = vpop.permute.xlu0 %3072  ;;  %v6575_v40 = vpop.permute.xlu1 %3351 }
 0x5cf   : > { %v3087_v59 = vsel %vm6773_vm13, %v6299_v12, %v3073_v25  ;;  %3110 = vst.msk [vmem:[#allocation5 + $0xf8] sm:$0xff] %vm379_vm3, %v3073_v25  ;;  %v3722_v25 = vld [vmem:[#allocation5 + $0x78] sm:$0xff] }
 0x5d0   : > { %v3434_v22 = vpop.permute.xlu2 %3433 }
 0x5d1   : > { %v3463_v37 = vsel %vm1390_vm10, %v3434_v22, %v6082_v54 }
 0x5d2   : > { %3880 = vmatpush.msrb.mxu1 %v3463_v37  ;;  %v3718_v37 = vld [vmem:[#allocation5 + $0x58] sm:$0xff] }
 0x5d6   : > { %v3268_v39 = vpop.permute.xlu0 %3267  ;;  %v3174_v52 = vpop.permute.xlu1 %3173  ;;  %v3738_v44 = vld [vmem:[#allocation5 + $0xf8] sm:$0xff] }
 0x5d7   : > { %v3281_v3 = vsel %vm1130_vm15, %v6358_v28, %v3268_v39  ;;  %v3282_v51 = vsel %vm1130_vm15, %v3268_v39, %v3270_v11  ;;  %vm6774_vm15 = vmmov %vm6767_vm11 }
 0x5d8   : > { %v3358_v26 = vpop.permute.xlu2 %3357  ;;  %3946 = vmatpush.msra.mxu0 %v3281_v3  ;;  %3306 = vst.msk [vmem:[#allocation5 + $0x1d8] sm:$0xff] %vm379_vm3, %v3282_v51  ;;  %vm6777_vm11 = vmmov %vm6775_vm2  ;;  %v3714_v51 = vld [vmem:[#allocation5 + $0x38] sm:$0xff] }
 0x5d9   : > { %v3375_v12 = vsel %vm1195_vm7, %v3358_v26, %v6450_v57  ;;  %v3758_v57 = vld [vmem:[#allocation5 + $0x198] sm:$0xff]  ;;  %v3703_v26 = vld [vmem:[%s6728_s3 + $0x10] sm:$0xff] }
 0x5da   : > { %3947 = vmatpush.msra.mxu0 %v3277_v4  ;;  %3881 = vmatpush.msrb.mxu1 %v3375_v12  ;;  %v6661_v12 = vld [vmem:[%s6728_s3 + $0x18] sm:$0xff] }
 0x5dc   : > { %3948 = vmatpush.msra.mxu0 %v6503_v41 }
 0x5de   : > { %v3350_v54 = vpop.permute.xlu0 %3349  ;;  %v3164_v61 = vpop.permute.xlu1 %3163 }
 0x5df   : > { %v3372_v5 = vsel %vm1195_vm7, %v3350_v54, %v6575_v40  ;;  %v3766_v36 = vld [vmem:[#allocation5 + $0x1d8] sm:$0xff] }
 0x5e0   : > { %v3348_v28 = vpop.permute.xlu2 %3347  ;;  %3934 = vmatpush.msrb.mxu3 %v3372_v5  ;;  %3998 = vmatpush.msra.mxu2 %v3766_v36 }
 0x5e1   : > { %v3371_v32 = vsel %vm1195_vm7, %v3348_v28, %v3350_v54 }
 0x5e2   : > { %3882 = vmatpush.msrb.mxu1 %v3371_v32  ;;  %4188 = vmatpush.msk.msra.mxu3 %vm2196_vm12, %v3818_v35 }
 0x5e3   : > { %3999 = vmatpush.msra.mxu2 %v3762_v19 }
 0x5e4   : > { %4184 = vmatpush.msk.msra.mxu1 %vm2196_vm12, %v3817_v21  ;;  %vm6776_vm12 = vmmov %vm6775_vm2  ;;  %v3705_v21 = vld [vmem:[%s6728_s3 + $0x20] sm:$0xff] }
 0x5e5   : > { %4000 = vmatpush.msra.mxu2 %v3758_v57 }
 0x5e6   : > { %v3172_v0 = vpop.permute.xlu0 %3171  ;;  %v3654_v16 = vpop.permute.xlu1 %3653 }
 0x5e7   : > { %v3185_v41 = vsel %vm6774_vm15, %v6473_v27, %v3172_v0  ;;  %v3186_v31 = vsel %vm6775_vm2, %v3172_v0, %v3174_v52 }
 0x5e8   : > { %v6597_v15 = vpop.permute.xlu2 %3631  ;;  %3949 = vmatpush.msra.mxu0 %v3185_v41  ;;  %3210 = vst.msk [vmem:[#allocation5 + $0x178] sm:$0xff] %vm379_vm3, %v3186_v31 }
 0x5e9   : > { %v3657_v11 = vsel %vm1520_vm9, %v6290_v24, %v6597_v15 }
 0x5ee   : > { %v3162_v29 = vpop.permute.xlu0 %3161  ;;  %v3644_v62 = vpop.permute.xlu1 %3643 }
 0x5ef   : > { %v3181_v53 = vsel %vm6776_vm12, %v6344_v49, %v3162_v29  ;;  %v3182_v55 = vsel %vm6777_vm11, %v3162_v29, %v3164_v61  ;;  %v3754_v43 = vld [vmem:[#allocation5 + $0x178] sm:$0xff] }
 0x5f0   : > { %v3558_v27 = vpop.permute.xlu2 %3557  ;;  %3950 = vmatpush.msra.mxu0 %v3181_v53  ;;  %3206 = vst.msk [vmem:[#allocation5 + $0x158] sm:$0xff] %vm379_vm3, %v3182_v55  ;;  %4001 = vmatpush.msra.mxu2 %v3754_v43 }
 0x5f2   : > { %3951 = vmatpush.msra.mxu0 %v6524_v2  ;;  %v3746_v2 = vld [vmem:[#allocation5 + $0x138] sm:$0xff] }
 0x5f4   : > { %3952 = vmatpush.msra.mxu0 %v3090_v10  ;;  %v3734_v10 = vld [vmem:[#allocation5 + $0xd8] sm:$0xff] }
 0x5f6   : > { %v3652_v38 = vpop.permute.xlu0 %3651  ;;  %v3556_v4 = vpop.permute.xlu1 %3555  ;;  %3953 = vmatpush.msra.mxu0 %v3087_v59 }
 0x5f7   : > { %v3665_v24 = vsel %vm1520_vm9, %v6494_v34, %v3652_v38  ;;  %v3666_v48 = vsel %vm1520_vm9, %v3652_v38, %v3654_v16  ;;  %v3569_v49 = vsel %vm1455_vm1, %v6382_v50, %v3556_v4  ;;  %v3570_v63 = vsel %vm1455_vm1, %v3556_v4, %v3558_v27  ;;  %v3750_v20 = vld [vmem:[#allocation5 + $0x158] sm:$0xff] }
 0x5f8   : > { %v6614_v46 = vpop.permute.xlu2 %3535  ;;  %3954 = vmatpush.msra.mxu0 %v6507_v33  ;;  %3976 = vmatpush.msra.mxu1 %v3665_v24  ;;  %3690 = vst.msk [vmem:[#allocation5 + $0x358] sm:$0xff] %vm379_vm3, %v3666_v48  ;;  %v3742_v50 = vld [vmem:[#allocation5 + $0x118] sm:$0xff] }
 0x5f9   : > { %4002 = vmatpush.msra.mxu2 %v3750_v20  ;;  %v6621_v34 = vsel %vm1455_vm1, %v6237_v7, %v6614_v46  ;;  %3594 = vst.msk [vmem:[#allocation5 + $0x2f8] sm:$0xff] %vm379_vm3, %v3570_v63 }
 0x5fa   : > { %3955 = vmatpush.msra.mxu0 %v6560_v42 }
 0x5fb   : > { %4003 = vmatpush.msra.mxu2 %v3746_v2 }
 0x5fc   : > { %3956 = vmatpush.msra.mxu0 %v6567_v60  ;;  %v3730_v60 = vld [vmem:[#allocation5 + $0xb8] sm:$0xff] }
 0x5fd   : > { %4004 = vmatpush.msra.mxu2 %v3742_v50 }
 0x5fe   : > { %v3642_v33 = vpop.permute.xlu0 %3641  ;;  %v3548_v58 = vpop.permute.xlu1 %3547  ;;  %3957 = vmatpush.msra.mxu0 %v6485_v23  ;;  %v3726_v23 = vld [vmem:[#allocation5 + $0x98] sm:$0xff] }
 0x5ff   : > { %v3661_v17 = vsel %vm1520_vm9, %v6368_v9, %v3642_v33  ;;  %v3662_v7 = vsel %vm1520_vm9, %v3642_v33, %v3644_v62  ;;  %4005 = vmatpush.msra.mxu2 %v3738_v44  ;;  %v3814_v42 = vld [vmem:[#allocation5 + $0x358] sm:$0xff]  ;;  %v3701_v9 = vld [vmem:[%s6728_s3] sm:$0xff] }
 0x600   : > { %v3462_v13 = vpop.permute.xlu2 %3461  ;;  %3958 = vmatpush.msra.mxu0 %v6540_v45  ;;  %3977 = vmatpush.msra.mxu1 %v3661_v17  ;;  %3686 = vst.msk [vmem:[#allocation5 + $0x338] sm:$0xff] %vm379_vm3, %v3662_v7  ;;  %v6640_v45 = vld [vmem:[%s6728_s3 + $0x8] sm:$0xff] }
 0x601   : > { %4006 = vmatpush.msra.mxu2 %v3734_v10  ;;  %4028 = vmatpush.msra.mxu3 %v3814_v42  ;;  %v3802_v28 = vld [vmem:[#allocation5 + $0x2f8] sm:$0xff] }
 0x602   : > { %3959 = vmatpush.msra.mxu0 %v6555_v56  ;;  %3978 = vmatpush.msra.mxu1 %v3657_v11 }
 0x603   : > { %4007 = vmatpush.msra.mxu2 %v3730_v60  ;;  %4181 = vmatmul.msk.f32.vlgmr.msrb.gmra.mxu3 %vm3819_vm14, %v6640_v45 }
 0x604   : > { %3960 = vmatpush.msra.mxu0 %v6466_v47  ;;  %3979 = vmatpush.msra.mxu1 %v3569_v49 }
 0x605   : > { %4008 = vmatpush.msra.mxu2 %v3726_v23  ;;  %3857 = vmatmul.f32.vlgmr.msrb.gmra.mxu0 %v3701_v9 }
 0x606   : > { %v3634_v56 = vpop.permute.xlu0 %3633  ;;  %v3460_v18 = vpop.permute.xlu1 %3459  ;;  %3909 = vmatmul.f32.vlgmr.msrb.gmra.mxu2 %v3701_v9  ;;  %4177 = vmatmul.msk.f32.vlgmr.msrb.gmra.mxu1 %vm3819_vm14, %v6640_v45 }
 0x607   : > { %v3658_v47 = vsel %vm1520_vm9, %v6597_v15, %v3634_v56  ;;  %v3473_v59 = vsel %vm1390_vm10, %v6400_v1, %v3460_v18  ;;  %4009 = vmatpush.msra.mxu2 %v3722_v25  ;;  %v3474_v22 = vsel %vm1390_vm10, %v3460_v18, %v3462_v13  ;;  %v3810_v39 = vld [vmem:[#allocation5 + $0x338] sm:$0xff] }
 0x608   : > { %3682 = vst.msk [vmem:[#allocation5 + $0x318] sm:$0xff] %vm379_vm3, %v3658_v47  ;;  %v3440_v52 = vpop.permute.xlu2 %3439  ;;  %4029 = vmatpush.msra.mxu3 %v3810_v39  ;;  %v3710_v1 = vld [vmem:[#allocation5 + $0x18] sm:$0xff] }
 0x609   : > { %4010 = vmatpush.msra.mxu2 %v3718_v37  ;;  %v3465_v3 = vsel %vm1390_vm10, %v6312_v6, %v3440_v52  ;;  %3498 = vst.msk [vmem:[#allocation5 + $0x298] sm:$0xff] %vm379_vm3, %v3474_v22 }
 0x60b   : > { %4011 = vmatpush.msra.mxu2 %v3714_v51  ;;  %4182 = vmatmul.msk.f32.gmra.mxu3 %vm3819_vm14, %v6661_v12 }
 0x60d   : > { %4012 = vmatpush.msra.mxu2 %v3710_v1  ;;  %3860 = vmatmul.f32.gmra.mxu0 %v3703_v26 }
 0x60e   : > { %v3546_v54 = vpop.permute.xlu0 %3545  ;;  %v3452_v6 = vpop.permute.xlu1 %3451  ;;  %3912 = vmatmul.f32.gmra.mxu2 %v3703_v26  ;;  %4178 = vmatmul.msk.f32.gmra.mxu1 %vm3819_vm14, %v6661_v12 }
 0x60f   : > { %v3565_v61 = vsel %vm1455_vm1, %v6329_v8, %v3546_v54  ;;  %v3566_v5 = vsel %vm1455_vm1, %v3546_v54, %v3548_v58  ;;  %v3806_v36 = vld [vmem:[#allocation5 + $0x318] sm:$0xff] }
 0x610   : > { %4030 = vmatpush.msra.mxu3 %v3806_v36  ;;  %3980 = vmatpush.msra.mxu1 %v3565_v61  ;;  %3590 = vst.msk [vmem:[#allocation5 + $0x2d8] sm:$0xff] %vm379_vm3, %v3566_v5  ;;  %v3706_v8 = vld [vmem:[%s6728_s3 + $0x28] sm:$0xff]  ;;  %v3366_v32 = vpop.permute.xlu2 %3365 }
 0x612   : > { %4031 = vmatpush.msra.mxu3 %v3802_v28  ;;  %3981 = vmatpush.msra.mxu1 %v6621_v34 }
 0x613   : > { %4183 = vmatmul.msk.f32.gmra.mxu3 %vm3819_vm14, %v3706_v8 }
 0x614   : > { %3982 = vmatpush.msra.mxu1 %v3473_v59 }
 0x615   : > { %3863 = vmatmul.f32.gmra.mxu0 %v3705_v21 }
 0x616   : > { %v3538_v35 = vpop.permute.xlu0 %3537  ;;  %v3364_v19 = vpop.permute.xlu1 %3363  ;;  %3915 = vmatmul.f32.gmra.mxu2 %v3705_v21  ;;  %4179 = vmatmul.msk.f32.gmra.mxu1 %vm3819_vm14, %v3706_v8 }
 0x617   : > { %v3562_v57 = vsel %vm1455_vm1, %v6614_v46, %v3538_v35  ;;  %v3377_v0 = vsel %vm1195_vm7, %v6424_v14, %v3364_v19  ;;  %v3378_v16 = vsel %vm1195_vm7, %v3364_v19, %v3366_v32  ;;  %v3798_v41 = vld [vmem:[#allocation5 + $0x2d8] sm:$0xff] }
 0x618   : > { %3586 = vst.msk [vmem:[#allocation5 + $0x2b8] sm:$0xff] %vm379_vm3, %v3562_v57  ;;  %4032 = vmatpush.msra.mxu3 %v3798_v41  ;;  %v3790_v14 = vld [vmem:[#allocation5 + $0x298] sm:$0xff] }
 0x619   : > { %3402 = vst.msk [vmem:[#allocation5 + $0x238] sm:$0xff] %vm379_vm3, %v3378_v16 }
 0x61d   : > { %3961 = vmatmul.f32.vlgmr.msra.gmra.mxu0 %v3701_v9 }
 0x61e   : > { %v3450_v31 = vpop.permute.xlu0 %3449  ;;  %4013 = vmatmul.f32.vlgmr.msra.gmra.mxu2 %v3701_v9 }
 0x61f   : > { %v3469_v15 = vsel %vm1390_vm10, %v6432_v30, %v3450_v31  ;;  %v3470_v11 = vsel %vm1390_vm10, %v3450_v31, %v3452_v6  ;;  %v3794_v29 = vld [vmem:[#allocation5 + $0x2b8] sm:$0xff]  ;;  %v3356_v30 = vpop.permute.xlu1 %3355 }
 0x620   : > { %4033 = vmatpush.msra.mxu3 %v3794_v29  ;;  %3983 = vmatpush.msra.mxu1 %v3469_v15  ;;  %3494 = vst.msk [vmem:[#allocation5 + $0x278] sm:$0xff] %vm379_vm3, %v3470_v11  ;;  %v3778_v24 = vld [vmem:[#allocation5 + $0x238] sm:$0xff] }
 0x622   : > { %4034 = vmatpush.msra.mxu3 %v3790_v14  ;;  %3984 = vmatpush.msra.mxu1 %v3465_v3 }
 0x624   : > { %3985 = vmatpush.msra.mxu1 %v3377_v0 }
 0x625   : > { %3964 = vmatmul.f32.gmra.mxu0 %v3703_v26 }
 0x626   : > { %v3442_v62 = vpop.permute.xlu0 %3441  ;;  %4016 = vmatmul.f32.gmra.mxu2 %v3703_v26 }
 0x627   : > { %v3466_v53 = vsel %vm1390_vm10, %v3440_v52, %v3442_v62  ;;  %v3786_v55 = vld [vmem:[#allocation5 + $0x278] sm:$0xff] }
 0x628   : > { %3490 = vst.msk [vmem:[#allocation5 + $0x258] sm:$0xff] %vm379_vm3, %v3466_v53  ;;  %4035 = vmatpush.msra.mxu3 %v3786_v55 }
 0x62d   : > { %3967 = vmatmul.f32.gmra.mxu0 %v3705_v21 }
 0x62e   : > { %v3354_v43 = vpop.permute.xlu0 %3353  ;;  %4019 = vmatmul.f32.gmra.mxu2 %v3705_v21 }
 0x62f   : > { %v3373_v27 = vsel %vm1195_vm7, %v6575_v40, %v3354_v43  ;;  %v3374_v38 = vsel %vm1195_vm7, %v3354_v43, %v3356_v30  ;;  %v3782_v4 = vld [vmem:[#allocation5 + $0x258] sm:$0xff] }
 0x630   : > { %4036 = vmatpush.msra.mxu3 %v3782_v4  ;;  %3986 = vmatpush.msra.mxu1 %v3373_v27  ;;  %3398 = vst.msk [vmem:[#allocation5 + $0x218] sm:$0xff] %vm379_vm3, %v3374_v38 }
 0x631   : > { %4185 = vmatmul.msk.f32.vlgmr.msra.gmra.mxu1 %vm3819_vm14, %v6640_v45 }
 0x632   : > { %4037 = vmatpush.msra.mxu3 %v3778_v24 }
 0x637   : > { %v3774_v48 = vld [vmem:[#allocation5 + $0x218] sm:$0xff] }
 0x638   : > { %4038 = vmatpush.msra.mxu3 %v3774_v48 }
 0x639   : > { %4186 = vmatmul.msk.f32.gmra.mxu1 %vm3819_vm14, %v6661_v12  ;;  %4189 = vmatmul.msk.f32.vlgmr.msra.gmra.mxu3 %vm3819_vm14, %v6640_v45 }
 0x641   : > { %4187 = vmatmul.msk.f32.gmra.mxu1 %vm3819_vm14, %v3706_v8  ;;  %4190 = vmatmul.msk.f32.gmra.mxu3 %vm3819_vm14, %v6661_v12 }
 0x649   : > { %4191 = vmatmul.msk.f32.gmra.mxu3 %vm3819_vm14, %v3706_v8 }
 0x682   : > { %v3858_v40 = vpop.f32.mrf.mxu0 }
 0x683   : > { %v3884_v49 = vpop.f32.mrf.mxu1 }
 0x684   : > { %v3885_v63 = vadd.f32 %v3884_v49, %v3858_v40 }
 0x686   : > { %4049 = vst [vmem:[%s4363_s8 + $0x100] sm:$0xff] %v3885_v63  ;;  %v3936_v20 = vpop.f32.mrf.mxu3 }
 0x689   : > { %v3910_v46 = vpop.f32.mrf.mxu2 }
 0x68a   : > { %v3937_v34 = vadd.f32 %v3936_v20, %v3910_v46  ;;  %v3861_v2 = vpop.f32.mrf.mxu0 }
 0x68b   : > { %v3887_v50 = vpop.f32.mrf.mxu1 }
 0x68c   : > { %4050 = vst [vmem:[%s4363_s8 + $0x108] sm:$0xff] %v3937_v34  ;;  %v3888_v33 = vadd.f32 %v3887_v50, %v3861_v2 }
 0x68e   : > { %4053 = vst [vmem:[%s4363_s8 + $0x120] sm:$0xff] %v3888_v33  ;;  %v3939_v58 = vpop.f32.mrf.mxu3 }
 0x691   : > { %v3913_v44 = vpop.f32.mrf.mxu2 }
 0x692   : > { %v3940_v17 = vadd.f32 %v3939_v58, %v3913_v44  ;;  %v3864_v7 = vpop.f32.mrf.mxu0 }
 0x693   : > { %v3890_v10 = vpop.f32.mrf.mxu1 }
 0x694   : > { %4054 = vst [vmem:[%s4363_s8 + $0x128] sm:$0xff] %v3940_v17  ;;  %v3891_v42 = vadd.f32 %v3890_v10, %v3864_v7 }
 0x696   : > { %4057 = vst [vmem:[%s4363_s8 + $0x140] sm:$0xff] %v3891_v42  ;;  %v3942_v13 = vpop.f32.mrf.mxu3 }
 0x699   : > { %v3916_v60 = vpop.f32.mrf.mxu2 }
 0x69a   : > { %v3943_v23 = vadd.f32 %v3942_v13, %v3916_v60  ;;  %v3962_v9 = vpop.f32.mrf.mxu0 }
 0x69c   : > { %4058 = vst [vmem:[%s4363_s8 + $0x148] sm:$0xff] %v3943_v23 }
 0x6a1   : > { %v4014_v47 = vpop.f32.mrf.mxu2 }
 0x6a2   : > { %v3965_v18 = vpop.f32.mrf.mxu0 }
 0x6a9   : > { %v4017_v51 = vpop.f32.mrf.mxu2 }
 0x6aa   : > { %v3968_v22 = vpop.f32.mrf.mxu0 }
 0x6ae   : > { %v3988_v45 = vpop.f32.mrf.mxu1 }
 0x6af   : > { %v3989_v56 = vadd.f32 %v3988_v45, %v3962_v9 }
 0x6b1   : > { %4051 = vst [vmem:[%s4363_s8 + $0x110] sm:$0xff] %v3989_v56  ;;  %v4020_v12 = vpop.f32.mrf.mxu2 }
 0x6b6   : > { %v3991_v25 = vpop.f32.mrf.mxu1 }
 0x6b7   : > { %v3992_v59 = vadd.f32 %v3991_v25, %v3965_v18 }
 0x6b9   : > { %4055 = vst [vmem:[%s4363_s8 + $0x130] sm:$0xff] %v3992_v59 }
 0x6bc   : > { %v4040_v37 = vpop.f32.mrf.mxu3 }
 0x6bd   : > { %v4041_v39 = vadd.f32 %v4040_v37, %v4014_v47 }
 0x6be   : > { %v3994_v52 = vpop.f32.mrf.mxu1 }
 0x6bf   : > { %v3995_v3 = vadd.f32 %v3994_v52, %v3968_v22  ;;  %4052 = vst.msk [vmem:[%s4363_s8 + $0x118] sm:$0xff] %vm379_vm3, %v4041_v39 }
 0x6c1   : > { %4059 = vst [vmem:[%s4363_s8 + $0x150] sm:$0xff] %v3995_v3 }
 0x6c4   : > { %v4043_v1 = vpop.f32.mrf.mxu3 }
 0x6c5   : > { %v4044_v26 = vadd.f32 %v4043_v1, %v4017_v51 }
 0x6c7   : > { %4056 = vst.msk [vmem:[%s4363_s8 + $0x138] sm:$0xff] %vm379_vm3, %v4044_v26 }
 0x6cc   : > { %v4046_v54 = vpop.f32.mrf.mxu3 }
 0x6cd   : > { %v4047_v6 = vadd.f32 %v4046_v54, %v4020_v12 }
 0x6cf   : > { %4060 = vst.msk [vmem:[%s4363_s8 + $0x158] sm:$0xff] %vm379_vm3, %v4047_v6 }
 0x6d0 PF: > { %s14_s15 = sadd.s32 1, %s4245_s15  }
 0x6d1   : > { %p11_p4 = scmp.ge.s32.totalorder %s14_s15, 4  }
 0x6d3   :  { %13 = sbr.rel (!%p11_p4) target bundleno = 1 (0x1), region = 70 }

</bundles_post_ra>
